<compile_context>
chip_gen: v7x
topology: tpu7x:2x2x1
jax: 0.10.0
libtpu: 0.0.40
codegen_flags: <defaults>
</compile_context>

<pallas_src>
import functools

import jax
import jax.numpy as jnp
from jax import lax
from jax.experimental import pallas as pl
from jax.experimental.pallas import tpu as pltpu

LEAKY_SLOPE = 0.2
BN_EPS = 1e-5

MATMUL_DTYPE = jnp.bfloat16   # MXU operand dtype (bf16-native on v5e/v6e/v7x)
ACT_DTYPE = jnp.bfloat16      # inter-layer activation (canvas) dtype


@functools.lru_cache(maxsize=None)
def _vmem_limit_bytes():
    """Per-generation scoped-VMEM limit: ~48 MiB on v7x (64 MiB physical),
    ~96 MiB on v5e/v6e (128 MiB physical)."""
    try:
        cap = int(getattr(pltpu.get_tpu_info(), "vmem_capacity_bytes",
                          64 * 1024 * 1024))
    except Exception:  # pragma: no cover - conservative fallback
        cap = 64 * 1024 * 1024
    return int(min(cap * 3 // 4, 96 * 1024 * 1024))


# ----------------------------- Pallas kernels ------------------------------

def _tap_conv_kernel(x_ref, w_ref, b_ref, sc_ref, sh_ref, o_ref, *,
                     shifts, base, l_out, wc, w_valid, wbase, tail):
    """Fused multi-tap conv + bias + LeakyReLU(0.2) + folded-BN, canvas out.

    x_ref  : (1, Cin, Hc*Wc)   flattened zero-bordered input canvas (bf16)
    w_ref  : (Cb, T*Cin)       taps folded into one contraction (bf16)
    b_ref  : (Cb, 1)  sc_ref/sh_ref : (Cb, 1)   f32 epilogue params
    o_ref  : (1, Cb, Hc*Wc)    flattened output canvas (bf16)

    One MXU matmul over a (T*Cin, Lout) RHS built from lane-shifted views of
    the VMEM-resident tile; the wrap-around garbage columns land exactly on
    the output-canvas border and are zero-masked so the next layer reads
    correct padding with no host-side pad/slice.
    """
    # RHS: T lane-shifted views of the resident flattened canvas.
    rhs = jnp.concatenate(
        [x_ref[0, :, pl.ds(base + s, l_out)] for s in shifts], axis=0)
    acc = jnp.dot(w_ref[...], rhs, preferred_element_type=jnp.float32)
    acc = acc + b_ref[...]                                   # bias
    acc = jnp.maximum(acc, LEAKY_SLOPE * acc)                # LeakyReLU(0.2)
    acc = acc * sc_ref[...] + sh_ref[...]                    # folded BatchNorm
    # Mask wrap-around columns -> they are the zero border of the out canvas.
    col = (lax.broadcasted_iota(jnp.int32, (1, l_out), 1) + (wbase % wc)) % wc
    acc = jnp.where(jnp.logical_and(col >= 1, col <= w_valid), acc, 0.0)

    cb = o_ref.shape[1]
    o_ref[0, :, pl.ds(0, wbase)] = jnp.zeros((cb, wbase), o_ref.dtype)
    o_ref[0, :, pl.ds(wbase, l_out)] = acc.astype(o_ref.dtype)
    o_ref[0, :, pl.ds(wbase + l_out, tail)] = jnp.zeros((cb, tail), o_ref.dtype)


def _maxpool_kernel(ev_ref, od_ref, out_ref, *, wo):
    """2x2/stride-2 max pool: contiguous loads + pure VPU max (no MXU).

    ev_ref / od_ref : (1, C*Ho, 2*Wo)  even / odd column planes, each row is
                      [input row 2a | input row 2a+1] of that plane.
    """
    m_e = jnp.maximum(ev_ref[0, :, pl.ds(0, wo)], ev_ref[0, :, pl.ds(wo, wo)])
    m_o = jnp.maximum(od_ref[0, :, pl.ds(0, wo)], od_ref[0, :, pl.ds(wo, wo)])
    out_ref[0] = jnp.maximum(m_e, m_o)


# ------------------------------ Pallas wrappers ----------------------------

def _pick_cout_block(couts, cin, t, l, vmem_limit):
    """Largest Cout block whose (double-buffered) footprint fits VMEM."""
    headroom = vmem_limit - (4 << 20)

    def fits(cb):
        per_buf = cin * l * 2 + cb * l * 2 + cb * t * cin * 2 + 3 * cb * 4
        temps = t * cin * l * 2 + cb * l * 4
        return 2 * per_buf + temps <= headroom

    if fits(couts):
        return couts
    for cb in range(couts - 1, 0, -1):
        if couts % cb == 0 and cb % 8 == 0 and fits(cb):
            return cb
    return couts


def pallas_tap_conv(xc, tap_mats, tap_dydx, bias, scale, shift, *,
                    origin=(0, 0)):
    """Fused tap conv on a zero-bordered canvas.

    xc       : (N, Cin, Hc, Wc) bf16 canvas, valid data at [1:-1, 1:-1]
    tap_mats : (T, CoutS, Cin)  per-tap weight matrices
    tap_dydx : T offsets (dy, dx) relative to `origin` on the canvas
    Returns the output canvas (N, CoutS, Hc, Wc) bf16 (valid at [1:-1, 1:-1]).
    """
    N, Cin, Hc, Wc = xc.shape
    T, CoutS, _ = tap_mats.shape
    H, W = Hc - 2, Wc - 2                      # valid (== output) spatial dims
    l_out = (H - 1) * Wc + W                   # flattened output span
    wbase = Wc + 1                             # canvas offset of output (1,1)
    tail = Hc * Wc - wbase - l_out
    base = origin[0] * Wc + origin[1]
    shifts = tuple(dy * Wc + dx for dy, dx in tap_dydx)

    # Fold the T taps into one contraction: (CoutS, T*Cin).
    w2 = jnp.transpose(tap_mats, (1, 0, 2)).reshape(CoutS, T * Cin)
    xf = xc.reshape(N, Cin, Hc * Wc)

    vmem_limit = _vmem_limit_bytes()
    cb = _pick_cout_block(CoutS, Cin, T, Hc * Wc, vmem_limit)
    nc = CoutS // cb

    kernel = functools.partial(
        _tap_conv_kernel, shifts=shifts, base=base, l_out=l_out,
        wc=Wc, w_valid=W, wbase=wbase, tail=tail)

    cost = pl.CostEstimate(
        flops=2 * N * CoutS * T * Cin * l_out,
        transcendentals=0,
        bytes_accessed=(N * nc * Cin * Hc * Wc * 2 + CoutS * T * Cin * 2
                        + 3 * CoutS * 4 + N * CoutS * Hc * Wc * 2))

    out = pl.pallas_call(
        kernel,
        out_shape=jax.ShapeDtypeStruct((N, CoutS, Hc * Wc), ACT_DTYPE),
        grid=(N, nc),
        in_specs=[
            pl.BlockSpec((1, Cin, Hc * Wc), lambda n, c: (n, 0, 0)),
            pl.BlockSpec((cb, T * Cin), lambda n, c: (c, 0)),
            pl.BlockSpec((cb, 1), lambda n, c: (c, 0)),
            pl.BlockSpec((cb, 1), lambda n, c: (c, 0)),
            pl.BlockSpec((cb, 1), lambda n, c: (c, 0)),
        ],
        out_specs=pl.BlockSpec((1, cb, Hc * Wc), lambda n, c: (n, c, 0)),
        compiler_params=pltpu.CompilerParams(
            dimension_semantics=("parallel", "parallel"),
            vmem_limit_bytes=vmem_limit),
        cost_estimate=cost,
    )(xf.astype(MATMUL_DTYPE),
      w2.astype(MATMUL_DTYPE),
      bias.astype(jnp.float32).reshape(CoutS, 1),
      scale.astype(jnp.float32).reshape(CoutS, 1),
      shift.astype(jnp.float32).reshape(CoutS, 1))

    return out.reshape(N, CoutS, Hc, Wc)


def pallas_maxpool2x2(xc):
    """MaxPool2d(2, 2) on a zero-bordered canvas -> pooled valid (N,C,Ho,Wo)."""
    N, C, Hc, Wc = xc.shape
    H, W = Hc - 2, Wc - 2
    Ho, Wo = H // 2, W // 2
    xv = xc[:, :, 1:1 + H, 1:1 + W]
    # Even/odd column planes are split by XLA (cheap strided slice on a small
    # tensor) so the kernel only needs contiguous loads + VPU max.
    ev = xv[..., 0::2].reshape(N, C * Ho, 2 * Wo)
    od = xv[..., 1::2].reshape(N, C * Ho, 2 * Wo)
    R = C * Ho

    cost = pl.CostEstimate(flops=3 * N * R * Wo, transcendentals=0,
                           bytes_accessed=(2 * N * R * 2 * Wo + N * R * Wo) * 2)
    out = pl.pallas_call(
        functools.partial(_maxpool_kernel, wo=Wo),
        out_shape=jax.ShapeDtypeStruct((N, R, Wo), ACT_DTYPE),
        grid=(N,),
        in_specs=[pl.BlockSpec((1, R, 2 * Wo), lambda n: (n, 0, 0)),
                  pl.BlockSpec((1, R, 2 * Wo), lambda n: (n, 0, 0))],
        out_specs=pl.BlockSpec((1, R, Wo), lambda n: (n, 0, 0)),
        compiler_params=pltpu.CompilerParams(
            dimension_semantics=("parallel",),
            vmem_limit_bytes=_vmem_limit_bytes()),
        cost_estimate=cost,
    )(ev, od)
    return out.reshape(N, C, Ho, Wo)


# ---------------------- layer -> tap-matrix preparation --------------------

_DYDX_3x3 = tuple((dy, dx) for dy in range(3) for dx in range(3))
_DYDX_2x2 = ((0, 0), (0, 1), (1, 0), (1, 1))


def _taps_from_conv(w_oihw):
    """nn.Conv2d(k=3, s=1, p=1): 9 taps on the canvas (origin (0,0))."""
    return jnp.stack([w_oihw[:, :, dy, dx] for dy, dx in _DYDX_3x3], axis=0)


def _taps_from_convT_s1(w_iohw):
    """nn.ConvTranspose2d(k=3, s=1, p=1) == conv with the flipped kernel."""
    return jnp.stack([w_iohw[:, :, 2 - dy, 2 - dx].T for dy, dx in _DYDX_3x3],
                     axis=0)


def _taps_from_convT_s2(w_iohw):
    """nn.ConvTranspose2d(k=3, s=2, p=1, output_padding=1): polyphase taps.

    4 output phases (oy%2, ox%2) stacked along the Cout axis (CoutS = 4*Cout),
    computed from 4 taps with origin (1,1) on the canvas (i.e. the valid data
    plus one trailing zero row/col); unused (phase, tap) combos are zero.
    """
    cin, cout = w_iohw.shape[0], w_iohw.shape[1]
    zeros = jnp.zeros((cout, cin), w_iohw.dtype)
    # (output phase r, input offset d) -> kernel index k  (None = no tap)
    kmap = {(0, 0): 1, (0, 1): None, (1, 0): 2, (1, 1): 0}
    mats = []
    for dy, dx in _DYDX_2x2:
        blocks = []
        for ry in (0, 1):
            for rx in (0, 1):
                ky, kx = kmap[(ry, dy)], kmap[(rx, dx)]
                blocks.append(zeros if (ky is None or kx is None)
                              else w_iohw[:, :, ky, kx].T)
        mats.append(jnp.concatenate(blocks, axis=0))          # (4*Cout, Cin)
    return jnp.stack(mats, axis=0)                            # (4, 4*Cout, Cin)


def _interleave_phases(y):
    """(N, 4*Cout, H, W) phase-stacked (valid) -> (N, Cout, 2H, 2W)."""
    N, CS, H, W = y.shape
    cout = CS // 4
    y = y.reshape(N, 2, 2, cout, H, W)            # (n, ry, rx, co, a, b)
    y = y.transpose(0, 3, 4, 1, 5, 2)             # (n, co, a, ry, b, rx)
    return y.reshape(N, cout, 2 * H, 2 * W)


# --------------------------- parameter construction ------------------------

def _init_conv(key, cin, cout):
    kw, kb = jax.random.split(key)
    bound = 1.0 / (cin * 9) ** 0.5
    w = jax.random.uniform(kw, (cout, cin, 3, 3), jnp.float32, -bound, bound)  # OIHW
    b = jax.random.uniform(kb, (cout,), jnp.float32, -bound, bound)
    return {"w": w, "b": b}


def _init_convT(key, cin, cout):
    kw, kb = jax.random.split(key)
    bound = 1.0 / (cout * 9) ** 0.5
    w = jax.random.uniform(kw, (cin, cout, 3, 3), jnp.float32, -bound, bound)  # IOHW
    b = jax.random.uniform(kb, (cout,), jnp.float32, -bound, bound)
    return {"w": w, "b": b}


def _init_bn(key, c):
    k1, k2, k3, k4 = jax.random.split(key, 4)
    return {
        "gamma": 1.0 + 0.1 * jax.random.normal(k1, (c,), jnp.float32),
        "beta": 0.1 * jax.random.normal(k2, (c,), jnp.float32),
        "mean": 0.1 * jax.random.normal(k3, (c,), jnp.float32),
        "var": 1.0 + 0.1 * jax.random.uniform(k4, (c,), jnp.float32),
    }


def init_vanilla_ae_params(key, chnum_in, nf1, nf2, nf3, nf4, nf5):
    ks = jax.random.split(key, 18)
    p = {}
    # Encoder block1: 3x (Conv -> LReLU -> BN), MaxPool
    p["e1"] = _init_conv(ks[0], chnum_in, nf1); p["e1_bn"] = _init_bn(ks[1], nf1)
    p["e2"] = _init_conv(ks[2], nf1, nf2);      p["e2_bn"] = _init_bn(ks[3], nf2)
    p["e3"] = _init_conv(ks[4], nf2, nf3);      p["e3_bn"] = _init_bn(ks[5], nf3)
    # Encoder block2: Conv -> LReLU -> BN, MaxPool, Conv -> LReLU
    p["e4"] = _init_conv(ks[6], nf3, nf4);      p["e4_bn"] = _init_bn(ks[7], nf4)
    p["e5"] = _init_conv(ks[8], nf4, nf5)
    # Decoder block1: 2x (ConvT s1 -> LReLU -> BN)
    p["d1"] = _init_convT(ks[9], nf5, nf4);     p["d1_bn"] = _init_bn(ks[10], nf4)
    p["d2"] = _init_convT(ks[11], nf4, nf3);    p["d2_bn"] = _init_bn(ks[12], nf3)
    # Decoder block2: ConvT s2, ConvT s1, ConvT s2 (last one without BN)
    p["d3"] = _init_convT(ks[13], nf3, nf2);    p["d3_bn"] = _init_bn(ks[14], nf2)
    p["d4"] = _init_convT(ks[15], nf2, nf1);    p["d4_bn"] = _init_bn(ks[16], nf1)
    p["d5"] = _init_convT(ks[17], nf1, chnum_in)
    return p


def _bn_affine(bn):
    inv = 1.0 / jnp.sqrt(bn["var"] + BN_EPS)
    scale = bn["gamma"] * inv
    shift = bn["beta"] - bn["mean"] * scale
    return scale, shift


def _affine_or_identity(params, bn_name, cout):
    if bn_name is None:
        return jnp.ones((cout,), jnp.float32), jnp.zeros((cout,), jnp.float32)
    return _bn_affine(params[bn_name])


# --------------------------------- forward ---------------------------------

def _to_canvas(v):
    """Valid NCHW activation -> zero-bordered bf16 canvas."""
    return jnp.pad(v.astype(ACT_DTYPE), ((0, 0), (0, 0), (1, 1), (1, 1)))


def vanilla_ae_forward_pallas(params, x_nchw):
    """VanillaAE forward (NCHW in / NCHW out) using the Pallas kernels."""

    def conv(hc, name, bn_name):
        p = params[name]
        mats = _taps_from_conv(p["w"])
        sc, sh = _affine_or_identity(params, bn_name, mats.shape[1])
        return pallas_tap_conv(hc, mats, _DYDX_3x3, p["b"], sc, sh,
                               origin=(0, 0))

    def convT_s1(hc, name, bn_name):
        p = params[name]
        mats = _taps_from_convT_s1(p["w"])
        sc, sh = _affine_or_identity(params, bn_name, mats.shape[1])
        return pallas_tap_conv(hc, mats, _DYDX_3x3, p["b"], sc, sh,
                               origin=(0, 0))

    def convT_s2(hc, name, bn_name):
        p = params[name]
        mats = _taps_from_convT_s2(p["w"])
        cout = mats.shape[1] // 4
        sc, sh = _affine_or_identity(params, bn_name, cout)
        y = pallas_tap_conv(hc, mats, _DYDX_2x2,
                            jnp.tile(p["b"], 4), jnp.tile(sc, 4),
                            jnp.tile(sh, 4), origin=(1, 1))
        return _interleave_phases(y[:, :, 1:-1, 1:-1])   # (N, Cout, 2H, 2W)

    h = _to_canvas(x_nchw)
    # Encoder
    h = conv(h, "e1", "e1_bn")
    h = conv(h, "e2", "e2_bn")
    h = conv(h, "e3", "e3_bn")
    h = _to_canvas(pallas_maxpool2x2(h))
    h = conv(h, "e4", "e4_bn")
    h = _to_canvas(pallas_maxpool2x2(h))
    z = conv(h, "e5", None)                              # latent (canvas)
    # Decoder
    h = convT_s1(z, "d1", "d1_bn")
    h = convT_s1(h, "d2", "d2_bn")
    h = _to_canvas(convT_s2(h, "d3", "d3_bn"))
    h = convT_s1(h, "d4", "d4_bn")
    out = convT_s2(h, "d5", None)
    return out.astype(jnp.float32)


# ----------------------- pure-XLA reference forward ------------------------
# Mirrors the kernel pipeline's numerics exactly: bf16 MXU operands, f32
# accumulation/epilogue, bf16 inter-layer activations.

def vanilla_ae_forward_ref(params, x_nchw):
    def epilogue(y, b, sc, sh):
        y = y + b[None, :, None, None]
        y = jnp.maximum(y, LEAKY_SLOPE * y)
        y = y * sc[None, :, None, None] + sh[None, :, None, None]
        return y.astype(ACT_DTYPE)

    def conv(h, name, bn_name):
        p = params[name]
        sc, sh = _affine_or_identity(params, bn_name, p["w"].shape[0])
        y = lax.conv_general_dilated(
            h.astype(MATMUL_DTYPE), p["w"].astype(MATMUL_DTYPE),
            window_strides=(1, 1), padding=((1, 1), (1, 1)),
            dimension_numbers=("NCHW", "OIHW", "NCHW"),
            preferred_element_type=jnp.float32)
        return epilogue(y, p["b"], sc, sh)

    def convT(h, name, bn_name, stride=1, output_padding=0):
        p = params[name]
        w = jnp.transpose(jnp.flip(p["w"], (2, 3)), (1, 0, 2, 3))   # -> OIHW
        sc, sh = _affine_or_identity(params, bn_name, w.shape[0])
        pad = (1, 1 + output_padding)
        y = lax.conv_general_dilated(
            h.astype(MATMUL_DTYPE), w.astype(MATMUL_DTYPE),
            window_strides=(1, 1), padding=(pad, pad),
            lhs_dilation=(stride, stride),
            dimension_numbers=("NCHW", "OIHW", "NCHW"),
            preferred_element_type=jnp.float32)
        return epilogue(y, p["b"], sc, sh)

    def pool(h):
        N, C, H, W = h.shape
        return jnp.max(h.reshape(N, C, H // 2, 2, W // 2, 2), axis=(3, 5))

    h = x_nchw.astype(ACT_DTYPE)
    h = conv(h, "e1", "e1_bn")
    h = conv(h, "e2", "e2_bn")
    h = conv(h, "e3", "e3_bn")
    h = pool(h)
    h = conv(h, "e4", "e4_bn")
    h = pool(h)
    z = conv(h, "e5", None)
    h = convT(z, "d1", "d1_bn")
    h = convT(h, "d2", "d2_bn")
    h = convT(h, "d3", "d3_bn", stride=2, output_padding=1)
    h = convT(h, "d4", "d4_bn")
    h = convT(h, "d5", None, stride=2, output_padding=1)
    return h.astype(jnp.float32)


# ----------------------------------- main -----------------------------------

if __name__ == "__main__":
    key = jax.random.PRNGKey(0)
    kp, kx = jax.random.split(key)

    # Small synthetic configuration (module defaults are 16/32/64/128/256).
    chnum_in, nf1, nf2, nf3, nf4, nf5 = 4, 8, 16, 16, 32, 32
    params = init_vanilla_ae_params(kp, chnum_in, nf1, nf2, nf3, nf4, nf5)

    x = jax.random.normal(kx, (2, chnum_in, 16, 16), jnp.float32)  # NCHW input

    pallas_fwd = jax.jit(vanilla_ae_forward_pallas)
    ref_fwd = jax.jit(vanilla_ae_forward_ref)

    out = jax.block_until_ready(pallas_fwd(params, x))
    assert out.shape == x.shape, out.shape

    ref = jax.block_until_ready(ref_fwd(params, x))
    max_err = float(jnp.max(jnp.abs(out - ref)))
    # bf16 inter-layer activations in both paths -> small reduction-order /
    # rounding differences only.
    assert max_err < 2e-2, max_err

    print("KERNEL_OK")
</pallas_src>

<mosaic_0001>
module attributes {stable_mosaic.version = 11 : i64} {
  func.func @_tap_conv_kernel(%arg0: i32, %arg1: i32, %arg2: memref<1x4x324xbf16, #tpu.memory_space<vmem>>, %arg3: memref<8x36xbf16, #tpu.memory_space<vmem>>, %arg4: memref<8x1xf32, #tpu.memory_space<vmem>>, %arg5: memref<8x1xf32, #tpu.memory_space<vmem>>, %arg6: memref<8x1xf32, #tpu.memory_space<vmem>>, %arg7: memref<1x8x324xbf16, #tpu.memory_space<vmem>>) attributes {dimension_semantics = [#tpu.dimension_semantics<parallel>, #tpu.dimension_semantics<parallel>], iteration_bounds = array<i64: 2, 1>, scalar_prefetch = 0 : i64, scratch_operands = 0 : i64, tpu.core_type = #tpu.core_type<tc>, window_params = [{transform_indices = @transform_0, window_bounds = array<i64: 1, 4, 324>}, {transform_indices = @transform_1, window_bounds = array<i64: 8, 36>}, {transform_indices = @transform_2, window_bounds = array<i64: 8, 1>}, {transform_indices = @transform_3, window_bounds = array<i64: 8, 1>}, {transform_indices = @transform_4, window_bounds = array<i64: 8, 1>}, {transform_indices = @transform_5, window_bounds = array<i64: 1, 8, 324>}]} {
    %c0 = arith.constant 0 : index
    %c0_0 = arith.constant 0 : index
    %c0_1 = arith.constant 0 : index
    %0 = vector.load %arg2[%c0, %c0_0, %c0_1] : memref<1x4x324xbf16, #tpu.memory_space<vmem>>, vector<1x4x286xbf16>
    %1 = vector.shape_cast %0 : vector<1x4x286xbf16> to vector<4x286xbf16>
    %c0_2 = arith.constant 0 : index
    %c0_3 = arith.constant 0 : index
    %c1 = arith.constant 1 : index
    %2 = vector.load %arg2[%c0_2, %c0_3, %c1] : memref<1x4x324xbf16, #tpu.memory_space<vmem>>, vector<1x4x286xbf16>
    %3 = vector.shape_cast %2 : vector<1x4x286xbf16> to vector<4x286xbf16>
    %c0_4 = arith.constant 0 : index
    %c0_5 = arith.constant 0 : index
    %c2 = arith.constant 2 : index
    %4 = vector.load %arg2[%c0_4, %c0_5, %c2] : memref<1x4x324xbf16, #tpu.memory_space<vmem>>, vector<1x4x286xbf16>
    %5 = vector.shape_cast %4 : vector<1x4x286xbf16> to vector<4x286xbf16>
    %c0_6 = arith.constant 0 : index
    %c0_7 = arith.constant 0 : index
    %c18 = arith.constant 18 : index
    %6 = vector.load %arg2[%c0_6, %c0_7, %c18] : memref<1x4x324xbf16, #tpu.memory_space<vmem>>, vector<1x4x286xbf16>
    %7 = vector.shape_cast %6 : vector<1x4x286xbf16> to vector<4x286xbf16>
    %c0_8 = arith.constant 0 : index
    %c0_9 = arith.constant 0 : index
    %c19 = arith.constant 19 : index
    %8 = vector.load %arg2[%c0_8, %c0_9, %c19] : memref<1x4x324xbf16, #tpu.memory_space<vmem>>, vector<1x4x286xbf16>
    %9 = vector.shape_cast %8 : vector<1x4x286xbf16> to vector<4x286xbf16>
    %c0_10 = arith.constant 0 : index
    %c0_11 = arith.constant 0 : index
    %c20 = arith.constant 20 : index
    %10 = vector.load %arg2[%c0_10, %c0_11, %c20] : memref<1x4x324xbf16, #tpu.memory_space<vmem>>, vector<1x4x286xbf16>
    %11 = vector.shape_cast %10 : vector<1x4x286xbf16> to vector<4x286xbf16>
    %c0_12 = arith.constant 0 : index
    %c0_13 = arith.constant 0 : index
    %c36 = arith.constant 36 : index
    %12 = vector.load %arg2[%c0_12, %c0_13, %c36] : memref<1x4x324xbf16, #tpu.memory_space<vmem>>, vector<1x4x286xbf16>
    %13 = vector.shape_cast %12 : vector<1x4x286xbf16> to vector<4x286xbf16>
    %c0_14 = arith.constant 0 : index
    %c0_15 = arith.constant 0 : index
    %c37 = arith.constant 37 : index
    %14 = vector.load %arg2[%c0_14, %c0_15, %c37] : memref<1x4x324xbf16, #tpu.memory_space<vmem>>, vector<1x4x286xbf16>
    %15 = vector.shape_cast %14 : vector<1x4x286xbf16> to vector<4x286xbf16>
    %c0_16 = arith.constant 0 : index
    %c0_17 = arith.constant 0 : index
    %c38 = arith.constant 38 : index
    %16 = vector.load %arg2[%c0_16, %c0_17, %c38] : memref<1x4x324xbf16, #tpu.memory_space<vmem>>, vector<1x4x286xbf16>
    %17 = vector.shape_cast %16 : vector<1x4x286xbf16> to vector<4x286xbf16>
    %18 = tpu.concatenate %1, %3, %5, %7, %9, %11, %13, %15, %17 in 0 : vector<4x286xbf16>, vector<4x286xbf16>, vector<4x286xbf16>, vector<4x286xbf16>, vector<4x286xbf16>, vector<4x286xbf16>, vector<4x286xbf16>, vector<4x286xbf16>, vector<4x286xbf16> -> vector<36x286xbf16>
    %c0_18 = arith.constant 0 : index
    %c0_19 = arith.constant 0 : index
    %19 = vector.load %arg3[%c0_18, %c0_19] : memref<8x36xbf16, #tpu.memory_space<vmem>>, vector<8x36xbf16>
    %cst = arith.constant dense<0.000000e+00> : vector<8x286xf32>
    %20 = tpu.matmul %19, %18, %cst {dimension_numbers = #tpu.dot_dimension_numbers<[1], [0], [0], [1], [0, 0, 1, 1], [], []>} : vector<8x36xbf16>, vector<36x286xbf16>, vector<8x286xf32> -> vector<8x286xf32>
    %c0_20 = arith.constant 0 : index
    %c0_21 = arith.constant 0 : index
    %21 = vector.load %arg4[%c0_20, %c0_21] : memref<8x1xf32, #tpu.memory_space<vmem>>, vector<8x1xf32>
    %22 = vector.broadcast %21 : vector<8x1xf32> to vector<8x286xf32>
    %23 = arith.addf %20, %22 : vector<8x286xf32>
    %cst_22 = arith.constant 2.000000e-01 : f32
    %24 = vector.broadcast %cst_22 : f32 to vector<8x286xf32>
    %25 = arith.mulf %24, %23 : vector<8x286xf32>
    %26 = arith.maximumf %23, %25 : vector<8x286xf32>
    %c0_23 = arith.constant 0 : index
    %c0_24 = arith.constant 0 : index
    %27 = vector.load %arg5[%c0_23, %c0_24] : memref<8x1xf32, #tpu.memory_space<vmem>>, vector<8x1xf32>
    %28 = vector.broadcast %27 : vector<8x1xf32> to vector<8x286xf32>
    %29 = arith.mulf %26, %28 : vector<8x286xf32>
    %c0_25 = arith.constant 0 : index
    %c0_26 = arith.constant 0 : index
    %30 = vector.load %arg6[%c0_25, %c0_26] : memref<8x1xf32, #tpu.memory_space<vmem>>, vector<8x1xf32>
    %31 = vector.broadcast %30 : vector<8x1xf32> to vector<8x286xf32>
    %32 = arith.addf %29, %31 : vector<8x286xf32>
    %33 = tpu.iota {dimensions = array<i32: 1>} : vector<1x286xi32>
    %c1_i32 = arith.constant 1 : i32
    %34 = vector.broadcast %c1_i32 : i32 to vector<1x286xi32>
    %35 = arith.addi %33, %34 : vector<1x286xi32>
    %c18_i32 = arith.constant 18 : i32
    %c0_i32 = arith.constant 0 : i32
    %36 = arith.cmpi eq, %c18_i32, %c0_i32 : i32
    %c1_i32_27 = arith.constant 1 : i32
    %37 = arith.select %36, %c1_i32_27, %c18_i32 : i32
    %38 = vector.broadcast %37 : i32 to vector<1x286xi32>
    %39 = arith.remsi %35, %38 : vector<1x286xi32>
    %c0_i32_28 = arith.constant 0 : i32
    %40 = vector.broadcast %c0_i32_28 : i32 to vector<1x286xi32>
    %41 = arith.cmpi ne, %39, %40 : vector<1x286xi32>
    %c0_i32_29 = arith.constant 0 : i32
    %42 = vector.broadcast %c0_i32_29 : i32 to vector<1x286xi32>
    %43 = arith.cmpi slt, %39, %42 : vector<1x286xi32>
    %c0_i32_30 = arith.constant 0 : i32
    %44 = arith.cmpi slt, %37, %c0_i32_30 : i32
    %45 = vector.broadcast %44 : i1 to vector<1x286xi1>
    %46 = vector.broadcast %45 : vector<1x286xi1> to vector<1x286xi1>
    %47 = arith.xori %43, %46 : vector<1x286xi1>
    %48 = arith.andi %47, %41 : vector<1x286xi1>
    %49 = vector.broadcast %37 : i32 to vector<1x286xi32>
    %50 = arith.addi %39, %49 : vector<1x286xi32>
    %51 = arith.select %48, %50, %39 : vector<1x286xi1>, vector<1x286xi32>
    %c1_i32_31 = arith.constant 1 : i32
    %52 = vector.broadcast %c1_i32_31 : i32 to vector<1x286xi32>
    %53 = arith.cmpi sge, %51, %52 : vector<1x286xi32>
    %c16_i32 = arith.constant 16 : i32
    %54 = vector.broadcast %c16_i32 : i32 to vector<1x286xi32>
    %55 = arith.cmpi sle, %51, %54 : vector<1x286xi32>
    %56 = arith.andi %53, %55 : vector<1x286xi1>
    %cst_32 = arith.constant 0.000000e+00 : f32
    %57 = vector.shape_cast %56 : vector<1x286xi1> to vector<1x286xi1>
    %58 = vector.broadcast %57 : vector<1x286xi1> to vector<8x286xi1>
    %59 = vector.broadcast %cst_32 : f32 to vector<8x286xf32>
    %60 = arith.select %58, %32, %59 : vector<8x286xi1>, vector<8x286xf32>
    %cst_33 = arith.constant 0.000000e+00 : bf16
    %61 = vector.broadcast %cst_33 : bf16 to vector<8x19xbf16>
    %c0_34 = arith.constant 0 : index
    %c0_35 = arith.constant 0 : index
    %c0_36 = arith.constant 0 : index
    %62 = vector.load %arg7[%c0_34, %c0_35, %c0_36] : memref<1x8x324xbf16, #tpu.memory_space<vmem>>, vector<1x8x19xbf16>
    %63 = vector.shape_cast %62 : vector<1x8x19xbf16> to vector<8x19xbf16>
    %64 = vector.shape_cast %61 : vector<8x19xbf16> to vector<1x8x19xbf16>
    tpu.vector_store %arg7[%c0_34, %c0_35, %c0_36], %64 {strides = array<i32>} : memref<1x8x324xbf16, #tpu.memory_space<vmem>>, vector<1x8x19xbf16>,
    %65 = arith.truncf %60 : vector<8x286xf32> to vector<8x286xbf16>
    %c0_37 = arith.constant 0 : index
    %c0_38 = arith.constant 0 : index
    %c19_39 = arith.constant 19 : index
    %66 = vector.load %arg7[%c0_37, %c0_38, %c19_39] : memref<1x8x324xbf16, #tpu.memory_space<vmem>>, vector<1x8x286xbf16>
    %67 = vector.shape_cast %66 : vector<1x8x286xbf16> to vector<8x286xbf16>
    %68 = vector.shape_cast %65 : vector<8x286xbf16> to vector<1x8x286xbf16>
    tpu.vector_store %arg7[%c0_37, %c0_38, %c19_39], %68 {strides = array<i32>} : memref<1x8x324xbf16, #tpu.memory_space<vmem>>, vector<1x8x286xbf16>,
    %cst_40 = arith.constant 0.000000e+00 : bf16
    %69 = vector.broadcast %cst_40 : bf16 to vector<8x19xbf16>
    %c0_41 = arith.constant 0 : index
    %c0_42 = arith.constant 0 : index
    %c305 = arith.constant 305 : index
    %70 = vector.load %arg7[%c0_41, %c0_42, %c305] : memref<1x8x324xbf16, #tpu.memory_space<vmem>>, vector<1x8x19xbf16>
    %71 = vector.shape_cast %70 : vector<1x8x19xbf16> to vector<8x19xbf16>
    %72 = vector.shape_cast %69 : vector<8x19xbf16> to vector<1x8x19xbf16>
    tpu.vector_store %arg7[%c0_41, %c0_42, %c305], %72 {strides = array<i32>} : memref<1x8x324xbf16, #tpu.memory_space<vmem>>, vector<1x8x19xbf16>,
    return
  }
  func.func @transform_0(%arg0: i32, %arg1: i32) -> (i32, i32, i32) {
    %c0_i32 = arith.constant 0 : i32
    %c0_i32_0 = arith.constant 0 : i32
    %c0_i32_1 = arith.constant 0 : i32
    return %arg0, %c0_i32, %c0_i32_0 : i32, i32, i32
  }
  func.func @transform_1(%arg0: i32, %arg1: i32) -> (i32, i32) {
    %c0_i32 = arith.constant 0 : i32
    %c0_i32_0 = arith.constant 0 : i32
    return %arg1, %c0_i32 : i32, i32
  }
  func.func @transform_2(%arg0: i32, %arg1: i32) -> (i32, i32) {
    %c0_i32 = arith.constant 0 : i32
    %c0_i32_0 = arith.constant 0 : i32
    return %arg1, %c0_i32 : i32, i32
  }
  func.func @transform_3(%arg0: i32, %arg1: i32) -> (i32, i32) {
    %c0_i32 = arith.constant 0 : i32
    %c0_i32_0 = arith.constant 0 : i32
    return %arg1, %c0_i32 : i32, i32
  }
  func.func @transform_4(%arg0: i32, %arg1: i32) -> (i32, i32) {
    %c0_i32 = arith.constant 0 : i32
    %c0_i32_0 = arith.constant 0 : i32
    return %arg1, %c0_i32 : i32, i32
  }
  func.func @transform_5(%arg0: i32, %arg1: i32) -> (i32, i32, i32) {
    %c0_i32 = arith.constant 0 : i32
    %c0_i32_0 = arith.constant 0 : i32
    return %arg0, %arg1, %c0_i32 : i32, i32, i32
  }
}

module attributes {stable_mosaic.version = 11 : i64} {
  func.func @_tap_conv_kernel(%arg0: i32, %arg1: i32, %arg2: memref<1x8x324xbf16, #tpu.memory_space<vmem>>, %arg3: memref<16x72xbf16, #tpu.memory_space<vmem>>, %arg4: memref<16x1xf32, #tpu.memory_space<vmem>>, %arg5: memref<16x1xf32, #tpu.memory_space<vmem>>, %arg6: memref<16x1xf32, #tpu.memory_space<vmem>>, %arg7: memref<1x16x324xbf16, #tpu.memory_space<vmem>>) attributes {dimension_semantics = [#tpu.dimension_semantics<parallel>, #tpu.dimension_semantics<parallel>], iteration_bounds = array<i64: 2, 1>, scalar_prefetch = 0 : i64, scratch_operands = 0 : i64, tpu.core_type = #tpu.core_type<tc>, window_params = [{transform_indices = @transform_0, window_bounds = array<i64: 1, 8, 324>}, {transform_indices = @transform_1, window_bounds = array<i64: 16, 72>}, {transform_indices = @transform_2, window_bounds = array<i64: 16, 1>}, {transform_indices = @transform_3, window_bounds = array<i64: 16, 1>}, {transform_indices = @transform_4, window_bounds = array<i64: 16, 1>}, {transform_indices = @transform_5, window_bounds = array<i64: 1, 16, 324>}]} {
    %c0 = arith.constant 0 : index
    %c0_0 = arith.constant 0 : index
    %c0_1 = arith.constant 0 : index
    %0 = vector.load %arg2[%c0, %c0_0, %c0_1] : memref<1x8x324xbf16, #tpu.memory_space<vmem>>, vector<1x8x286xbf16>
    %1 = vector.shape_cast %0 : vector<1x8x286xbf16> to vector<8x286xbf16>
    %c0_2 = arith.constant 0 : index
    %c0_3 = arith.constant 0 : index
    %c1 = arith.constant 1 : index
    %2 = vector.load %arg2[%c0_2, %c0_3, %c1] : memref<1x8x324xbf16, #tpu.memory_space<vmem>>, vector<1x8x286xbf16>
    %3 = vector.shape_cast %2 : vector<1x8x286xbf16> to vector<8x286xbf16>
    %c0_4 = arith.constant 0 : index
    %c0_5 = arith.constant 0 : index
    %c2 = arith.constant 2 : index
    %4 = vector.load %arg2[%c0_4, %c0_5, %c2] : memref<1x8x324xbf16, #tpu.memory_space<vmem>>, vector<1x8x286xbf16>
    %5 = vector.shape_cast %4 : vector<1x8x286xbf16> to vector<8x286xbf16>
    %c0_6 = arith.constant 0 : index
    %c0_7 = arith.constant 0 : index
    %c18 = arith.constant 18 : index
    %6 = vector.load %arg2[%c0_6, %c0_7, %c18] : memref<1x8x324xbf16, #tpu.memory_space<vmem>>, vector<1x8x286xbf16>
    %7 = vector.shape_cast %6 : vector<1x8x286xbf16> to vector<8x286xbf16>
    %c0_8 = arith.constant 0 : index
    %c0_9 = arith.constant 0 : index
    %c19 = arith.constant 19 : index
    %8 = vector.load %arg2[%c0_8, %c0_9, %c19] : memref<1x8x324xbf16, #tpu.memory_space<vmem>>, vector<1x8x286xbf16>
    %9 = vector.shape_cast %8 : vector<1x8x286xbf16> to vector<8x286xbf16>
    %c0_10 = arith.constant 0 : index
    %c0_11 = arith.constant 0 : index
    %c20 = arith.constant 20 : index
    %10 = vector.load %arg2[%c0_10, %c0_11, %c20] : memref<1x8x324xbf16, #tpu.memory_space<vmem>>, vector<1x8x286xbf16>
    %11 = vector.shape_cast %10 : vector<1x8x286xbf16> to vector<8x286xbf16>
    %c0_12 = arith.constant 0 : index
    %c0_13 = arith.constant 0 : index
    %c36 = arith.constant 36 : index
    %12 = vector.load %arg2[%c0_12, %c0_13, %c36] : memref<1x8x324xbf16, #tpu.memory_space<vmem>>, vector<1x8x286xbf16>
    %13 = vector.shape_cast %12 : vector<1x8x286xbf16> to vector<8x286xbf16>
    %c0_14 = arith.constant 0 : index
    %c0_15 = arith.constant 0 : index
    %c37 = arith.constant 37 : index
    %14 = vector.load %arg2[%c0_14, %c0_15, %c37] : memref<1x8x324xbf16, #tpu.memory_space<vmem>>, vector<1x8x286xbf16>
    %15 = vector.shape_cast %14 : vector<1x8x286xbf16> to vector<8x286xbf16>
    %c0_16 = arith.constant 0 : index
    %c0_17 = arith.constant 0 : index
    %c38 = arith.constant 38 : index
    %16 = vector.load %arg2[%c0_16, %c0_17, %c38] : memref<1x8x324xbf16, #tpu.memory_space<vmem>>, vector<1x8x286xbf16>
    %17 = vector.shape_cast %16 : vector<1x8x286xbf16> to vector<8x286xbf16>
    %18 = tpu.concatenate %1, %3, %5, %7, %9, %11, %13, %15, %17 in 0 : vector<8x286xbf16>, vector<8x286xbf16>, vector<8x286xbf16>, vector<8x286xbf16>, vector<8x286xbf16>, vector<8x286xbf16>, vector<8x286xbf16>, vector<8x286xbf16>, vector<8x286xbf16> -> vector<72x286xbf16>
    %c0_18 = arith.constant 0 : index
    %c0_19 = arith.constant 0 : index
    %19 = vector.load %arg3[%c0_18, %c0_19] : memref<16x72xbf16, #tpu.memory_space<vmem>>, vector<16x72xbf16>
    %cst = arith.constant dense<0.000000e+00> : vector<16x286xf32>
    %20 = tpu.matmul %19, %18, %cst {dimension_numbers = #tpu.dot_dimension_numbers<[1], [0], [0], [1], [0, 0, 1, 1], [], []>} : vector<16x72xbf16>, vector<72x286xbf16>, vector<16x286xf32> -> vector<16x286xf32>
    %c0_20 = arith.constant 0 : index
    %c0_21 = arith.constant 0 : index
    %21 = vector.load %arg4[%c0_20, %c0_21] : memref<16x1xf32, #tpu.memory_space<vmem>>, vector<16x1xf32>
    %22 = vector.broadcast %21 : vector<16x1xf32> to vector<16x286xf32>
    %23 = arith.addf %20, %22 : vector<16x286xf32>
    %cst_22 = arith.constant 2.000000e-01 : f32
    %24 = vector.broadcast %cst_22 : f32 to vector<16x286xf32>
    %25 = arith.mulf %24, %23 : vector<16x286xf32>
    %26 = arith.maximumf %23, %25 : vector<16x286xf32>
    %c0_23 = arith.constant 0 : index
    %c0_24 = arith.constant 0 : index
    %27 = vector.load %arg5[%c0_23, %c0_24] : memref<16x1xf32, #tpu.memory_space<vmem>>, vector<16x1xf32>
    %28 = vector.broadcast %27 : vector<16x1xf32> to vector<16x286xf32>
    %29 = arith.mulf %26, %28 : vector<16x286xf32>
    %c0_25 = arith.constant 0 : index
    %c0_26 = arith.constant 0 : index
    %30 = vector.load %arg6[%c0_25, %c0_26] : memref<16x1xf32, #tpu.memory_space<vmem>>, vector<16x1xf32>
    %31 = vector.broadcast %30 : vector<16x1xf32> to vector<16x286xf32>
    %32 = arith.addf %29, %31 : vector<16x286xf32>
    %33 = tpu.iota {dimensions = array<i32: 1>} : vector<1x286xi32>
    %c1_i32 = arith.constant 1 : i32
    %34 = vector.broadcast %c1_i32 : i32 to vector<1x286xi32>
    %35 = arith.addi %33, %34 : vector<1x286xi32>
    %c18_i32 = arith.constant 18 : i32
    %c0_i32 = arith.constant 0 : i32
    %36 = arith.cmpi eq, %c18_i32, %c0_i32 : i32
    %c1_i32_27 = arith.constant 1 : i32
    %37 = arith.select %36, %c1_i32_27, %c18_i32 : i32
    %38 = vector.broadcast %37 : i32 to vector<1x286xi32>
    %39 = arith.remsi %35, %38 : vector<1x286xi32>
    %c0_i32_28 = arith.constant 0 : i32
    %40 = vector.broadcast %c0_i32_28 : i32 to vector<1x286xi32>
    %41 = arith.cmpi ne, %39, %40 : vector<1x286xi32>
    %c0_i32_29 = arith.constant 0 : i32
    %42 = vector.broadcast %c0_i32_29 : i32 to vector<1x286xi32>
    %43 = arith.cmpi slt, %39, %42 : vector<1x286xi32>
    %c0_i32_30 = arith.constant 0 : i32
    %44 = arith.cmpi slt, %37, %c0_i32_30 : i32
    %45 = vector.broadcast %44 : i1 to vector<1x286xi1>
    %46 = vector.broadcast %45 : vector<1x286xi1> to vector<1x286xi1>
    %47 = arith.xori %43, %46 : vector<1x286xi1>
    %48 = arith.andi %47, %41 : vector<1x286xi1>
    %49 = vector.broadcast %37 : i32 to vector<1x286xi32>
    %50 = arith.addi %39, %49 : vector<1x286xi32>
    %51 = arith.select %48, %50, %39 : vector<1x286xi1>, vector<1x286xi32>
    %c1_i32_31 = arith.constant 1 : i32
    %52 = vector.broadcast %c1_i32_31 : i32 to vector<1x286xi32>
    %53 = arith.cmpi sge, %51, %52 : vector<1x286xi32>
    %c16_i32 = arith.constant 16 : i32
    %54 = vector.broadcast %c16_i32 : i32 to vector<1x286xi32>
    %55 = arith.cmpi sle, %51, %54 : vector<1x286xi32>
    %56 = arith.andi %53, %55 : vector<1x286xi1>
    %cst_32 = arith.constant 0.000000e+00 : f32
    %57 = vector.shape_cast %56 : vector<1x286xi1> to vector<1x286xi1>
    %58 = vector.broadcast %57 : vector<1x286xi1> to vector<16x286xi1>
    %59 = vector.broadcast %cst_32 : f32 to vector<16x286xf32>
    %60 = arith.select %58, %32, %59 : vector<16x286xi1>, vector<16x286xf32>
    %cst_33 = arith.constant 0.000000e+00 : bf16
    %61 = vector.broadcast %cst_33 : bf16 to vector<16x19xbf16>
    %c0_34 = arith.constant 0 : index
    %c0_35 = arith.constant 0 : index
    %c0_36 = arith.constant 0 : index
    %62 = vector.load %arg7[%c0_34, %c0_35, %c0_36] : memref<1x16x324xbf16, #tpu.memory_space<vmem>>, vector<1x16x19xbf16>
    %63 = vector.shape_cast %62 : vector<1x16x19xbf16> to vector<16x19xbf16>
    %64 = vector.shape_cast %61 : vector<16x19xbf16> to vector<1x16x19xbf16>
    tpu.vector_store %arg7[%c0_34, %c0_35, %c0_36], %64 {strides = array<i32>} : memref<1x16x324xbf16, #tpu.memory_space<vmem>>, vector<1x16x19xbf16>,
    %65 = arith.truncf %60 : vector<16x286xf32> to vector<16x286xbf16>
    %c0_37 = arith.constant 0 : index
    %c0_38 = arith.constant 0 : index
    %c19_39 = arith.constant 19 : index
    %66 = vector.load %arg7[%c0_37, %c0_38, %c19_39] : memref<1x16x324xbf16, #tpu.memory_space<vmem>>, vector<1x16x286xbf16>
    %67 = vector.shape_cast %66 : vector<1x16x286xbf16> to vector<16x286xbf16>
    %68 = vector.shape_cast %65 : vector<16x286xbf16> to vector<1x16x286xbf16>
    tpu.vector_store %arg7[%c0_37, %c0_38, %c19_39], %68 {strides = array<i32>} : memref<1x16x324xbf16, #tpu.memory_space<vmem>>, vector<1x16x286xbf16>,
    %cst_40 = arith.constant 0.000000e+00 : bf16
    %69 = vector.broadcast %cst_40 : bf16 to vector<16x19xbf16>
    %c0_41 = arith.constant 0 : index
    %c0_42 = arith.constant 0 : index
    %c305 = arith.constant 305 : index
    %70 = vector.load %arg7[%c0_41, %c0_42, %c305] : memref<1x16x324xbf16, #tpu.memory_space<vmem>>, vector<1x16x19xbf16>
    %71 = vector.shape_cast %70 : vector<1x16x19xbf16> to vector<16x19xbf16>
    %72 = vector.shape_cast %69 : vector<16x19xbf16> to vector<1x16x19xbf16>
    tpu.vector_store %arg7[%c0_41, %c0_42, %c305], %72 {strides = array<i32>} : memref<1x16x324xbf16, #tpu.memory_space<vmem>>, vector<1x16x19xbf16>,
    return
  }
  func.func @transform_0(%arg0: i32, %arg1: i32) -> (i32, i32, i32) {
    %c0_i32 = arith.constant 0 : i32
    %c0_i32_0 = arith.constant 0 : i32
    %c0_i32_1 = arith.constant 0 : i32
    return %arg0, %c0_i32, %c0_i32_0 : i32, i32, i32
  }
  func.func @transform_1(%arg0: i32, %arg1: i32) -> (i32, i32) {
    %c0_i32 = arith.constant 0 : i32
    %c0_i32_0 = arith.constant 0 : i32
    return %arg1, %c0_i32 : i32, i32
  }
  func.func @transform_2(%arg0: i32, %arg1: i32) -> (i32, i32) {
    %c0_i32 = arith.constant 0 : i32
    %c0_i32_0 = arith.constant 0 : i32
    return %arg1, %c0_i32 : i32, i32
  }
  func.func @transform_3(%arg0: i32, %arg1: i32) -> (i32, i32) {
    %c0_i32 = arith.constant 0 : i32
    %c0_i32_0 = arith.constant 0 : i32
    return %arg1, %c0_i32 : i32, i32
  }
  func.func @transform_4(%arg0: i32, %arg1: i32) -> (i32, i32) {
    %c0_i32 = arith.constant 0 : i32
    %c0_i32_0 = arith.constant 0 : i32
    return %arg1, %c0_i32 : i32, i32
  }
  func.func @transform_5(%arg0: i32, %arg1: i32) -> (i32, i32, i32) {
    %c0_i32 = arith.constant 0 : i32
    %c0_i32_0 = arith.constant 0 : i32
    return %arg0, %arg1, %c0_i32 : i32, i32, i32
  }
}

module attributes {stable_mosaic.version = 11 : i64} {
  func.func @_tap_conv_kernel(%arg0: i32, %arg1: i32, %arg2: memref<1x16x324xbf16, #tpu.memory_space<vmem>>, %arg3: memref<16x144xbf16, #tpu.memory_space<vmem>>, %arg4: memref<16x1xf32, #tpu.memory_space<vmem>>, %arg5: memref<16x1xf32, #tpu.memory_space<vmem>>, %arg6: memref<16x1xf32, #tpu.memory_space<vmem>>, %arg7: memref<1x16x324xbf16, #tpu.memory_space<vmem>>) attributes {dimension_semantics = [#tpu.dimension_semantics<parallel>, #tpu.dimension_semantics<parallel>], iteration_bounds = array<i64: 2, 1>, scalar_prefetch = 0 : i64, scratch_operands = 0 : i64, tpu.core_type = #tpu.core_type<tc>, window_params = [{transform_indices = @transform_0, window_bounds = array<i64: 1, 16, 324>}, {transform_indices = @transform_1, window_bounds = array<i64: 16, 144>}, {transform_indices = @transform_2, window_bounds = array<i64: 16, 1>}, {transform_indices = @transform_3, window_bounds = array<i64: 16, 1>}, {transform_indices = @transform_4, window_bounds = array<i64: 16, 1>}, {transform_indices = @transform_5, window_bounds = array<i64: 1, 16, 324>}]} {
    %c0 = arith.constant 0 : index
    %c0_0 = arith.constant 0 : index
    %c0_1 = arith.constant 0 : index
    %0 = vector.load %arg2[%c0, %c0_0, %c0_1] : memref<1x16x324xbf16, #tpu.memory_space<vmem>>, vector<1x16x286xbf16>
    %1 = vector.shape_cast %0 : vector<1x16x286xbf16> to vector<16x286xbf16>
    %c0_2 = arith.constant 0 : index
    %c0_3 = arith.constant 0 : index
    %c1 = arith.constant 1 : index
    %2 = vector.load %arg2[%c0_2, %c0_3, %c1] : memref<1x16x324xbf16, #tpu.memory_space<vmem>>, vector<1x16x286xbf16>
    %3 = vector.shape_cast %2 : vector<1x16x286xbf16> to vector<16x286xbf16>
    %c0_4 = arith.constant 0 : index
    %c0_5 = arith.constant 0 : index
    %c2 = arith.constant 2 : index
    %4 = vector.load %arg2[%c0_4, %c0_5, %c2] : memref<1x16x324xbf16, #tpu.memory_space<vmem>>, vector<1x16x286xbf16>
    %5 = vector.shape_cast %4 : vector<1x16x286xbf16> to vector<16x286xbf16>
    %c0_6 = arith.constant 0 : index
    %c0_7 = arith.constant 0 : index
    %c18 = arith.constant 18 : index
    %6 = vector.load %arg2[%c0_6, %c0_7, %c18] : memref<1x16x324xbf16, #tpu.memory_space<vmem>>, vector<1x16x286xbf16>
    %7 = vector.shape_cast %6 : vector<1x16x286xbf16> to vector<16x286xbf16>
    %c0_8 = arith.constant 0 : index
    %c0_9 = arith.constant 0 : index
    %c19 = arith.constant 19 : index
    %8 = vector.load %arg2[%c0_8, %c0_9, %c19] : memref<1x16x324xbf16, #tpu.memory_space<vmem>>, vector<1x16x286xbf16>
    %9 = vector.shape_cast %8 : vector<1x16x286xbf16> to vector<16x286xbf16>
    %c0_10 = arith.constant 0 : index
    %c0_11 = arith.constant 0 : index
    %c20 = arith.constant 20 : index
    %10 = vector.load %arg2[%c0_10, %c0_11, %c20] : memref<1x16x324xbf16, #tpu.memory_space<vmem>>, vector<1x16x286xbf16>
    %11 = vector.shape_cast %10 : vector<1x16x286xbf16> to vector<16x286xbf16>
    %c0_12 = arith.constant 0 : index
    %c0_13 = arith.constant 0 : index
    %c36 = arith.constant 36 : index
    %12 = vector.load %arg2[%c0_12, %c0_13, %c36] : memref<1x16x324xbf16, #tpu.memory_space<vmem>>, vector<1x16x286xbf16>
    %13 = vector.shape_cast %12 : vector<1x16x286xbf16> to vector<16x286xbf16>
    %c0_14 = arith.constant 0 : index
    %c0_15 = arith.constant 0 : index
    %c37 = arith.constant 37 : index
    %14 = vector.load %arg2[%c0_14, %c0_15, %c37] : memref<1x16x324xbf16, #tpu.memory_space<vmem>>, vector<1x16x286xbf16>
    %15 = vector.shape_cast %14 : vector<1x16x286xbf16> to vector<16x286xbf16>
    %c0_16 = arith.constant 0 : index
    %c0_17 = arith.constant 0 : index
    %c38 = arith.constant 38 : index
    %16 = vector.load %arg2[%c0_16, %c0_17, %c38] : memref<1x16x324xbf16, #tpu.memory_space<vmem>>, vector<1x16x286xbf16>
    %17 = vector.shape_cast %16 : vector<1x16x286xbf16> to vector<16x286xbf16>
    %18 = tpu.concatenate %1, %3, %5, %7, %9, %11, %13, %15, %17 in 0 : vector<16x286xbf16>, vector<16x286xbf16>, vector<16x286xbf16>, vector<16x286xbf16>, vector<16x286xbf16>, vector<16x286xbf16>, vector<16x286xbf16>, vector<16x286xbf16>, vector<16x286xbf16> -> vector<144x286xbf16>
    %c0_18 = arith.constant 0 : index
    %c0_19 = arith.constant 0 : index
    %19 = vector.load %arg3[%c0_18, %c0_19] : memref<16x144xbf16, #tpu.memory_space<vmem>>, vector<16x144xbf16>
    %cst = arith.constant dense<0.000000e+00> : vector<16x286xf32>
    %20 = tpu.matmul %19, %18, %cst {dimension_numbers = #tpu.dot_dimension_numbers<[1], [0], [0], [1], [0, 0, 1, 1], [], []>} : vector<16x144xbf16>, vector<144x286xbf16>, vector<16x286xf32> -> vector<16x286xf32>
    %c0_20 = arith.constant 0 : index
    %c0_21 = arith.constant 0 : index
    %21 = vector.load %arg4[%c0_20, %c0_21] : memref<16x1xf32, #tpu.memory_space<vmem>>, vector<16x1xf32>
    %22 = vector.broadcast %21 : vector<16x1xf32> to vector<16x286xf32>
    %23 = arith.addf %20, %22 : vector<16x286xf32>
    %cst_22 = arith.constant 2.000000e-01 : f32
    %24 = vector.broadcast %cst_22 : f32 to vector<16x286xf32>
    %25 = arith.mulf %24, %23 : vector<16x286xf32>
    %26 = arith.maximumf %23, %25 : vector<16x286xf32>
    %c0_23 = arith.constant 0 : index
    %c0_24 = arith.constant 0 : index
    %27 = vector.load %arg5[%c0_23, %c0_24] : memref<16x1xf32, #tpu.memory_space<vmem>>, vector<16x1xf32>
    %28 = vector.broadcast %27 : vector<16x1xf32> to vector<16x286xf32>
    %29 = arith.mulf %26, %28 : vector<16x286xf32>
    %c0_25 = arith.constant 0 : index
    %c0_26 = arith.constant 0 : index
    %30 = vector.load %arg6[%c0_25, %c0_26] : memref<16x1xf32, #tpu.memory_space<vmem>>, vector<16x1xf32>
    %31 = vector.broadcast %30 : vector<16x1xf32> to vector<16x286xf32>
    %32 = arith.addf %29, %31 : vector<16x286xf32>
    %33 = tpu.iota {dimensions = array<i32: 1>} : vector<1x286xi32>
    %c1_i32 = arith.constant 1 : i32
    %34 = vector.broadcast %c1_i32 : i32 to vector<1x286xi32>
    %35 = arith.addi %33, %34 : vector<1x286xi32>
    %c18_i32 = arith.constant 18 : i32
    %c0_i32 = arith.constant 0 : i32
    %36 = arith.cmpi eq, %c18_i32, %c0_i32 : i32
    %c1_i32_27 = arith.constant 1 : i32
    %37 = arith.select %36, %c1_i32_27, %c18_i32 : i32
    %38 = vector.broadcast %37 : i32 to vector<1x286xi32>
    %39 = arith.remsi %35, %38 : vector<1x286xi32>
    %c0_i32_28 = arith.constant 0 : i32
    %40 = vector.broadcast %c0_i32_28 : i32 to vector<1x286xi32>
    %41 = arith.cmpi ne, %39, %40 : vector<1x286xi32>
    %c0_i32_29 = arith.constant 0 : i32
    %42 = vector.broadcast %c0_i32_29 : i32 to vector<1x286xi32>
    %43 = arith.cmpi slt, %39, %42 : vector<1x286xi32>
    %c0_i32_30 = arith.constant 0 : i32
    %44 = arith.cmpi slt, %37, %c0_i32_30 : i32
    %45 = vector.broadcast %44 : i1 to vector<1x286xi1>
    %46 = vector.broadcast %45 : vector<1x286xi1> to vector<1x286xi1>
    %47 = arith.xori %43, %46 : vector<1x286xi1>
    %48 = arith.andi %47, %41 : vector<1x286xi1>
    %49 = vector.broadcast %37 : i32 to vector<1x286xi32>
    %50 = arith.addi %39, %49 : vector<1x286xi32>
    %51 = arith.select %48, %50, %39 : vector<1x286xi1>, vector<1x286xi32>
    %c1_i32_31 = arith.constant 1 : i32
    %52 = vector.broadcast %c1_i32_31 : i32 to vector<1x286xi32>
    %53 = arith.cmpi sge, %51, %52 : vector<1x286xi32>
    %c16_i32 = arith.constant 16 : i32
    %54 = vector.broadcast %c16_i32 : i32 to vector<1x286xi32>
    %55 = arith.cmpi sle, %51, %54 : vector<1x286xi32>
    %56 = arith.andi %53, %55 : vector<1x286xi1>
    %cst_32 = arith.constant 0.000000e+00 : f32
    %57 = vector.shape_cast %56 : vector<1x286xi1> to vector<1x286xi1>
    %58 = vector.broadcast %57 : vector<1x286xi1> to vector<16x286xi1>
    %59 = vector.broadcast %cst_32 : f32 to vector<16x286xf32>
    %60 = arith.select %58, %32, %59 : vector<16x286xi1>, vector<16x286xf32>
    %cst_33 = arith.constant 0.000000e+00 : bf16
    %61 = vector.broadcast %cst_33 : bf16 to vector<16x19xbf16>
    %c0_34 = arith.constant 0 : index
    %c0_35 = arith.constant 0 : index
    %c0_36 = arith.constant 0 : index
    %62 = vector.load %arg7[%c0_34, %c0_35, %c0_36] : memref<1x16x324xbf16, #tpu.memory_space<vmem>>, vector<1x16x19xbf16>
    %63 = vector.shape_cast %62 : vector<1x16x19xbf16> to vector<16x19xbf16>
    %64 = vector.shape_cast %61 : vector<16x19xbf16> to vector<1x16x19xbf16>
    tpu.vector_store %arg7[%c0_34, %c0_35, %c0_36], %64 {strides = array<i32>} : memref<1x16x324xbf16, #tpu.memory_space<vmem>>, vector<1x16x19xbf16>,
    %65 = arith.truncf %60 : vector<16x286xf32> to vector<16x286xbf16>
    %c0_37 = arith.constant 0 : index
    %c0_38 = arith.constant 0 : index
    %c19_39 = arith.constant 19 : index
    %66 = vector.load %arg7[%c0_37, %c0_38, %c19_39] : memref<1x16x324xbf16, #tpu.memory_space<vmem>>, vector<1x16x286xbf16>
    %67 = vector.shape_cast %66 : vector<1x16x286xbf16> to vector<16x286xbf16>
    %68 = vector.shape_cast %65 : vector<16x286xbf16> to vector<1x16x286xbf16>
    tpu.vector_store %arg7[%c0_37, %c0_38, %c19_39], %68 {strides = array<i32>} : memref<1x16x324xbf16, #tpu.memory_space<vmem>>, vector<1x16x286xbf16>,
    %cst_40 = arith.constant 0.000000e+00 : bf16
    %69 = vector.broadcast %cst_40 : bf16 to vector<16x19xbf16>
    %c0_41 = arith.constant 0 : index
    %c0_42 = arith.constant 0 : index
    %c305 = arith.constant 305 : index
    %70 = vector.load %arg7[%c0_41, %c0_42, %c305] : memref<1x16x324xbf16, #tpu.memory_space<vmem>>, vector<1x16x19xbf16>
    %71 = vector.shape_cast %70 : vector<1x16x19xbf16> to vector<16x19xbf16>
    %72 = vector.shape_cast %69 : vector<16x19xbf16> to vector<1x16x19xbf16>
    tpu.vector_store %arg7[%c0_41, %c0_42, %c305], %72 {strides = array<i32>} : memref<1x16x324xbf16, #tpu.memory_space<vmem>>, vector<1x16x19xbf16>,
    return
  }
  func.func @transform_0(%arg0: i32, %arg1: i32) -> (i32, i32, i32) {
    %c0_i32 = arith.constant 0 : i32
    %c0_i32_0 = arith.constant 0 : i32
    %c0_i32_1 = arith.constant 0 : i32
    return %arg0, %c0_i32, %c0_i32_0 : i32, i32, i32
  }
  func.func @transform_1(%arg0: i32, %arg1: i32) -> (i32, i32) {
    %c0_i32 = arith.constant 0 : i32
    %c0_i32_0 = arith.constant 0 : i32
    return %arg1, %c0_i32 : i32, i32
  }
  func.func @transform_2(%arg0: i32, %arg1: i32) -> (i32, i32) {
    %c0_i32 = arith.constant 0 : i32
    %c0_i32_0 = arith.constant 0 : i32
    return %arg1, %c0_i32 : i32, i32
  }
  func.func @transform_3(%arg0: i32, %arg1: i32) -> (i32, i32) {
    %c0_i32 = arith.constant 0 : i32
    %c0_i32_0 = arith.constant 0 : i32
    return %arg1, %c0_i32 : i32, i32
  }
  func.func @transform_4(%arg0: i32, %arg1: i32) -> (i32, i32) {
    %c0_i32 = arith.constant 0 : i32
    %c0_i32_0 = arith.constant 0 : i32
    return %arg1, %c0_i32 : i32, i32
  }
  func.func @transform_5(%arg0: i32, %arg1: i32) -> (i32, i32, i32) {
    %c0_i32 = arith.constant 0 : i32
    %c0_i32_0 = arith.constant 0 : i32
    return %arg0, %arg1, %c0_i32 : i32, i32, i32
  }
}

module attributes {stable_mosaic.version = 11 : i64} {
  func.func @_maxpool_kernel(%arg0: i32, %arg1: memref<1x128x16xbf16, #tpu.memory_space<vmem>>, %arg2: memref<1x128x16xbf16, #tpu.memory_space<vmem>>, %arg3: memref<1x128x8xbf16, #tpu.memory_space<vmem>>) attributes {dimension_semantics = [#tpu.dimension_semantics<parallel>], iteration_bounds = array<i64: 2>, scalar_prefetch = 0 : i64, scratch_operands = 0 : i64, tpu.core_type = #tpu.core_type<tc>, window_params = [{transform_indices = @transform_0, window_bounds = array<i64: 1, 128, 16>}, {transform_indices = @transform_1, window_bounds = array<i64: 1, 128, 16>}, {transform_indices = @transform_2, window_bounds = array<i64: 1, 128, 8>}]} {
    %c0 = arith.constant 0 : index
    %c0_0 = arith.constant 0 : index
    %c0_1 = arith.constant 0 : index
    %0 = vector.load %arg1[%c0, %c0_0, %c0_1] : memref<1x128x16xbf16, #tpu.memory_space<vmem>>, vector<1x128x8xbf16>
    %1 = vector.shape_cast %0 : vector<1x128x8xbf16> to vector<128x8xbf16>
    %c0_2 = arith.constant 0 : index
    %c0_3 = arith.constant 0 : index
    %c8 = arith.constant 8 : index
    %2 = vector.load %arg1[%c0_2, %c0_3, %c8] : memref<1x128x16xbf16, #tpu.memory_space<vmem>>, vector<1x128x8xbf16>
    %3 = vector.shape_cast %2 : vector<1x128x8xbf16> to vector<128x8xbf16>
    %4 = arith.maximumf %1, %3 : vector<128x8xbf16>
    %c0_4 = arith.constant 0 : index
    %c0_5 = arith.constant 0 : index
    %c0_6 = arith.constant 0 : index
    %5 = vector.load %arg2[%c0_4, %c0_5, %c0_6] : memref<1x128x16xbf16, #tpu.memory_space<vmem>>, vector<1x128x8xbf16>
    %6 = vector.shape_cast %5 : vector<1x128x8xbf16> to vector<128x8xbf16>
    %c0_7 = arith.constant 0 : index
    %c0_8 = arith.constant 0 : index
    %c8_9 = arith.constant 8 : index
    %7 = vector.load %arg2[%c0_7, %c0_8, %c8_9] : memref<1x128x16xbf16, #tpu.memory_space<vmem>>, vector<1x128x8xbf16>
    %8 = vector.shape_cast %7 : vector<1x128x8xbf16> to vector<128x8xbf16>
    %9 = arith.maximumf %6, %8 : vector<128x8xbf16>
    %10 = arith.maximumf %4, %9 : vector<128x8xbf16>
    %c0_10 = arith.constant 0 : index
    %c0_11 = arith.constant 0 : index
    %c0_12 = arith.constant 0 : index
    %11 = vector.load %arg3[%c0_10, %c0_11, %c0_12] : memref<1x128x8xbf16, #tpu.memory_space<vmem>>, vector<1x128x8xbf16>
    %12 = vector.shape_cast %11 : vector<1x128x8xbf16> to vector<128x8xbf16>
    %13 = vector.shape_cast %10 : vector<128x8xbf16> to vector<1x128x8xbf16>
    tpu.vector_store %arg3[%c0_10, %c0_11, %c0_12], %13 {strides = array<i32>} : memref<1x128x8xbf16, #tpu.memory_space<vmem>>, vector<1x128x8xbf16>,
    return
  }
  func.func @transform_0(%arg0: i32) -> (i32, i32, i32) {
    %c0_i32 = arith.constant 0 : i32
    %c0_i32_0 = arith.constant 0 : i32
    %c0_i32_1 = arith.constant 0 : i32
    return %arg0, %c0_i32, %c0_i32_0 : i32, i32, i32
  }
  func.func @transform_1(%arg0: i32) -> (i32, i32, i32) {
    %c0_i32 = arith.constant 0 : i32
    %c0_i32_0 = arith.constant 0 : i32
    %c0_i32_1 = arith.constant 0 : i32
    return %arg0, %c0_i32, %c0_i32_0 : i32, i32, i32
  }
  func.func @transform_2(%arg0: i32) -> (i32, i32, i32) {
    %c0_i32 = arith.constant 0 : i32
    %c0_i32_0 = arith.constant 0 : i32
    %c0_i32_1 = arith.constant 0 : i32
    return %arg0, %c0_i32, %c0_i32_0 : i32, i32, i32
  }
}

module attributes {stable_mosaic.version = 11 : i64} {
  func.func @_tap_conv_kernel(%arg0: i32, %arg1: i32, %arg2: memref<1x16x100xbf16, #tpu.memory_space<vmem>>, %arg3: memref<32x144xbf16, #tpu.memory_space<vmem>>, %arg4: memref<32x1xf32, #tpu.memory_space<vmem>>, %arg5: memref<32x1xf32, #tpu.memory_space<vmem>>, %arg6: memref<32x1xf32, #tpu.memory_space<vmem>>, %arg7: memref<1x32x100xbf16, #tpu.memory_space<vmem>>) attributes {dimension_semantics = [#tpu.dimension_semantics<parallel>, #tpu.dimension_semantics<parallel>], iteration_bounds = array<i64: 2, 1>, scalar_prefetch = 0 : i64, scratch_operands = 0 : i64, tpu.core_type = #tpu.core_type<tc>, window_params = [{transform_indices = @transform_0, window_bounds = array<i64: 1, 16, 100>}, {transform_indices = @transform_1, window_bounds = array<i64: 32, 144>}, {transform_indices = @transform_2, window_bounds = array<i64: 32, 1>}, {transform_indices = @transform_3, window_bounds = array<i64: 32, 1>}, {transform_indices = @transform_4, window_bounds = array<i64: 32, 1>}, {transform_indices = @transform_5, window_bounds = array<i64: 1, 32, 100>}]} {
    %c0 = arith.constant 0 : index
    %c0_0 = arith.constant 0 : index
    %c0_1 = arith.constant 0 : index
    %0 = vector.load %arg2[%c0, %c0_0, %c0_1] : memref<1x16x100xbf16, #tpu.memory_space<vmem>>, vector<1x16x78xbf16>
    %1 = vector.shape_cast %0 : vector<1x16x78xbf16> to vector<16x78xbf16>
    %c0_2 = arith.constant 0 : index
    %c0_3 = arith.constant 0 : index
    %c1 = arith.constant 1 : index
    %2 = vector.load %arg2[%c0_2, %c0_3, %c1] : memref<1x16x100xbf16, #tpu.memory_space<vmem>>, vector<1x16x78xbf16>
    %3 = vector.shape_cast %2 : vector<1x16x78xbf16> to vector<16x78xbf16>
    %c0_4 = arith.constant 0 : index
    %c0_5 = arith.constant 0 : index
    %c2 = arith.constant 2 : index
    %4 = vector.load %arg2[%c0_4, %c0_5, %c2] : memref<1x16x100xbf16, #tpu.memory_space<vmem>>, vector<1x16x78xbf16>
    %5 = vector.shape_cast %4 : vector<1x16x78xbf16> to vector<16x78xbf16>
    %c0_6 = arith.constant 0 : index
    %c0_7 = arith.constant 0 : index
    %c10 = arith.constant 10 : index
    %6 = vector.load %arg2[%c0_6, %c0_7, %c10] : memref<1x16x100xbf16, #tpu.memory_space<vmem>>, vector<1x16x78xbf16>
    %7 = vector.shape_cast %6 : vector<1x16x78xbf16> to vector<16x78xbf16>
    %c0_8 = arith.constant 0 : index
    %c0_9 = arith.constant 0 : index
    %c11 = arith.constant 11 : index
    %8 = vector.load %arg2[%c0_8, %c0_9, %c11] : memref<1x16x100xbf16, #tpu.memory_space<vmem>>, vector<1x16x78xbf16>
    %9 = vector.shape_cast %8 : vector<1x16x78xbf16> to vector<16x78xbf16>
    %c0_10 = arith.constant 0 : index
    %c0_11 = arith.constant 0 : index
    %c12 = arith.constant 12 : index
    %10 = vector.load %arg2[%c0_10, %c0_11, %c12] : memref<1x16x100xbf16, #tpu.memory_space<vmem>>, vector<1x16x78xbf16>
    %11 = vector.shape_cast %10 : vector<1x16x78xbf16> to vector<16x78xbf16>
    %c0_12 = arith.constant 0 : index
    %c0_13 = arith.constant 0 : index
    %c20 = arith.constant 20 : index
    %12 = vector.load %arg2[%c0_12, %c0_13, %c20] : memref<1x16x100xbf16, #tpu.memory_space<vmem>>, vector<1x16x78xbf16>
    %13 = vector.shape_cast %12 : vector<1x16x78xbf16> to vector<16x78xbf16>
    %c0_14 = arith.constant 0 : index
    %c0_15 = arith.constant 0 : index
    %c21 = arith.constant 21 : index
    %14 = vector.load %arg2[%c0_14, %c0_15, %c21] : memref<1x16x100xbf16, #tpu.memory_space<vmem>>, vector<1x16x78xbf16>
    %15 = vector.shape_cast %14 : vector<1x16x78xbf16> to vector<16x78xbf16>
    %c0_16 = arith.constant 0 : index
    %c0_17 = arith.constant 0 : index
    %c22 = arith.constant 22 : index
    %16 = vector.load %arg2[%c0_16, %c0_17, %c22] : memref<1x16x100xbf16, #tpu.memory_space<vmem>>, vector<1x16x78xbf16>
    %17 = vector.shape_cast %16 : vector<1x16x78xbf16> to vector<16x78xbf16>
    %18 = tpu.concatenate %1, %3, %5, %7, %9, %11, %13, %15, %17 in 0 : vector<16x78xbf16>, vector<16x78xbf16>, vector<16x78xbf16>, vector<16x78xbf16>, vector<16x78xbf16>, vector<16x78xbf16>, vector<16x78xbf16>, vector<16x78xbf16>, vector<16x78xbf16> -> vector<144x78xbf16>
    %c0_18 = arith.constant 0 : index
    %c0_19 = arith.constant 0 : index
    %19 = vector.load %arg3[%c0_18, %c0_19] : memref<32x144xbf16, #tpu.memory_space<vmem>>, vector<32x144xbf16>
    %cst = arith.constant dense<0.000000e+00> : vector<32x78xf32>
    %20 = tpu.matmul %19, %18, %cst {dimension_numbers = #tpu.dot_dimension_numbers<[1], [0], [0], [1], [0, 0, 1, 1], [], []>} : vector<32x144xbf16>, vector<144x78xbf16>, vector<32x78xf32> -> vector<32x78xf32>
    %c0_20 = arith.constant 0 : index
    %c0_21 = arith.constant 0 : index
    %21 = vector.load %arg4[%c0_20, %c0_21] : memref<32x1xf32, #tpu.memory_space<vmem>>, vector<32x1xf32>
    %22 = vector.broadcast %21 : vector<32x1xf32> to vector<32x78xf32>
    %23 = arith.addf %20, %22 : vector<32x78xf32>
    %cst_22 = arith.constant 2.000000e-01 : f32
    %24 = vector.broadcast %cst_22 : f32 to vector<32x78xf32>
    %25 = arith.mulf %24, %23 : vector<32x78xf32>
    %26 = arith.maximumf %23, %25 : vector<32x78xf32>
    %c0_23 = arith.constant 0 : index
    %c0_24 = arith.constant 0 : index
    %27 = vector.load %arg5[%c0_23, %c0_24] : memref<32x1xf32, #tpu.memory_space<vmem>>, vector<32x1xf32>
    %28 = vector.broadcast %27 : vector<32x1xf32> to vector<32x78xf32>
    %29 = arith.mulf %26, %28 : vector<32x78xf32>
    %c0_25 = arith.constant 0 : index
    %c0_26 = arith.constant 0 : index
    %30 = vector.load %arg6[%c0_25, %c0_26] : memref<32x1xf32, #tpu.memory_space<vmem>>, vector<32x1xf32>
    %31 = vector.broadcast %30 : vector<32x1xf32> to vector<32x78xf32>
    %32 = arith.addf %29, %31 : vector<32x78xf32>
    %33 = tpu.iota {dimensions = array<i32: 1>} : vector<1x78xi32>
    %c1_i32 = arith.constant 1 : i32
    %34 = vector.broadcast %c1_i32 : i32 to vector<1x78xi32>
    %35 = arith.addi %33, %34 : vector<1x78xi32>
    %c10_i32 = arith.constant 10 : i32
    %c0_i32 = arith.constant 0 : i32
    %36 = arith.cmpi eq, %c10_i32, %c0_i32 : i32
    %c1_i32_27 = arith.constant 1 : i32
    %37 = arith.select %36, %c1_i32_27, %c10_i32 : i32
    %38 = vector.broadcast %37 : i32 to vector<1x78xi32>
    %39 = arith.remsi %35, %38 : vector<1x78xi32>
    %c0_i32_28 = arith.constant 0 : i32
    %40 = vector.broadcast %c0_i32_28 : i32 to vector<1x78xi32>
    %41 = arith.cmpi ne, %39, %40 : vector<1x78xi32>
    %c0_i32_29 = arith.constant 0 : i32
    %42 = vector.broadcast %c0_i32_29 : i32 to vector<1x78xi32>
    %43 = arith.cmpi slt, %39, %42 : vector<1x78xi32>
    %c0_i32_30 = arith.constant 0 : i32
    %44 = arith.cmpi slt, %37, %c0_i32_30 : i32
    %45 = vector.broadcast %44 : i1 to vector<1x78xi1>
    %46 = vector.broadcast %45 : vector<1x78xi1> to vector<1x78xi1>
    %47 = arith.xori %43, %46 : vector<1x78xi1>
    %48 = arith.andi %47, %41 : vector<1x78xi1>
    %49 = vector.broadcast %37 : i32 to vector<1x78xi32>
    %50 = arith.addi %39, %49 : vector<1x78xi32>
    %51 = arith.select %48, %50, %39 : vector<1x78xi1>, vector<1x78xi32>
    %c1_i32_31 = arith.constant 1 : i32
    %52 = vector.broadcast %c1_i32_31 : i32 to vector<1x78xi32>
    %53 = arith.cmpi sge, %51, %52 : vector<1x78xi32>
    %c8_i32 = arith.constant 8 : i32
    %54 = vector.broadcast %c8_i32 : i32 to vector<1x78xi32>
    %55 = arith.cmpi sle, %51, %54 : vector<1x78xi32>
    %56 = arith.andi %53, %55 : vector<1x78xi1>
    %cst_32 = arith.constant 0.000000e+00 : f32
    %57 = vector.shape_cast %56 : vector<1x78xi1> to vector<1x78xi1>
    %58 = vector.broadcast %57 : vector<1x78xi1> to vector<32x78xi1>
    %59 = vector.broadcast %cst_32 : f32 to vector<32x78xf32>
    %60 = arith.select %58, %32, %59 : vector<32x78xi1>, vector<32x78xf32>
    %cst_33 = arith.constant 0.000000e+00 : bf16
    %61 = vector.broadcast %cst_33 : bf16 to vector<32x11xbf16>
    %c0_34 = arith.constant 0 : index
    %c0_35 = arith.constant 0 : index
    %c0_36 = arith.constant 0 : index
    %62 = vector.load %arg7[%c0_34, %c0_35, %c0_36] : memref<1x32x100xbf16, #tpu.memory_space<vmem>>, vector<1x32x11xbf16>
    %63 = vector.shape_cast %62 : vector<1x32x11xbf16> to vector<32x11xbf16>
    %64 = vector.shape_cast %61 : vector<32x11xbf16> to vector<1x32x11xbf16>
    tpu.vector_store %arg7[%c0_34, %c0_35, %c0_36], %64 {strides = array<i32>} : memref<1x32x100xbf16, #tpu.memory_space<vmem>>, vector<1x32x11xbf16>,
    %65 = arith.truncf %60 : vector<32x78xf32> to vector<32x78xbf16>
    %c0_37 = arith.constant 0 : index
    %c0_38 = arith.constant 0 : index
    %c11_39 = arith.constant 11 : index
    %66 = vector.load %arg7[%c0_37, %c0_38, %c11_39] : memref<1x32x100xbf16, #tpu.memory_space<vmem>>, vector<1x32x78xbf16>
    %67 = vector.shape_cast %66 : vector<1x32x78xbf16> to vector<32x78xbf16>
    %68 = vector.shape_cast %65 : vector<32x78xbf16> to vector<1x32x78xbf16>
    tpu.vector_store %arg7[%c0_37, %c0_38, %c11_39], %68 {strides = array<i32>} : memref<1x32x100xbf16, #tpu.memory_space<vmem>>, vector<1x32x78xbf16>,
    %cst_40 = arith.constant 0.000000e+00 : bf16
    %69 = vector.broadcast %cst_40 : bf16 to vector<32x11xbf16>
    %c0_41 = arith.constant 0 : index
    %c0_42 = arith.constant 0 : index
    %c89 = arith.constant 89 : index
    %70 = vector.load %arg7[%c0_41, %c0_42, %c89] : memref<1x32x100xbf16, #tpu.memory_space<vmem>>, vector<1x32x11xbf16>
    %71 = vector.shape_cast %70 : vector<1x32x11xbf16> to vector<32x11xbf16>
    %72 = vector.shape_cast %69 : vector<32x11xbf16> to vector<1x32x11xbf16>
    tpu.vector_store %arg7[%c0_41, %c0_42, %c89], %72 {strides = array<i32>} : memref<1x32x100xbf16, #tpu.memory_space<vmem>>, vector<1x32x11xbf16>,
    return
  }
  func.func @transform_0(%arg0: i32, %arg1: i32) -> (i32, i32, i32) {
    %c0_i32 = arith.constant 0 : i32
    %c0_i32_0 = arith.constant 0 : i32
    %c0_i32_1 = arith.constant 0 : i32
    return %arg0, %c0_i32, %c0_i32_0 : i32, i32, i32
  }
  func.func @transform_1(%arg0: i32, %arg1: i32) -> (i32, i32) {
    %c0_i32 = arith.constant 0 : i32
    %c0_i32_0 = arith.constant 0 : i32
    return %arg1, %c0_i32 : i32, i32
  }
  func.func @transform_2(%arg0: i32, %arg1: i32) -> (i32, i32) {
    %c0_i32 = arith.constant 0 : i32
    %c0_i32_0 = arith.constant 0 : i32
    return %arg1, %c0_i32 : i32, i32
  }
  func.func @transform_3(%arg0: i32, %arg1: i32) -> (i32, i32) {
    %c0_i32 = arith.constant 0 : i32
    %c0_i32_0 = arith.constant 0 : i32
    return %arg1, %c0_i32 : i32, i32
  }
  func.func @transform_4(%arg0: i32, %arg1: i32) -> (i32, i32) {
    %c0_i32 = arith.constant 0 : i32
    %c0_i32_0 = arith.constant 0 : i32
    return %arg1, %c0_i32 : i32, i32
  }
  func.func @transform_5(%arg0: i32, %arg1: i32) -> (i32, i32, i32) {
    %c0_i32 = arith.constant 0 : i32
    %c0_i32_0 = arith.constant 0 : i32
    return %arg0, %arg1, %c0_i32 : i32, i32, i32
  }
}

module attributes {stable_mosaic.version = 11 : i64} {
  func.func @_maxpool_kernel(%arg0: i32, %arg1: memref<1x128x8xbf16, #tpu.memory_space<vmem>>, %arg2: memref<1x128x8xbf16, #tpu.memory_space<vmem>>, %arg3: memref<1x128x4xbf16, #tpu.memory_space<vmem>>) attributes {dimension_semantics = [#tpu.dimension_semantics<parallel>], iteration_bounds = array<i64: 2>, scalar_prefetch = 0 : i64, scratch_operands = 0 : i64, tpu.core_type = #tpu.core_type<tc>, window_params = [{transform_indices = @transform_0, window_bounds = array<i64: 1, 128, 8>}, {transform_indices = @transform_1, window_bounds = array<i64: 1, 128, 8>}, {transform_indices = @transform_2, window_bounds = array<i64: 1, 128, 4>}]} {
    %c0 = arith.constant 0 : index
    %c0_0 = arith.constant 0 : index
    %c0_1 = arith.constant 0 : index
    %0 = vector.load %arg1[%c0, %c0_0, %c0_1] : memref<1x128x8xbf16, #tpu.memory_space<vmem>>, vector<1x128x4xbf16>
    %1 = vector.shape_cast %0 : vector<1x128x4xbf16> to vector<128x4xbf16>
    %c0_2 = arith.constant 0 : index
    %c0_3 = arith.constant 0 : index
    %c4 = arith.constant 4 : index
    %2 = vector.load %arg1[%c0_2, %c0_3, %c4] : memref<1x128x8xbf16, #tpu.memory_space<vmem>>, vector<1x128x4xbf16>
    %3 = vector.shape_cast %2 : vector<1x128x4xbf16> to vector<128x4xbf16>
    %4 = arith.maximumf %1, %3 : vector<128x4xbf16>
    %c0_4 = arith.constant 0 : index
    %c0_5 = arith.constant 0 : index
    %c0_6 = arith.constant 0 : index
    %5 = vector.load %arg2[%c0_4, %c0_5, %c0_6] : memref<1x128x8xbf16, #tpu.memory_space<vmem>>, vector<1x128x4xbf16>
    %6 = vector.shape_cast %5 : vector<1x128x4xbf16> to vector<128x4xbf16>
    %c0_7 = arith.constant 0 : index
    %c0_8 = arith.constant 0 : index
    %c4_9 = arith.constant 4 : index
    %7 = vector.load %arg2[%c0_7, %c0_8, %c4_9] : memref<1x128x8xbf16, #tpu.memory_space<vmem>>, vector<1x128x4xbf16>
    %8 = vector.shape_cast %7 : vector<1x128x4xbf16> to vector<128x4xbf16>
    %9 = arith.maximumf %6, %8 : vector<128x4xbf16>
    %10 = arith.maximumf %4, %9 : vector<128x4xbf16>
    %c0_10 = arith.constant 0 : index
    %c0_11 = arith.constant 0 : index
    %c0_12 = arith.constant 0 : index
    %11 = vector.load %arg3[%c0_10, %c0_11, %c0_12] : memref<1x128x4xbf16, #tpu.memory_space<vmem>>, vector<1x128x4xbf16>
    %12 = vector.shape_cast %11 : vector<1x128x4xbf16> to vector<128x4xbf16>
    %13 = vector.shape_cast %10 : vector<128x4xbf16> to vector<1x128x4xbf16>
    tpu.vector_store %arg3[%c0_10, %c0_11, %c0_12], %13 {strides = array<i32>} : memref<1x128x4xbf16, #tpu.memory_space<vmem>>, vector<1x128x4xbf16>,
    return
  }
  func.func @transform_0(%arg0: i32) -> (i32, i32, i32) {
    %c0_i32 = arith.constant 0 : i32
    %c0_i32_0 = arith.constant 0 : i32
    %c0_i32_1 = arith.constant 0 : i32
    return %arg0, %c0_i32, %c0_i32_0 : i32, i32, i32
  }
  func.func @transform_1(%arg0: i32) -> (i32, i32, i32) {
    %c0_i32 = arith.constant 0 : i32
    %c0_i32_0 = arith.constant 0 : i32
    %c0_i32_1 = arith.constant 0 : i32
    return %arg0, %c0_i32, %c0_i32_0 : i32, i32, i32
  }
  func.func @transform_2(%arg0: i32) -> (i32, i32, i32) {
    %c0_i32 = arith.constant 0 : i32
    %c0_i32_0 = arith.constant 0 : i32
    %c0_i32_1 = arith.constant 0 : i32
    return %arg0, %c0_i32, %c0_i32_0 : i32, i32, i32
  }
}

module attributes {stable_mosaic.version = 11 : i64} {
  func.func @_tap_conv_kernel(%arg0: i32, %arg1: i32, %arg2: memref<1x32x36xbf16, #tpu.memory_space<vmem>>, %arg3: memref<32x288xbf16, #tpu.memory_space<vmem>>, %arg4: memref<32x1xf32, #tpu.memory_space<vmem>>, %arg5: memref<32x1xf32, #tpu.memory_space<vmem>>, %arg6: memref<32x1xf32, #tpu.memory_space<vmem>>, %arg7: memref<1x32x36xbf16, #tpu.memory_space<vmem>>) attributes {dimension_semantics = [#tpu.dimension_semantics<parallel>, #tpu.dimension_semantics<parallel>], iteration_bounds = array<i64: 2, 1>, scalar_prefetch = 0 : i64, scratch_operands = 0 : i64, tpu.core_type = #tpu.core_type<tc>, window_params = [{transform_indices = @transform_0, window_bounds = array<i64: 1, 32, 36>}, {transform_indices = @transform_1, window_bounds = array<i64: 32, 288>}, {transform_indices = @transform_2, window_bounds = array<i64: 32, 1>}, {transform_indices = @transform_3, window_bounds = array<i64: 32, 1>}, {transform_indices = @transform_4, window_bounds = array<i64: 32, 1>}, {transform_indices = @transform_5, window_bounds = array<i64: 1, 32, 36>}]} {
    %c0 = arith.constant 0 : index
    %c0_0 = arith.constant 0 : index
    %c0_1 = arith.constant 0 : index
    %0 = vector.load %arg2[%c0, %c0_0, %c0_1] : memref<1x32x36xbf16, #tpu.memory_space<vmem>>, vector<1x32x22xbf16>
    %1 = vector.shape_cast %0 : vector<1x32x22xbf16> to vector<32x22xbf16>
    %c0_2 = arith.constant 0 : index
    %c0_3 = arith.constant 0 : index
    %c1 = arith.constant 1 : index
    %2 = vector.load %arg2[%c0_2, %c0_3, %c1] : memref<1x32x36xbf16, #tpu.memory_space<vmem>>, vector<1x32x22xbf16>
    %3 = vector.shape_cast %2 : vector<1x32x22xbf16> to vector<32x22xbf16>
    %c0_4 = arith.constant 0 : index
    %c0_5 = arith.constant 0 : index
    %c2 = arith.constant 2 : index
    %4 = vector.load %arg2[%c0_4, %c0_5, %c2] : memref<1x32x36xbf16, #tpu.memory_space<vmem>>, vector<1x32x22xbf16>
    %5 = vector.shape_cast %4 : vector<1x32x22xbf16> to vector<32x22xbf16>
    %c0_6 = arith.constant 0 : index
    %c0_7 = arith.constant 0 : index
    %c6 = arith.constant 6 : index
    %6 = vector.load %arg2[%c0_6, %c0_7, %c6] : memref<1x32x36xbf16, #tpu.memory_space<vmem>>, vector<1x32x22xbf16>
    %7 = vector.shape_cast %6 : vector<1x32x22xbf16> to vector<32x22xbf16>
    %c0_8 = arith.constant 0 : index
    %c0_9 = arith.constant 0 : index
    %c7 = arith.constant 7 : index
    %8 = vector.load %arg2[%c0_8, %c0_9, %c7] : memref<1x32x36xbf16, #tpu.memory_space<vmem>>, vector<1x32x22xbf16>
    %9 = vector.shape_cast %8 : vector<1x32x22xbf16> to vector<32x22xbf16>
    %c0_10 = arith.constant 0 : index
    %c0_11 = arith.constant 0 : index
    %c8 = arith.constant 8 : index
    %10 = vector.load %arg2[%c0_10, %c0_11, %c8] : memref<1x32x36xbf16, #tpu.memory_space<vmem>>, vector<1x32x22xbf16>
    %11 = vector.shape_cast %10 : vector<1x32x22xbf16> to vector<32x22xbf16>
    %c0_12 = arith.constant 0 : index
    %c0_13 = arith.constant 0 : index
    %c12 = arith.constant 12 : index
    %12 = vector.load %arg2[%c0_12, %c0_13, %c12] : memref<1x32x36xbf16, #tpu.memory_space<vmem>>, vector<1x32x22xbf16>
    %13 = vector.shape_cast %12 : vector<1x32x22xbf16> to vector<32x22xbf16>
    %c0_14 = arith.constant 0 : index
    %c0_15 = arith.constant 0 : index
    %c13 = arith.constant 13 : index
    %14 = vector.load %arg2[%c0_14, %c0_15, %c13] : memref<1x32x36xbf16, #tpu.memory_space<vmem>>, vector<1x32x22xbf16>
    %15 = vector.shape_cast %14 : vector<1x32x22xbf16> to vector<32x22xbf16>
    %c0_16 = arith.constant 0 : index
    %c0_17 = arith.constant 0 : index
    %c14 = arith.constant 14 : index
    %16 = vector.load %arg2[%c0_16, %c0_17, %c14] : memref<1x32x36xbf16, #tpu.memory_space<vmem>>, vector<1x32x22xbf16>
    %17 = vector.shape_cast %16 : vector<1x32x22xbf16> to vector<32x22xbf16>
    %18 = tpu.concatenate %1, %3, %5, %7, %9, %11, %13, %15, %17 in 0 : vector<32x22xbf16>, vector<32x22xbf16>, vector<32x22xbf16>, vector<32x22xbf16>, vector<32x22xbf16>, vector<32x22xbf16>, vector<32x22xbf16>, vector<32x22xbf16>, vector<32x22xbf16> -> vector<288x22xbf16>
    %c0_18 = arith.constant 0 : index
    %c0_19 = arith.constant 0 : index
    %19 = vector.load %arg3[%c0_18, %c0_19] : memref<32x288xbf16, #tpu.memory_space<vmem>>, vector<32x288xbf16>
    %cst = arith.constant dense<0.000000e+00> : vector<32x22xf32>
    %20 = tpu.matmul %19, %18, %cst {dimension_numbers = #tpu.dot_dimension_numbers<[1], [0], [0], [1], [0, 0, 1, 1], [], []>} : vector<32x288xbf16>, vector<288x22xbf16>, vector<32x22xf32> -> vector<32x22xf32>
    %c0_20 = arith.constant 0 : index
    %c0_21 = arith.constant 0 : index
    %21 = vector.load %arg4[%c0_20, %c0_21] : memref<32x1xf32, #tpu.memory_space<vmem>>, vector<32x1xf32>
    %22 = vector.broadcast %21 : vector<32x1xf32> to vector<32x22xf32>
    %23 = arith.addf %20, %22 : vector<32x22xf32>
    %cst_22 = arith.constant 2.000000e-01 : f32
    %24 = vector.broadcast %cst_22 : f32 to vector<32x22xf32>
    %25 = arith.mulf %24, %23 : vector<32x22xf32>
    %26 = arith.maximumf %23, %25 : vector<32x22xf32>
    %c0_23 = arith.constant 0 : index
    %c0_24 = arith.constant 0 : index
    %27 = vector.load %arg5[%c0_23, %c0_24] : memref<32x1xf32, #tpu.memory_space<vmem>>, vector<32x1xf32>
    %28 = vector.broadcast %27 : vector<32x1xf32> to vector<32x22xf32>
    %29 = arith.mulf %26, %28 : vector<32x22xf32>
    %c0_25 = arith.constant 0 : index
    %c0_26 = arith.constant 0 : index
    %30 = vector.load %arg6[%c0_25, %c0_26] : memref<32x1xf32, #tpu.memory_space<vmem>>, vector<32x1xf32>
    %31 = vector.broadcast %30 : vector<32x1xf32> to vector<32x22xf32>
    %32 = arith.addf %29, %31 : vector<32x22xf32>
    %33 = tpu.iota {dimensions = array<i32: 1>} : vector<1x22xi32>
    %c1_i32 = arith.constant 1 : i32
    %34 = vector.broadcast %c1_i32 : i32 to vector<1x22xi32>
    %35 = arith.addi %33, %34 : vector<1x22xi32>
    %c6_i32 = arith.constant 6 : i32
    %c0_i32 = arith.constant 0 : i32
    %36 = arith.cmpi eq, %c6_i32, %c0_i32 : i32
    %c1_i32_27 = arith.constant 1 : i32
    %37 = arith.select %36, %c1_i32_27, %c6_i32 : i32
    %38 = vector.broadcast %37 : i32 to vector<1x22xi32>
    %39 = arith.remsi %35, %38 : vector<1x22xi32>
    %c0_i32_28 = arith.constant 0 : i32
    %40 = vector.broadcast %c0_i32_28 : i32 to vector<1x22xi32>
    %41 = arith.cmpi ne, %39, %40 : vector<1x22xi32>
    %c0_i32_29 = arith.constant 0 : i32
    %42 = vector.broadcast %c0_i32_29 : i32 to vector<1x22xi32>
    %43 = arith.cmpi slt, %39, %42 : vector<1x22xi32>
    %c0_i32_30 = arith.constant 0 : i32
    %44 = arith.cmpi slt, %37, %c0_i32_30 : i32
    %45 = vector.broadcast %44 : i1 to vector<1x22xi1>
    %46 = vector.broadcast %45 : vector<1x22xi1> to vector<1x22xi1>
    %47 = arith.xori %43, %46 : vector<1x22xi1>
    %48 = arith.andi %47, %41 : vector<1x22xi1>
    %49 = vector.broadcast %37 : i32 to vector<1x22xi32>
    %50 = arith.addi %39, %49 : vector<1x22xi32>
    %51 = arith.select %48, %50, %39 : vector<1x22xi1>, vector<1x22xi32>
    %c1_i32_31 = arith.constant 1 : i32
    %52 = vector.broadcast %c1_i32_31 : i32 to vector<1x22xi32>
    %53 = arith.cmpi sge, %51, %52 : vector<1x22xi32>
    %c4_i32 = arith.constant 4 : i32
    %54 = vector.broadcast %c4_i32 : i32 to vector<1x22xi32>
    %55 = arith.cmpi sle, %51, %54 : vector<1x22xi32>
    %56 = arith.andi %53, %55 : vector<1x22xi1>
    %cst_32 = arith.constant 0.000000e+00 : f32
    %57 = vector.shape_cast %56 : vector<1x22xi1> to vector<1x22xi1>
    %58 = vector.broadcast %57 : vector<1x22xi1> to vector<32x22xi1>
    %59 = vector.broadcast %cst_32 : f32 to vector<32x22xf32>
    %60 = arith.select %58, %32, %59 : vector<32x22xi1>, vector<32x22xf32>
    %cst_33 = arith.constant 0.000000e+00 : bf16
    %61 = vector.broadcast %cst_33 : bf16 to vector<32x7xbf16>
    %c0_34 = arith.constant 0 : index
    %c0_35 = arith.constant 0 : index
    %c0_36 = arith.constant 0 : index
    %62 = vector.load %arg7[%c0_34, %c0_35, %c0_36] : memref<1x32x36xbf16, #tpu.memory_space<vmem>>, vector<1x32x7xbf16>
    %63 = vector.shape_cast %62 : vector<1x32x7xbf16> to vector<32x7xbf16>
    %64 = vector.shape_cast %61 : vector<32x7xbf16> to vector<1x32x7xbf16>
    tpu.vector_store %arg7[%c0_34, %c0_35, %c0_36], %64 {strides = array<i32>} : memref<1x32x36xbf16, #tpu.memory_space<vmem>>, vector<1x32x7xbf16>,
    %65 = arith.truncf %60 : vector<32x22xf32> to vector<32x22xbf16>
    %c0_37 = arith.constant 0 : index
    %c0_38 = arith.constant 0 : index
    %c7_39 = arith.constant 7 : index
    %66 = vector.load %arg7[%c0_37, %c0_38, %c7_39] : memref<1x32x36xbf16, #tpu.memory_space<vmem>>, vector<1x32x22xbf16>
    %67 = vector.shape_cast %66 : vector<1x32x22xbf16> to vector<32x22xbf16>
    %68 = vector.shape_cast %65 : vector<32x22xbf16> to vector<1x32x22xbf16>
    tpu.vector_store %arg7[%c0_37, %c0_38, %c7_39], %68 {strides = array<i32>} : memref<1x32x36xbf16, #tpu.memory_space<vmem>>, vector<1x32x22xbf16>,
    %cst_40 = arith.constant 0.000000e+00 : bf16
    %69 = vector.broadcast %cst_40 : bf16 to vector<32x7xbf16>
    %c0_41 = arith.constant 0 : index
    %c0_42 = arith.constant 0 : index
    %c29 = arith.constant 29 : index
    %70 = vector.load %arg7[%c0_41, %c0_42, %c29] : memref<1x32x36xbf16, #tpu.memory_space<vmem>>, vector<1x32x7xbf16>
    %71 = vector.shape_cast %70 : vector<1x32x7xbf16> to vector<32x7xbf16>
    %72 = vector.shape_cast %69 : vector<32x7xbf16> to vector<1x32x7xbf16>
    tpu.vector_store %arg7[%c0_41, %c0_42, %c29], %72 {strides = array<i32>} : memref<1x32x36xbf16, #tpu.memory_space<vmem>>, vector<1x32x7xbf16>,
    return
  }
  func.func @transform_0(%arg0: i32, %arg1: i32) -> (i32, i32, i32) {
    %c0_i32 = arith.constant 0 : i32
    %c0_i32_0 = arith.constant 0 : i32
    %c0_i32_1 = arith.constant 0 : i32
    return %arg0, %c0_i32, %c0_i32_0 : i32, i32, i32
  }
  func.func @transform_1(%arg0: i32, %arg1: i32) -> (i32, i32) {
    %c0_i32 = arith.constant 0 : i32
    %c0_i32_0 = arith.constant 0 : i32
    return %arg1, %c0_i32 : i32, i32
  }
  func.func @transform_2(%arg0: i32, %arg1: i32) -> (i32, i32) {
    %c0_i32 = arith.constant 0 : i32
    %c0_i32_0 = arith.constant 0 : i32
    return %arg1, %c0_i32 : i32, i32
  }
  func.func @transform_3(%arg0: i32, %arg1: i32) -> (i32, i32) {
    %c0_i32 = arith.constant 0 : i32
    %c0_i32_0 = arith.constant 0 : i32
    return %arg1, %c0_i32 : i32, i32
  }
  func.func @transform_4(%arg0: i32, %arg1: i32) -> (i32, i32) {
    %c0_i32 = arith.constant 0 : i32
    %c0_i32_0 = arith.constant 0 : i32
    return %arg1, %c0_i32 : i32, i32
  }
  func.func @transform_5(%arg0: i32, %arg1: i32) -> (i32, i32, i32) {
    %c0_i32 = arith.constant 0 : i32
    %c0_i32_0 = arith.constant 0 : i32
    return %arg0, %arg1, %c0_i32 : i32, i32, i32
  }
}

module attributes {stable_mosaic.version = 11 : i64} {
  func.func @_tap_conv_kernel(%arg0: i32, %arg1: i32, %arg2: memref<1x32x36xbf16, #tpu.memory_space<vmem>>, %arg3: memref<16x288xbf16, #tpu.memory_space<vmem>>, %arg4: memref<16x1xf32, #tpu.memory_space<vmem>>, %arg5: memref<16x1xf32, #tpu.memory_space<vmem>>, %arg6: memref<16x1xf32, #tpu.memory_space<vmem>>, %arg7: memref<1x16x36xbf16, #tpu.memory_space<vmem>>) attributes {dimension_semantics = [#tpu.dimension_semantics<parallel>, #tpu.dimension_semantics<parallel>], iteration_bounds = array<i64: 2, 1>, scalar_prefetch = 0 : i64, scratch_operands = 0 : i64, tpu.core_type = #tpu.core_type<tc>, window_params = [{transform_indices = @transform_0, window_bounds = array<i64: 1, 32, 36>}, {transform_indices = @transform_1, window_bounds = array<i64: 16, 288>}, {transform_indices = @transform_2, window_bounds = array<i64: 16, 1>}, {transform_indices = @transform_3, window_bounds = array<i64: 16, 1>}, {transform_indices = @transform_4, window_bounds = array<i64: 16, 1>}, {transform_indices = @transform_5, window_bounds = array<i64: 1, 16, 36>}]} {
    %c0 = arith.constant 0 : index
    %c0_0 = arith.constant 0 : index
    %c0_1 = arith.constant 0 : index
    %0 = vector.load %arg2[%c0, %c0_0, %c0_1] : memref<1x32x36xbf16, #tpu.memory_space<vmem>>, vector<1x32x22xbf16>
    %1 = vector.shape_cast %0 : vector<1x32x22xbf16> to vector<32x22xbf16>
    %c0_2 = arith.constant 0 : index
    %c0_3 = arith.constant 0 : index
    %c1 = arith.constant 1 : index
    %2 = vector.load %arg2[%c0_2, %c0_3, %c1] : memref<1x32x36xbf16, #tpu.memory_space<vmem>>, vector<1x32x22xbf16>
    %3 = vector.shape_cast %2 : vector<1x32x22xbf16> to vector<32x22xbf16>
    %c0_4 = arith.constant 0 : index
    %c0_5 = arith.constant 0 : index
    %c2 = arith.constant 2 : index
    %4 = vector.load %arg2[%c0_4, %c0_5, %c2] : memref<1x32x36xbf16, #tpu.memory_space<vmem>>, vector<1x32x22xbf16>
    %5 = vector.shape_cast %4 : vector<1x32x22xbf16> to vector<32x22xbf16>
    %c0_6 = arith.constant 0 : index
    %c0_7 = arith.constant 0 : index
    %c6 = arith.constant 6 : index
    %6 = vector.load %arg2[%c0_6, %c0_7, %c6] : memref<1x32x36xbf16, #tpu.memory_space<vmem>>, vector<1x32x22xbf16>
    %7 = vector.shape_cast %6 : vector<1x32x22xbf16> to vector<32x22xbf16>
    %c0_8 = arith.constant 0 : index
    %c0_9 = arith.constant 0 : index
    %c7 = arith.constant 7 : index
    %8 = vector.load %arg2[%c0_8, %c0_9, %c7] : memref<1x32x36xbf16, #tpu.memory_space<vmem>>, vector<1x32x22xbf16>
    %9 = vector.shape_cast %8 : vector<1x32x22xbf16> to vector<32x22xbf16>
    %c0_10 = arith.constant 0 : index
    %c0_11 = arith.constant 0 : index
    %c8 = arith.constant 8 : index
    %10 = vector.load %arg2[%c0_10, %c0_11, %c8] : memref<1x32x36xbf16, #tpu.memory_space<vmem>>, vector<1x32x22xbf16>
    %11 = vector.shape_cast %10 : vector<1x32x22xbf16> to vector<32x22xbf16>
    %c0_12 = arith.constant 0 : index
    %c0_13 = arith.constant 0 : index
    %c12 = arith.constant 12 : index
    %12 = vector.load %arg2[%c0_12, %c0_13, %c12] : memref<1x32x36xbf16, #tpu.memory_space<vmem>>, vector<1x32x22xbf16>
    %13 = vector.shape_cast %12 : vector<1x32x22xbf16> to vector<32x22xbf16>
    %c0_14 = arith.constant 0 : index
    %c0_15 = arith.constant 0 : index
    %c13 = arith.constant 13 : index
    %14 = vector.load %arg2[%c0_14, %c0_15, %c13] : memref<1x32x36xbf16, #tpu.memory_space<vmem>>, vector<1x32x22xbf16>
    %15 = vector.shape_cast %14 : vector<1x32x22xbf16> to vector<32x22xbf16>
    %c0_16 = arith.constant 0 : index
    %c0_17 = arith.constant 0 : index
    %c14 = arith.constant 14 : index
    %16 = vector.load %arg2[%c0_16, %c0_17, %c14] : memref<1x32x36xbf16, #tpu.memory_space<vmem>>, vector<1x32x22xbf16>
    %17 = vector.shape_cast %16 : vector<1x32x22xbf16> to vector<32x22xbf16>
    %18 = tpu.concatenate %1, %3, %5, %7, %9, %11, %13, %15, %17 in 0 : vector<32x22xbf16>, vector<32x22xbf16>, vector<32x22xbf16>, vector<32x22xbf16>, vector<32x22xbf16>, vector<32x22xbf16>, vector<32x22xbf16>, vector<32x22xbf16>, vector<32x22xbf16> -> vector<288x22xbf16>
    %c0_18 = arith.constant 0 : index
    %c0_19 = arith.constant 0 : index
    %19 = vector.load %arg3[%c0_18, %c0_19] : memref<16x288xbf16, #tpu.memory_space<vmem>>, vector<16x288xbf16>
    %cst = arith.constant dense<0.000000e+00> : vector<16x22xf32>
    %20 = tpu.matmul %19, %18, %cst {dimension_numbers = #tpu.dot_dimension_numbers<[1], [0], [0], [1], [0, 0, 1, 1], [], []>} : vector<16x288xbf16>, vector<288x22xbf16>, vector<16x22xf32> -> vector<16x22xf32>
    %c0_20 = arith.constant 0 : index
    %c0_21 = arith.constant 0 : index
    %21 = vector.load %arg4[%c0_20, %c0_21] : memref<16x1xf32, #tpu.memory_space<vmem>>, vector<16x1xf32>
    %22 = vector.broadcast %21 : vector<16x1xf32> to vector<16x22xf32>
    %23 = arith.addf %20, %22 : vector<16x22xf32>
    %cst_22 = arith.constant 2.000000e-01 : f32
    %24 = vector.broadcast %cst_22 : f32 to vector<16x22xf32>
    %25 = arith.mulf %24, %23 : vector<16x22xf32>
    %26 = arith.maximumf %23, %25 : vector<16x22xf32>
    %c0_23 = arith.constant 0 : index
    %c0_24 = arith.constant 0 : index
    %27 = vector.load %arg5[%c0_23, %c0_24] : memref<16x1xf32, #tpu.memory_space<vmem>>, vector<16x1xf32>
    %28 = vector.broadcast %27 : vector<16x1xf32> to vector<16x22xf32>
    %29 = arith.mulf %26, %28 : vector<16x22xf32>
    %c0_25 = arith.constant 0 : index
    %c0_26 = arith.constant 0 : index
    %30 = vector.load %arg6[%c0_25, %c0_26] : memref<16x1xf32, #tpu.memory_space<vmem>>, vector<16x1xf32>
    %31 = vector.broadcast %30 : vector<16x1xf32> to vector<16x22xf32>
    %32 = arith.addf %29, %31 : vector<16x22xf32>
    %33 = tpu.iota {dimensions = array<i32: 1>} : vector<1x22xi32>
    %c1_i32 = arith.constant 1 : i32
    %34 = vector.broadcast %c1_i32 : i32 to vector<1x22xi32>
    %35 = arith.addi %33, %34 : vector<1x22xi32>
    %c6_i32 = arith.constant 6 : i32
    %c0_i32 = arith.constant 0 : i32
    %36 = arith.cmpi eq, %c6_i32, %c0_i32 : i32
    %c1_i32_27 = arith.constant 1 : i32
    %37 = arith.select %36, %c1_i32_27, %c6_i32 : i32
    %38 = vector.broadcast %37 : i32 to vector<1x22xi32>
    %39 = arith.remsi %35, %38 : vector<1x22xi32>
    %c0_i32_28 = arith.constant 0 : i32
    %40 = vector.broadcast %c0_i32_28 : i32 to vector<1x22xi32>
    %41 = arith.cmpi ne, %39, %40 : vector<1x22xi32>
    %c0_i32_29 = arith.constant 0 : i32
    %42 = vector.broadcast %c0_i32_29 : i32 to vector<1x22xi32>
    %43 = arith.cmpi slt, %39, %42 : vector<1x22xi32>
    %c0_i32_30 = arith.constant 0 : i32
    %44 = arith.cmpi slt, %37, %c0_i32_30 : i32
    %45 = vector.broadcast %44 : i1 to vector<1x22xi1>
    %46 = vector.broadcast %45 : vector<1x22xi1> to vector<1x22xi1>
    %47 = arith.xori %43, %46 : vector<1x22xi1>
    %48 = arith.andi %47, %41 : vector<1x22xi1>
    %49 = vector.broadcast %37 : i32 to vector<1x22xi32>
    %50 = arith.addi %39, %49 : vector<1x22xi32>
    %51 = arith.select %48, %50, %39 : vector<1x22xi1>, vector<1x22xi32>
    %c1_i32_31 = arith.constant 1 : i32
    %52 = vector.broadcast %c1_i32_31 : i32 to vector<1x22xi32>
    %53 = arith.cmpi sge, %51, %52 : vector<1x22xi32>
    %c4_i32 = arith.constant 4 : i32
    %54 = vector.broadcast %c4_i32 : i32 to vector<1x22xi32>
    %55 = arith.cmpi sle, %51, %54 : vector<1x22xi32>
    %56 = arith.andi %53, %55 : vector<1x22xi1>
    %cst_32 = arith.constant 0.000000e+00 : f32
    %57 = vector.shape_cast %56 : vector<1x22xi1> to vector<1x22xi1>
    %58 = vector.broadcast %57 : vector<1x22xi1> to vector<16x22xi1>
    %59 = vector.broadcast %cst_32 : f32 to vector<16x22xf32>
    %60 = arith.select %58, %32, %59 : vector<16x22xi1>, vector<16x22xf32>
    %cst_33 = arith.constant 0.000000e+00 : bf16
    %61 = vector.broadcast %cst_33 : bf16 to vector<16x7xbf16>
    %c0_34 = arith.constant 0 : index
    %c0_35 = arith.constant 0 : index
    %c0_36 = arith.constant 0 : index
    %62 = vector.load %arg7[%c0_34, %c0_35, %c0_36] : memref<1x16x36xbf16, #tpu.memory_space<vmem>>, vector<1x16x7xbf16>
    %63 = vector.shape_cast %62 : vector<1x16x7xbf16> to vector<16x7xbf16>
    %64 = vector.shape_cast %61 : vector<16x7xbf16> to vector<1x16x7xbf16>
    tpu.vector_store %arg7[%c0_34, %c0_35, %c0_36], %64 {strides = array<i32>} : memref<1x16x36xbf16, #tpu.memory_space<vmem>>, vector<1x16x7xbf16>,
    %65 = arith.truncf %60 : vector<16x22xf32> to vector<16x22xbf16>
    %c0_37 = arith.constant 0 : index
    %c0_38 = arith.constant 0 : index
    %c7_39 = arith.constant 7 : index
    %66 = vector.load %arg7[%c0_37, %c0_38, %c7_39] : memref<1x16x36xbf16, #tpu.memory_space<vmem>>, vector<1x16x22xbf16>
    %67 = vector.shape_cast %66 : vector<1x16x22xbf16> to vector<16x22xbf16>
    %68 = vector.shape_cast %65 : vector<16x22xbf16> to vector<1x16x22xbf16>
    tpu.vector_store %arg7[%c0_37, %c0_38, %c7_39], %68 {strides = array<i32>} : memref<1x16x36xbf16, #tpu.memory_space<vmem>>, vector<1x16x22xbf16>,
    %cst_40 = arith.constant 0.000000e+00 : bf16
    %69 = vector.broadcast %cst_40 : bf16 to vector<16x7xbf16>
    %c0_41 = arith.constant 0 : index
    %c0_42 = arith.constant 0 : index
    %c29 = arith.constant 29 : index
    %70 = vector.load %arg7[%c0_41, %c0_42, %c29] : memref<1x16x36xbf16, #tpu.memory_space<vmem>>, vector<1x16x7xbf16>
    %71 = vector.shape_cast %70 : vector<1x16x7xbf16> to vector<16x7xbf16>
    %72 = vector.shape_cast %69 : vector<16x7xbf16> to vector<1x16x7xbf16>
    tpu.vector_store %arg7[%c0_41, %c0_42, %c29], %72 {strides = array<i32>} : memref<1x16x36xbf16, #tpu.memory_space<vmem>>, vector<1x16x7xbf16>,
    return
  }
  func.func @transform_0(%arg0: i32, %arg1: i32) -> (i32, i32, i32) {
    %c0_i32 = arith.constant 0 : i32
    %c0_i32_0 = arith.constant 0 : i32
    %c0_i32_1 = arith.constant 0 : i32
    return %arg0, %c0_i32, %c0_i32_0 : i32, i32, i32
  }
  func.func @transform_1(%arg0: i32, %arg1: i32) -> (i32, i32) {
    %c0_i32 = arith.constant 0 : i32
    %c0_i32_0 = arith.constant 0 : i32
    return %arg1, %c0_i32 : i32, i32
  }
  func.func @transform_2(%arg0: i32, %arg1: i32) -> (i32, i32) {
    %c0_i32 = arith.constant 0 : i32
    %c0_i32_0 = arith.constant 0 : i32
    return %arg1, %c0_i32 : i32, i32
  }
  func.func @transform_3(%arg0: i32, %arg1: i32) -> (i32, i32) {
    %c0_i32 = arith.constant 0 : i32
    %c0_i32_0 = arith.constant 0 : i32
    return %arg1, %c0_i32 : i32, i32
  }
  func.func @transform_4(%arg0: i32, %arg1: i32) -> (i32, i32) {
    %c0_i32 = arith.constant 0 : i32
    %c0_i32_0 = arith.constant 0 : i32
    return %arg1, %c0_i32 : i32, i32
  }
  func.func @transform_5(%arg0: i32, %arg1: i32) -> (i32, i32, i32) {
    %c0_i32 = arith.constant 0 : i32
    %c0_i32_0 = arith.constant 0 : i32
    return %arg0, %arg1, %c0_i32 : i32, i32, i32
  }
}

module attributes {stable_mosaic.version = 11 : i64} {
  func.func @_tap_conv_kernel(%arg0: i32, %arg1: i32, %arg2: memref<1x16x36xbf16, #tpu.memory_space<vmem>>, %arg3: memref<64x64xbf16, #tpu.memory_space<vmem>>, %arg4: memref<64x1xf32, #tpu.memory_space<vmem>>, %arg5: memref<64x1xf32, #tpu.memory_space<vmem>>, %arg6: memref<64x1xf32, #tpu.memory_space<vmem>>, %arg7: memref<1x64x36xbf16, #tpu.memory_space<vmem>>) attributes {dimension_semantics = [#tpu.dimension_semantics<parallel>, #tpu.dimension_semantics<parallel>], iteration_bounds = array<i64: 2, 1>, scalar_prefetch = 0 : i64, scratch_operands = 0 : i64, tpu.core_type = #tpu.core_type<tc>, window_params = [{transform_indices = @transform_0, window_bounds = array<i64: 1, 16, 36>}, {transform_indices = @transform_1, window_bounds = array<i64: 64, 64>}, {transform_indices = @transform_2, window_bounds = array<i64: 64, 1>}, {transform_indices = @transform_3, window_bounds = array<i64: 64, 1>}, {transform_indices = @transform_4, window_bounds = array<i64: 64, 1>}, {transform_indices = @transform_5, window_bounds = array<i64: 1, 64, 36>}]} {
    %c0 = arith.constant 0 : index
    %c0_0 = arith.constant 0 : index
    %c7 = arith.constant 7 : index
    %0 = vector.load %arg2[%c0, %c0_0, %c7] : memref<1x16x36xbf16, #tpu.memory_space<vmem>>, vector<1x16x22xbf16>
    %1 = vector.shape_cast %0 : vector<1x16x22xbf16> to vector<16x22xbf16>
    %c0_1 = arith.constant 0 : index
    %c0_2 = arith.constant 0 : index
    %c8 = arith.constant 8 : index
    %2 = vector.load %arg2[%c0_1, %c0_2, %c8] : memref<1x16x36xbf16, #tpu.memory_space<vmem>>, vector<1x16x22xbf16>
    %3 = vector.shape_cast %2 : vector<1x16x22xbf16> to vector<16x22xbf16>
    %c0_3 = arith.constant 0 : index
    %c0_4 = arith.constant 0 : index
    %c13 = arith.constant 13 : index
    %4 = vector.load %arg2[%c0_3, %c0_4, %c13] : memref<1x16x36xbf16, #tpu.memory_space<vmem>>, vector<1x16x22xbf16>
    %5 = vector.shape_cast %4 : vector<1x16x22xbf16> to vector<16x22xbf16>
    %c0_5 = arith.constant 0 : index
    %c0_6 = arith.constant 0 : index
    %c14 = arith.constant 14 : index
    %6 = vector.load %arg2[%c0_5, %c0_6, %c14] : memref<1x16x36xbf16, #tpu.memory_space<vmem>>, vector<1x16x22xbf16>
    %7 = vector.shape_cast %6 : vector<1x16x22xbf16> to vector<16x22xbf16>
    %8 = tpu.concatenate %1, %3, %5, %7 in 0 : vector<16x22xbf16>, vector<16x22xbf16>, vector<16x22xbf16>, vector<16x22xbf16> -> vector<64x22xbf16>
    %c0_7 = arith.constant 0 : index
    %c0_8 = arith.constant 0 : index
    %9 = vector.load %arg3[%c0_7, %c0_8] : memref<64x64xbf16, #tpu.memory_space<vmem>>, vector<64x64xbf16>
    %cst = arith.constant dense<0.000000e+00> : vector<64x22xf32>
    %10 = tpu.matmul %9, %8, %cst {dimension_numbers = #tpu.dot_dimension_numbers<[1], [0], [0], [1], [0, 0, 1, 1], [], []>} : vector<64x64xbf16>, vector<64x22xbf16>, vector<64x22xf32> -> vector<64x22xf32>
    %c0_9 = arith.constant 0 : index
    %c0_10 = arith.constant 0 : index
    %11 = vector.load %arg4[%c0_9, %c0_10] : memref<64x1xf32, #tpu.memory_space<vmem>>, vector<64x1xf32>
    %12 = vector.broadcast %11 : vector<64x1xf32> to vector<64x22xf32>
    %13 = arith.addf %10, %12 : vector<64x22xf32>
    %cst_11 = arith.constant 2.000000e-01 : f32
    %14 = vector.broadcast %cst_11 : f32 to vector<64x22xf32>
    %15 = arith.mulf %14, %13 : vector<64x22xf32>
    %16 = arith.maximumf %13, %15 : vector<64x22xf32>
    %c0_12 = arith.constant 0 : index
    %c0_13 = arith.constant 0 : index
    %17 = vector.load %arg5[%c0_12, %c0_13] : memref<64x1xf32, #tpu.memory_space<vmem>>, vector<64x1xf32>
    %18 = vector.broadcast %17 : vector<64x1xf32> to vector<64x22xf32>
    %19 = arith.mulf %16, %18 : vector<64x22xf32>
    %c0_14 = arith.constant 0 : index
    %c0_15 = arith.constant 0 : index
    %20 = vector.load %arg6[%c0_14, %c0_15] : memref<64x1xf32, #tpu.memory_space<vmem>>, vector<64x1xf32>
    %21 = vector.broadcast %20 : vector<64x1xf32> to vector<64x22xf32>
    %22 = arith.addf %19, %21 : vector<64x22xf32>
    %23 = tpu.iota {dimensions = array<i32: 1>} : vector<1x22xi32>
    %c1_i32 = arith.constant 1 : i32
    %24 = vector.broadcast %c1_i32 : i32 to vector<1x22xi32>
    %25 = arith.addi %23, %24 : vector<1x22xi32>
    %c6_i32 = arith.constant 6 : i32
    %c0_i32 = arith.constant 0 : i32
    %26 = arith.cmpi eq, %c6_i32, %c0_i32 : i32
    %c1_i32_16 = arith.constant 1 : i32
    %27 = arith.select %26, %c1_i32_16, %c6_i32 : i32
    %28 = vector.broadcast %27 : i32 to vector<1x22xi32>
    %29 = arith.remsi %25, %28 : vector<1x22xi32>
    %c0_i32_17 = arith.constant 0 : i32
    %30 = vector.broadcast %c0_i32_17 : i32 to vector<1x22xi32>
    %31 = arith.cmpi ne, %29, %30 : vector<1x22xi32>
    %c0_i32_18 = arith.constant 0 : i32
    %32 = vector.broadcast %c0_i32_18 : i32 to vector<1x22xi32>
    %33 = arith.cmpi slt, %29, %32 : vector<1x22xi32>
    %c0_i32_19 = arith.constant 0 : i32
    %34 = arith.cmpi slt, %27, %c0_i32_19 : i32
    %35 = vector.broadcast %34 : i1 to vector<1x22xi1>
    %36 = vector.broadcast %35 : vector<1x22xi1> to vector<1x22xi1>
    %37 = arith.xori %33, %36 : vector<1x22xi1>
    %38 = arith.andi %37, %31 : vector<1x22xi1>
    %39 = vector.broadcast %27 : i32 to vector<1x22xi32>
    %40 = arith.addi %29, %39 : vector<1x22xi32>
    %41 = arith.select %38, %40, %29 : vector<1x22xi1>, vector<1x22xi32>
    %c1_i32_20 = arith.constant 1 : i32
    %42 = vector.broadcast %c1_i32_20 : i32 to vector<1x22xi32>
    %43 = arith.cmpi sge, %41, %42 : vector<1x22xi32>
    %c4_i32 = arith.constant 4 : i32
    %44 = vector.broadcast %c4_i32 : i32 to vector<1x22xi32>
    %45 = arith.cmpi sle, %41, %44 : vector<1x22xi32>
    %46 = arith.andi %43, %45 : vector<1x22xi1>
    %cst_21 = arith.constant 0.000000e+00 : f32
    %47 = vector.shape_cast %46 : vector<1x22xi1> to vector<1x22xi1>
    %48 = vector.broadcast %47 : vector<1x22xi1> to vector<64x22xi1>
    %49 = vector.broadcast %cst_21 : f32 to vector<64x22xf32>
    %50 = arith.select %48, %22, %49 : vector<64x22xi1>, vector<64x22xf32>
    %cst_22 = arith.constant 0.000000e+00 : bf16
    %51 = vector.broadcast %cst_22 : bf16 to vector<64x7xbf16>
    %c0_23 = arith.constant 0 : index
    %c0_24 = arith.constant 0 : index
    %c0_25 = arith.constant 0 : index
    %52 = vector.load %arg7[%c0_23, %c0_24, %c0_25] : memref<1x64x36xbf16, #tpu.memory_space<vmem>>, vector<1x64x7xbf16>
    %53 = vector.shape_cast %52 : vector<1x64x7xbf16> to vector<64x7xbf16>
    %54 = vector.shape_cast %51 : vector<64x7xbf16> to vector<1x64x7xbf16>
    tpu.vector_store %arg7[%c0_23, %c0_24, %c0_25], %54 {strides = array<i32>} : memref<1x64x36xbf16, #tpu.memory_space<vmem>>, vector<1x64x7xbf16>,
    %55 = arith.truncf %50 : vector<64x22xf32> to vector<64x22xbf16>
    %c0_26 = arith.constant 0 : index
    %c0_27 = arith.constant 0 : index
    %c7_28 = arith.constant 7 : index
    %56 = vector.load %arg7[%c0_26, %c0_27, %c7_28] : memref<1x64x36xbf16, #tpu.memory_space<vmem>>, vector<1x64x22xbf16>
    %57 = vector.shape_cast %56 : vector<1x64x22xbf16> to vector<64x22xbf16>
    %58 = vector.shape_cast %55 : vector<64x22xbf16> to vector<1x64x22xbf16>
    tpu.vector_store %arg7[%c0_26, %c0_27, %c7_28], %58 {strides = array<i32>} : memref<1x64x36xbf16, #tpu.memory_space<vmem>>, vector<1x64x22xbf16>,
    %cst_29 = arith.constant 0.000000e+00 : bf16
    %59 = vector.broadcast %cst_29 : bf16 to vector<64x7xbf16>
    %c0_30 = arith.constant 0 : index
    %c0_31 = arith.constant 0 : index
    %c29 = arith.constant 29 : index
    %60 = vector.load %arg7[%c0_30, %c0_31, %c29] : memref<1x64x36xbf16, #tpu.memory_space<vmem>>, vector<1x64x7xbf16>
    %61 = vector.shape_cast %60 : vector<1x64x7xbf16> to vector<64x7xbf16>
    %62 = vector.shape_cast %59 : vector<64x7xbf16> to vector<1x64x7xbf16>
    tpu.vector_store %arg7[%c0_30, %c0_31, %c29], %62 {strides = array<i32>} : memref<1x64x36xbf16, #tpu.memory_space<vmem>>, vector<1x64x7xbf16>,
    return
  }
  func.func @transform_0(%arg0: i32, %arg1: i32) -> (i32, i32, i32) {
    %c0_i32 = arith.constant 0 : i32
    %c0_i32_0 = arith.constant 0 : i32
    %c0_i32_1 = arith.constant 0 : i32
    return %arg0, %c0_i32, %c0_i32_0 : i32, i32, i32
  }
  func.func @transform_1(%arg0: i32, %arg1: i32) -> (i32, i32) {
    %c0_i32 = arith.constant 0 : i32
    %c0_i32_0 = arith.constant 0 : i32
    return %arg1, %c0_i32 : i32, i32
  }
  func.func @transform_2(%arg0: i32, %arg1: i32) -> (i32, i32) {
    %c0_i32 = arith.constant 0 : i32
    %c0_i32_0 = arith.constant 0 : i32
    return %arg1, %c0_i32 : i32, i32
  }
  func.func @transform_3(%arg0: i32, %arg1: i32) -> (i32, i32) {
    %c0_i32 = arith.constant 0 : i32
    %c0_i32_0 = arith.constant 0 : i32
    return %arg1, %c0_i32 : i32, i32
  }
  func.func @transform_4(%arg0: i32, %arg1: i32) -> (i32, i32) {
    %c0_i32 = arith.constant 0 : i32
    %c0_i32_0 = arith.constant 0 : i32
    return %arg1, %c0_i32 : i32, i32
  }
  func.func @transform_5(%arg0: i32, %arg1: i32) -> (i32, i32, i32) {
    %c0_i32 = arith.constant 0 : i32
    %c0_i32_0 = arith.constant 0 : i32
    return %arg0, %arg1, %c0_i32 : i32, i32, i32
  }
}

module attributes {stable_mosaic.version = 11 : i64} {
  func.func @_tap_conv_kernel(%arg0: i32, %arg1: i32, %arg2: memref<1x16x100xbf16, #tpu.memory_space<vmem>>, %arg3: memref<8x144xbf16, #tpu.memory_space<vmem>>, %arg4: memref<8x1xf32, #tpu.memory_space<vmem>>, %arg5: memref<8x1xf32, #tpu.memory_space<vmem>>, %arg6: memref<8x1xf32, #tpu.memory_space<vmem>>, %arg7: memref<1x8x100xbf16, #tpu.memory_space<vmem>>) attributes {dimension_semantics = [#tpu.dimension_semantics<parallel>, #tpu.dimension_semantics<parallel>], iteration_bounds = array<i64: 2, 1>, scalar_prefetch = 0 : i64, scratch_operands = 0 : i64, tpu.core_type = #tpu.core_type<tc>, window_params = [{transform_indices = @transform_0, window_bounds = array<i64: 1, 16, 100>}, {transform_indices = @transform_1, window_bounds = array<i64: 8, 144>}, {transform_indices = @transform_2, window_bounds = array<i64: 8, 1>}, {transform_indices = @transform_3, window_bounds = array<i64: 8, 1>}, {transform_indices = @transform_4, window_bounds = array<i64: 8, 1>}, {transform_indices = @transform_5, window_bounds = array<i64: 1, 8, 100>}]} {
    %c0 = arith.constant 0 : index
    %c0_0 = arith.constant 0 : index
    %c0_1 = arith.constant 0 : index
    %0 = vector.load %arg2[%c0, %c0_0, %c0_1] : memref<1x16x100xbf16, #tpu.memory_space<vmem>>, vector<1x16x78xbf16>
    %1 = vector.shape_cast %0 : vector<1x16x78xbf16> to vector<16x78xbf16>
    %c0_2 = arith.constant 0 : index
    %c0_3 = arith.constant 0 : index
    %c1 = arith.constant 1 : index
    %2 = vector.load %arg2[%c0_2, %c0_3, %c1] : memref<1x16x100xbf16, #tpu.memory_space<vmem>>, vector<1x16x78xbf16>
    %3 = vector.shape_cast %2 : vector<1x16x78xbf16> to vector<16x78xbf16>
    %c0_4 = arith.constant 0 : index
    %c0_5 = arith.constant 0 : index
    %c2 = arith.constant 2 : index
    %4 = vector.load %arg2[%c0_4, %c0_5, %c2] : memref<1x16x100xbf16, #tpu.memory_space<vmem>>, vector<1x16x78xbf16>
    %5 = vector.shape_cast %4 : vector<1x16x78xbf16> to vector<16x78xbf16>
    %c0_6 = arith.constant 0 : index
    %c0_7 = arith.constant 0 : index
    %c10 = arith.constant 10 : index
    %6 = vector.load %arg2[%c0_6, %c0_7, %c10] : memref<1x16x100xbf16, #tpu.memory_space<vmem>>, vector<1x16x78xbf16>
    %7 = vector.shape_cast %6 : vector<1x16x78xbf16> to vector<16x78xbf16>
    %c0_8 = arith.constant 0 : index
    %c0_9 = arith.constant 0 : index
    %c11 = arith.constant 11 : index
    %8 = vector.load %arg2[%c0_8, %c0_9, %c11] : memref<1x16x100xbf16, #tpu.memory_space<vmem>>, vector<1x16x78xbf16>
    %9 = vector.shape_cast %8 : vector<1x16x78xbf16> to vector<16x78xbf16>
    %c0_10 = arith.constant 0 : index
    %c0_11 = arith.constant 0 : index
    %c12 = arith.constant 12 : index
    %10 = vector.load %arg2[%c0_10, %c0_11, %c12] : memref<1x16x100xbf16, #tpu.memory_space<vmem>>, vector<1x16x78xbf16>
    %11 = vector.shape_cast %10 : vector<1x16x78xbf16> to vector<16x78xbf16>
    %c0_12 = arith.constant 0 : index
    %c0_13 = arith.constant 0 : index
    %c20 = arith.constant 20 : index
    %12 = vector.load %arg2[%c0_12, %c0_13, %c20] : memref<1x16x100xbf16, #tpu.memory_space<vmem>>, vector<1x16x78xbf16>
    %13 = vector.shape_cast %12 : vector<1x16x78xbf16> to vector<16x78xbf16>
    %c0_14 = arith.constant 0 : index
    %c0_15 = arith.constant 0 : index
    %c21 = arith.constant 21 : index
    %14 = vector.load %arg2[%c0_14, %c0_15, %c21] : memref<1x16x100xbf16, #tpu.memory_space<vmem>>, vector<1x16x78xbf16>
    %15 = vector.shape_cast %14 : vector<1x16x78xbf16> to vector<16x78xbf16>
    %c0_16 = arith.constant 0 : index
    %c0_17 = arith.constant 0 : index
    %c22 = arith.constant 22 : index
    %16 = vector.load %arg2[%c0_16, %c0_17, %c22] : memref<1x16x100xbf16, #tpu.memory_space<vmem>>, vector<1x16x78xbf16>
    %17 = vector.shape_cast %16 : vector<1x16x78xbf16> to vector<16x78xbf16>
    %18 = tpu.concatenate %1, %3, %5, %7, %9, %11, %13, %15, %17 in 0 : vector<16x78xbf16>, vector<16x78xbf16>, vector<16x78xbf16>, vector<16x78xbf16>, vector<16x78xbf16>, vector<16x78xbf16>, vector<16x78xbf16>, vector<16x78xbf16>, vector<16x78xbf16> -> vector<144x78xbf16>
    %c0_18 = arith.constant 0 : index
    %c0_19 = arith.constant 0 : index
    %19 = vector.load %arg3[%c0_18, %c0_19] : memref<8x144xbf16, #tpu.memory_space<vmem>>, vector<8x144xbf16>
    %cst = arith.constant dense<0.000000e+00> : vector<8x78xf32>
    %20 = tpu.matmul %19, %18, %cst {dimension_numbers = #tpu.dot_dimension_numbers<[1], [0], [0], [1], [0, 0, 1, 1], [], []>} : vector<8x144xbf16>, vector<144x78xbf16>, vector<8x78xf32> -> vector<8x78xf32>
    %c0_20 = arith.constant 0 : index
    %c0_21 = arith.constant 0 : index
    %21 = vector.load %arg4[%c0_20, %c0_21] : memref<8x1xf32, #tpu.memory_space<vmem>>, vector<8x1xf32>
    %22 = vector.broadcast %21 : vector<8x1xf32> to vector<8x78xf32>
    %23 = arith.addf %20, %22 : vector<8x78xf32>
    %cst_22 = arith.constant 2.000000e-01 : f32
    %24 = vector.broadcast %cst_22 : f32 to vector<8x78xf32>
    %25 = arith.mulf %24, %23 : vector<8x78xf32>
    %26 = arith.maximumf %23, %25 : vector<8x78xf32>
    %c0_23 = arith.constant 0 : index
    %c0_24 = arith.constant 0 : index
    %27 = vector.load %arg5[%c0_23, %c0_24] : memref<8x1xf32, #tpu.memory_space<vmem>>, vector<8x1xf32>
    %28 = vector.broadcast %27 : vector<8x1xf32> to vector<8x78xf32>
    %29 = arith.mulf %26, %28 : vector<8x78xf32>
    %c0_25 = arith.constant 0 : index
    %c0_26 = arith.constant 0 : index
    %30 = vector.load %arg6[%c0_25, %c0_26] : memref<8x1xf32, #tpu.memory_space<vmem>>, vector<8x1xf32>
    %31 = vector.broadcast %30 : vector<8x1xf32> to vector<8x78xf32>
    %32 = arith.addf %29, %31 : vector<8x78xf32>
    %33 = tpu.iota {dimensions = array<i32: 1>} : vector<1x78xi32>
    %c1_i32 = arith.constant 1 : i32
    %34 = vector.broadcast %c1_i32 : i32 to vector<1x78xi32>
    %35 = arith.addi %33, %34 : vector<1x78xi32>
    %c10_i32 = arith.constant 10 : i32
    %c0_i32 = arith.constant 0 : i32
    %36 = arith.cmpi eq, %c10_i32, %c0_i32 : i32
    %c1_i32_27 = arith.constant 1 : i32
    %37 = arith.select %36, %c1_i32_27, %c10_i32 : i32
    %38 = vector.broadcast %37 : i32 to vector<1x78xi32>
    %39 = arith.remsi %35, %38 : vector<1x78xi32>
    %c0_i32_28 = arith.constant 0 : i32
    %40 = vector.broadcast %c0_i32_28 : i32 to vector<1x78xi32>
    %41 = arith.cmpi ne, %39, %40 : vector<1x78xi32>
    %c0_i32_29 = arith.constant 0 : i32
    %42 = vector.broadcast %c0_i32_29 : i32 to vector<1x78xi32>
    %43 = arith.cmpi slt, %39, %42 : vector<1x78xi32>
    %c0_i32_30 = arith.constant 0 : i32
    %44 = arith.cmpi slt, %37, %c0_i32_30 : i32
    %45 = vector.broadcast %44 : i1 to vector<1x78xi1>
    %46 = vector.broadcast %45 : vector<1x78xi1> to vector<1x78xi1>
    %47 = arith.xori %43, %46 : vector<1x78xi1>
    %48 = arith.andi %47, %41 : vector<1x78xi1>
    %49 = vector.broadcast %37 : i32 to vector<1x78xi32>
    %50 = arith.addi %39, %49 : vector<1x78xi32>
    %51 = arith.select %48, %50, %39 : vector<1x78xi1>, vector<1x78xi32>
    %c1_i32_31 = arith.constant 1 : i32
    %52 = vector.broadcast %c1_i32_31 : i32 to vector<1x78xi32>
    %53 = arith.cmpi sge, %51, %52 : vector<1x78xi32>
    %c8_i32 = arith.constant 8 : i32
    %54 = vector.broadcast %c8_i32 : i32 to vector<1x78xi32>
    %55 = arith.cmpi sle, %51, %54 : vector<1x78xi32>
    %56 = arith.andi %53, %55 : vector<1x78xi1>
    %cst_32 = arith.constant 0.000000e+00 : f32
    %57 = vector.shape_cast %56 : vector<1x78xi1> to vector<1x78xi1>
    %58 = vector.broadcast %57 : vector<1x78xi1> to vector<8x78xi1>
    %59 = vector.broadcast %cst_32 : f32 to vector<8x78xf32>
    %60 = arith.select %58, %32, %59 : vector<8x78xi1>, vector<8x78xf32>
    %cst_33 = arith.constant 0.000000e+00 : bf16
    %61 = vector.broadcast %cst_33 : bf16 to vector<8x11xbf16>
    %c0_34 = arith.constant 0 : index
    %c0_35 = arith.constant 0 : index
    %c0_36 = arith.constant 0 : index
    %62 = vector.load %arg7[%c0_34, %c0_35, %c0_36] : memref<1x8x100xbf16, #tpu.memory_space<vmem>>, vector<1x8x11xbf16>
    %63 = vector.shape_cast %62 : vector<1x8x11xbf16> to vector<8x11xbf16>
    %64 = vector.shape_cast %61 : vector<8x11xbf16> to vector<1x8x11xbf16>
    tpu.vector_store %arg7[%c0_34, %c0_35, %c0_36], %64 {strides = array<i32>} : memref<1x8x100xbf16, #tpu.memory_space<vmem>>, vector<1x8x11xbf16>,
    %65 = arith.truncf %60 : vector<8x78xf32> to vector<8x78xbf16>
    %c0_37 = arith.constant 0 : index
    %c0_38 = arith.constant 0 : index
    %c11_39 = arith.constant 11 : index
    %66 = vector.load %arg7[%c0_37, %c0_38, %c11_39] : memref<1x8x100xbf16, #tpu.memory_space<vmem>>, vector<1x8x78xbf16>
    %67 = vector.shape_cast %66 : vector<1x8x78xbf16> to vector<8x78xbf16>
    %68 = vector.shape_cast %65 : vector<8x78xbf16> to vector<1x8x78xbf16>
    tpu.vector_store %arg7[%c0_37, %c0_38, %c11_39], %68 {strides = array<i32>} : memref<1x8x100xbf16, #tpu.memory_space<vmem>>, vector<1x8x78xbf16>,
    %cst_40 = arith.constant 0.000000e+00 : bf16
    %69 = vector.broadcast %cst_40 : bf16 to vector<8x11xbf16>
    %c0_41 = arith.constant 0 : index
    %c0_42 = arith.constant 0 : index
    %c89 = arith.constant 89 : index
    %70 = vector.load %arg7[%c0_41, %c0_42, %c89] : memref<1x8x100xbf16, #tpu.memory_space<vmem>>, vector<1x8x11xbf16>
    %71 = vector.shape_cast %70 : vector<1x8x11xbf16> to vector<8x11xbf16>
    %72 = vector.shape_cast %69 : vector<8x11xbf16> to vector<1x8x11xbf16>
    tpu.vector_store %arg7[%c0_41, %c0_42, %c89], %72 {strides = array<i32>} : memref<1x8x100xbf16, #tpu.memory_space<vmem>>, vector<1x8x11xbf16>,
    return
  }
  func.func @transform_0(%arg0: i32, %arg1: i32) -> (i32, i32, i32) {
    %c0_i32 = arith.constant 0 : i32
    %c0_i32_0 = arith.constant 0 : i32
    %c0_i32_1 = arith.constant 0 : i32
    return %arg0, %c0_i32, %c0_i32_0 : i32, i32, i32
  }
  func.func @transform_1(%arg0: i32, %arg1: i32) -> (i32, i32) {
    %c0_i32 = arith.constant 0 : i32
    %c0_i32_0 = arith.constant 0 : i32
    return %arg1, %c0_i32 : i32, i32
  }
  func.func @transform_2(%arg0: i32, %arg1: i32) -> (i32, i32) {
    %c0_i32 = arith.constant 0 : i32
    %c0_i32_0 = arith.constant 0 : i32
    return %arg1, %c0_i32 : i32, i32
  }
  func.func @transform_3(%arg0: i32, %arg1: i32) -> (i32, i32) {
    %c0_i32 = arith.constant 0 : i32
    %c0_i32_0 = arith.constant 0 : i32
    return %arg1, %c0_i32 : i32, i32
  }
  func.func @transform_4(%arg0: i32, %arg1: i32) -> (i32, i32) {
    %c0_i32 = arith.constant 0 : i32
    %c0_i32_0 = arith.constant 0 : i32
    return %arg1, %c0_i32 : i32, i32
  }
  func.func @transform_5(%arg0: i32, %arg1: i32) -> (i32, i32, i32) {
    %c0_i32 = arith.constant 0 : i32
    %c0_i32_0 = arith.constant 0 : i32
    return %arg0, %arg1, %c0_i32 : i32, i32, i32
  }
}

module attributes {stable_mosaic.version = 11 : i64} {
  func.func @_tap_conv_kernel(%arg0: i32, %arg1: i32, %arg2: memref<1x8x100xbf16, #tpu.memory_space<vmem>>, %arg3: memref<16x32xbf16, #tpu.memory_space<vmem>>, %arg4: memref<16x1xf32, #tpu.memory_space<vmem>>, %arg5: memref<16x1xf32, #tpu.memory_space<vmem>>, %arg6: memref<16x1xf32, #tpu.memory_space<vmem>>, %arg7: memref<1x16x100xbf16, #tpu.memory_space<vmem>>) attributes {dimension_semantics = [#tpu.dimension_semantics<parallel>, #tpu.dimension_semantics<parallel>], iteration_bounds = array<i64: 2, 1>, scalar_prefetch = 0 : i64, scratch_operands = 0 : i64, tpu.core_type = #tpu.core_type<tc>, window_params = [{transform_indices = @transform_0, window_bounds = array<i64: 1, 8, 100>}, {transform_indices = @transform_1, window_bounds = array<i64: 16, 32>}, {transform_indices = @transform_2, window_bounds = array<i64: 16, 1>}, {transform_indices = @transform_3, window_bounds = array<i64: 16, 1>}, {transform_indices = @transform_4, window_bounds = array<i64: 16, 1>}, {transform_indices = @transform_5, window_bounds = array<i64: 1, 16, 100>}]} {
    %c0 = arith.constant 0 : index
    %c0_0 = arith.constant 0 : index
    %c11 = arith.constant 11 : index
    %0 = vector.load %arg2[%c0, %c0_0, %c11] : memref<1x8x100xbf16, #tpu.memory_space<vmem>>, vector<1x8x78xbf16>
    %1 = vector.shape_cast %0 : vector<1x8x78xbf16> to vector<8x78xbf16>
    %c0_1 = arith.constant 0 : index
    %c0_2 = arith.constant 0 : index
    %c12 = arith.constant 12 : index
    %2 = vector.load %arg2[%c0_1, %c0_2, %c12] : memref<1x8x100xbf16, #tpu.memory_space<vmem>>, vector<1x8x78xbf16>
    %3 = vector.shape_cast %2 : vector<1x8x78xbf16> to vector<8x78xbf16>
    %c0_3 = arith.constant 0 : index
    %c0_4 = arith.constant 0 : index
    %c21 = arith.constant 21 : index
    %4 = vector.load %arg2[%c0_3, %c0_4, %c21] : memref<1x8x100xbf16, #tpu.memory_space<vmem>>, vector<1x8x78xbf16>
    %5 = vector.shape_cast %4 : vector<1x8x78xbf16> to vector<8x78xbf16>
    %c0_5 = arith.constant 0 : index
    %c0_6 = arith.constant 0 : index
    %c22 = arith.constant 22 : index
    %6 = vector.load %arg2[%c0_5, %c0_6, %c22] : memref<1x8x100xbf16, #tpu.memory_space<vmem>>, vector<1x8x78xbf16>
    %7 = vector.shape_cast %6 : vector<1x8x78xbf16> to vector<8x78xbf16>
    %8 = tpu.concatenate %1, %3, %5, %7 in 0 : vector<8x78xbf16>, vector<8x78xbf16>, vector<8x78xbf16>, vector<8x78xbf16> -> vector<32x78xbf16>
    %c0_7 = arith.constant 0 : index
    %c0_8 = arith.constant 0 : index
    %9 = vector.load %arg3[%c0_7, %c0_8] : memref<16x32xbf16, #tpu.memory_space<vmem>>, vector<16x32xbf16>
    %cst = arith.constant dense<0.000000e+00> : vector<16x78xf32>
    %10 = tpu.matmul %9, %8, %cst {dimension_numbers = #tpu.dot_dimension_numbers<[1], [0], [0], [1], [0, 0, 1, 1], [], []>} : vector<16x32xbf16>, vector<32x78xbf16>, vector<16x78xf32> -> vector<16x78xf32>
    %c0_9 = arith.constant 0 : index
    %c0_10 = arith.constant 0 : index
    %11 = vector.load %arg4[%c0_9, %c0_10] : memref<16x1xf32, #tpu.memory_space<vmem>>, vector<16x1xf32>
    %12 = vector.broadcast %11 : vector<16x1xf32> to vector<16x78xf32>
    %13 = arith.addf %10, %12 : vector<16x78xf32>
    %cst_11 = arith.constant 2.000000e-01 : f32
    %14 = vector.broadcast %cst_11 : f32 to vector<16x78xf32>
    %15 = arith.mulf %14, %13 : vector<16x78xf32>
    %16 = arith.maximumf %13, %15 : vector<16x78xf32>
    %c0_12 = arith.constant 0 : index
    %c0_13 = arith.constant 0 : index
    %17 = vector.load %arg5[%c0_12, %c0_13] : memref<16x1xf32, #tpu.memory_space<vmem>>, vector<16x1xf32>
    %18 = vector.broadcast %17 : vector<16x1xf32> to vector<16x78xf32>
    %19 = arith.mulf %16, %18 : vector<16x78xf32>
    %c0_14 = arith.constant 0 : index
    %c0_15 = arith.constant 0 : index
    %20 = vector.load %arg6[%c0_14, %c0_15] : memref<16x1xf32, #tpu.memory_space<vmem>>, vector<16x1xf32>
    %21 = vector.broadcast %20 : vector<16x1xf32> to vector<16x78xf32>
    %22 = arith.addf %19, %21 : vector<16x78xf32>
    %23 = tpu.iota {dimensions = array<i32: 1>} : vector<1x78xi32>
    %c1_i32 = arith.constant 1 : i32
    %24 = vector.broadcast %c1_i32 : i32 to vector<1x78xi32>
    %25 = arith.addi %23, %24 : vector<1x78xi32>
    %c10_i32 = arith.constant 10 : i32
    %c0_i32 = arith.constant 0 : i32
    %26 = arith.cmpi eq, %c10_i32, %c0_i32 : i32
    %c1_i32_16 = arith.constant 1 : i32
    %27 = arith.select %26, %c1_i32_16, %c10_i32 : i32
    %28 = vector.broadcast %27 : i32 to vector<1x78xi32>
    %29 = arith.remsi %25, %28 : vector<1x78xi32>
    %c0_i32_17 = arith.constant 0 : i32
    %30 = vector.broadcast %c0_i32_17 : i32 to vector<1x78xi32>
    %31 = arith.cmpi ne, %29, %30 : vector<1x78xi32>
    %c0_i32_18 = arith.constant 0 : i32
    %32 = vector.broadcast %c0_i32_18 : i32 to vector<1x78xi32>
    %33 = arith.cmpi slt, %29, %32 : vector<1x78xi32>
    %c0_i32_19 = arith.constant 0 : i32
    %34 = arith.cmpi slt, %27, %c0_i32_19 : i32
    %35 = vector.broadcast %34 : i1 to vector<1x78xi1>
    %36 = vector.broadcast %35 : vector<1x78xi1> to vector<1x78xi1>
    %37 = arith.xori %33, %36 : vector<1x78xi1>
    %38 = arith.andi %37, %31 : vector<1x78xi1>
    %39 = vector.broadcast %27 : i32 to vector<1x78xi32>
    %40 = arith.addi %29, %39 : vector<1x78xi32>
    %41 = arith.select %38, %40, %29 : vector<1x78xi1>, vector<1x78xi32>
    %c1_i32_20 = arith.constant 1 : i32
    %42 = vector.broadcast %c1_i32_20 : i32 to vector<1x78xi32>
    %43 = arith.cmpi sge, %41, %42 : vector<1x78xi32>
    %c8_i32 = arith.constant 8 : i32
    %44 = vector.broadcast %c8_i32 : i32 to vector<1x78xi32>
    %45 = arith.cmpi sle, %41, %44 : vector<1x78xi32>
    %46 = arith.andi %43, %45 : vector<1x78xi1>
    %cst_21 = arith.constant 0.000000e+00 : f32
    %47 = vector.shape_cast %46 : vector<1x78xi1> to vector<1x78xi1>
    %48 = vector.broadcast %47 : vector<1x78xi1> to vector<16x78xi1>
    %49 = vector.broadcast %cst_21 : f32 to vector<16x78xf32>
    %50 = arith.select %48, %22, %49 : vector<16x78xi1>, vector<16x78xf32>
    %cst_22 = arith.constant 0.000000e+00 : bf16
    %51 = vector.broadcast %cst_22 : bf16 to vector<16x11xbf16>
    %c0_23 = arith.constant 0 : index
    %c0_24 = arith.constant 0 : index
    %c0_25 = arith.constant 0 : index
    %52 = vector.load %arg7[%c0_23, %c0_24, %c0_25] : memref<1x16x100xbf16, #tpu.memory_space<vmem>>, vector<1x16x11xbf16>
    %53 = vector.shape_cast %52 : vector<1x16x11xbf16> to vector<16x11xbf16>
    %54 = vector.shape_cast %51 : vector<16x11xbf16> to vector<1x16x11xbf16>
    tpu.vector_store %arg7[%c0_23, %c0_24, %c0_25], %54 {strides = array<i32>} : memref<1x16x100xbf16, #tpu.memory_space<vmem>>, vector<1x16x11xbf16>,
    %55 = arith.truncf %50 : vector<16x78xf32> to vector<16x78xbf16>
    %c0_26 = arith.constant 0 : index
    %c0_27 = arith.constant 0 : index
    %c11_28 = arith.constant 11 : index
    %56 = vector.load %arg7[%c0_26, %c0_27, %c11_28] : memref<1x16x100xbf16, #tpu.memory_space<vmem>>, vector<1x16x78xbf16>
    %57 = vector.shape_cast %56 : vector<1x16x78xbf16> to vector<16x78xbf16>
    %58 = vector.shape_cast %55 : vector<16x78xbf16> to vector<1x16x78xbf16>
    tpu.vector_store %arg7[%c0_26, %c0_27, %c11_28], %58 {strides = array<i32>} : memref<1x16x100xbf16, #tpu.memory_space<vmem>>, vector<1x16x78xbf16>,
    %cst_29 = arith.constant 0.000000e+00 : bf16
    %59 = vector.broadcast %cst_29 : bf16 to vector<16x11xbf16>
    %c0_30 = arith.constant 0 : index
    %c0_31 = arith.constant 0 : index
    %c89 = arith.constant 89 : index
    %60 = vector.load %arg7[%c0_30, %c0_31, %c89] : memref<1x16x100xbf16, #tpu.memory_space<vmem>>, vector<1x16x11xbf16>
    %61 = vector.shape_cast %60 : vector<1x16x11xbf16> to vector<16x11xbf16>
    %62 = vector.shape_cast %59 : vector<16x11xbf16> to vector<1x16x11xbf16>
    tpu.vector_store %arg7[%c0_30, %c0_31, %c89], %62 {strides = array<i32>} : memref<1x16x100xbf16, #tpu.memory_space<vmem>>, vector<1x16x11xbf16>,
    return
  }
  func.func @transform_0(%arg0: i32, %arg1: i32) -> (i32, i32, i32) {
    %c0_i32 = arith.constant 0 : i32
    %c0_i32_0 = arith.constant 0 : i32
    %c0_i32_1 = arith.constant 0 : i32
    return %arg0, %c0_i32, %c0_i32_0 : i32, i32, i32
  }
  func.func @transform_1(%arg0: i32, %arg1: i32) -> (i32, i32) {
    %c0_i32 = arith.constant 0 : i32
    %c0_i32_0 = arith.constant 0 : i32
    return %arg1, %c0_i32 : i32, i32
  }
  func.func @transform_2(%arg0: i32, %arg1: i32) -> (i32, i32) {
    %c0_i32 = arith.constant 0 : i32
    %c0_i32_0 = arith.constant 0 : i32
    return %arg1, %c0_i32 : i32, i32
  }
  func.func @transform_3(%arg0: i32, %arg1: i32) -> (i32, i32) {
    %c0_i32 = arith.constant 0 : i32
    %c0_i32_0 = arith.constant 0 : i32
    return %arg1, %c0_i32 : i32, i32
  }
  func.func @transform_4(%arg0: i32, %arg1: i32) -> (i32, i32) {
    %c0_i32 = arith.constant 0 : i32
    %c0_i32_0 = arith.constant 0 : i32
    return %arg1, %c0_i32 : i32, i32
  }
  func.func @transform_5(%arg0: i32, %arg1: i32) -> (i32, i32, i32) {
    %c0_i32 = arith.constant 0 : i32
    %c0_i32_0 = arith.constant 0 : i32
    return %arg0, %arg1, %c0_i32 : i32, i32, i32
  }
}

</mosaic_0001>

<bundles_post_ra>
// kernel: vanilla_ae_forward_pallas.13
= control target key start
LH: loop header
LB: loop body
LE: loop exit
PB: predicated region body
PF: predicated region fallthrough
CT: control target
= control target key end

     0   :  { %s1070_s18 = smov 0   ;;  %s1072_s19 = smov 0   ;;  %s1225_s0 = inlined_call_operand.vmem [shape: bf16[2,8,324], index: 0, kind: input, shape index: {}]   ;;  %s1226_s1 = inlined_call_operand.vmem [shape: bf16[16,72], index: 1, kind: input, shape index: {}]   ;;  %s1227_s2 = inlined_call_operand.vmem [shape: f32[16,1], index: 2, kind: input, shape index: {}]   ;;  %s1228_s3 = inlined_call_operand.vmem [shape: f32[16,1], index: 3, kind: input, shape index: {}]   ;;  %s1229_s4 = inlined_call_operand.vmem [shape: f32[16,1], index: 4, kind: input, shape index: {}]   ;;  %s1230_s5 = inlined_call_operand.vmem [shape: bf16[2,16,324], index: 5, kind: output, shape index: {}]  }
   0x1   :  { %s1074_s20 = smov 0  }
   0x2 LB: > { %s27_s21 = sadd.s32 1, %s1022_s19  ;;  %p914_p0 = scmp.ge.s32.totalorder %s1026_s20, 1  ;;  %s1026_s20 = sphi %s1074_s20, %s15_s20   ;;  %s1022_s19 = sphi %s1072_s19, %s1236_s19   ;;  %s1018_s18 = sphi %s1070_s18, %s1235_s18  }
   0x3   : > { %p29_p1 = scmp.ge.s32.totalorder %s27_s21, 2  ;;  %p245_p2 = scmp.lt.s32.totalorder %s1026_s20, 3 }
   0x5   : > { %s1238_s21 = smov (%p29_p1, %s27_s21), 0  ;;  %p246_p3 = pnand %p914_p0, %p245_p2 }
   0x6   : > { %p298_p4 = scmp.lt.s32.totalorder (!%p246_p3), %s1018_s18, 1  ;;  %v1028_v0 = vmov (!%p246_p3), 0.0   ;;  %s1029_s26 = smov (!%p246_p3), 127   ;;  %vm1036_vm0 = vmmov (!%p246_p3), 0   ;;  %v1037_v5 = vmov (!%p246_p3), 0   ;;  %v472_v6 = vld [vmem:[%s1227_s2] sm:$0xff] (!%p246_p3) }
   0x7   : > { %249 = sbr.rel (%p246_p3) target bundleno = 536 (0x218), region = 40  ;;  %940 = vmatprep.subr.bf16.mxu1 (!%p246_p3), %v1028_v0  ;;  %s1030_s27 = smov (!%p246_p3), 126   ;;  %950 = vmatprep.mubr.msk.bf16.mxu1 (!%p246_p3), %vm1036_vm0, %v1028_v0  ;;  %v473_v7 = vld [vmem:[%s1227_s2 + $0x8] sm:$0xff] (!%p246_p3)  ;;  %v598_v9 = vld [vmem:[%s1228_s3] sm:$0xff] (!%p246_p3)  ;;  %vm355_vm1 = vcmask (!%p246_p3), 1039360   ;;  %vm421_vm2 = vcmask (!%p246_p3), 1043456  }
   0x8   : > { %s1031_s28 = smov (!%p246_p3), 110   ;;  %s1032_s29 = smov (!%p246_p3), 109   ;;  %534 = vmatprep.mubr.bf16.mxu0 (!%p246_p3), %v1037_v5  ;;  %999 = vset.pattern.permute.xlu1 (!%p246_p3), %v1037_v5  ;;  %v599_v8 = vld [vmem:[%s1228_s3 + $0x8] sm:$0xff] (!%p246_p3)  ;;  %v616_v11 = vld [vmem:[%s1229_s4] sm:$0xff] (!%p246_p3)  ;;  %vm364_vm3 = vcmask (!%p246_p3), 1031168   ;;  %vm373_vm4 = vcmask (!%p246_p3), 900096  }
   0x9   : > { %s1033_s30 = smov (!%p246_p3), 108   ;;  %s1034_s6 = smov (!%p246_p3), 92   ;;  %998 = vset.pattern.permute.xlu0 (!%p246_p3), %v1037_v5  ;;  %v617_v10 = vld [vmem:[%s1229_s4 + $0x8] sm:$0xff] (!%p246_p3)  ;;  %vm382_vm5 = vcmask (!%p246_p3), 891904   ;;  %vm391_vm6 = vcmask (!%p246_p3), 883712   ;;  %vm400_vm7 = vcmask (!%p246_p3), 752640  }
   0xa   : > { %s1035_s7 = smov (!%p246_p3), 91   ;;  %s1038_s8 = smov (!%p246_p3), 90   ;;  %vm409_vm8 = vcmask (!%p246_p3), 744448   ;;  %vm418_vm9 = vcmask (!%p246_p3), 736256   ;;  %vm489_vm10 = vcmask (!%p246_p3), 588800   ;;  %vm710_vm11 = vcmask (!%p246_p3), 150528  }
   0xe   : > { %s1240_s18 = smov (!%p298_p4, %s1018_s18), 1 }
   0xf   : > { %s954_s22 = smul.u32 12, %s1240_s18 }
  0x11   : > { %s302_s25 = scalar_lea.vmem %s1225_s0, %s954_s22 }
  0x12   : > { %v339_v1 = vld [vmem:[%s302_s25] sm:$0xff]  ;;  %v1002_v4 = vld [vmem:[%s302_s25 + $0x8] ss:$0 sps:$4 sm:$0xff]  }
  0x13   : > { %v1095_v2 = vcombine.high %v339_v1, %v339_v1  ;;  %v1097_v3 = vcombine.low %v339_v1, %v339_v1 }
  0x15   : > { %351 = vrot.lane.b32.xlu0 %v1095_v2, %s1029_s26  ;;  %349 = vrot.lane.b32.xlu1 %v1097_v3, %s1029_s26 }
  0x19   : > { %353 = vrot.lane.b32.xlu0 %v1002_v4, %s1029_s26  ;;  %360 = vrot.lane.b32.xlu1 %v1095_v2, %s1030_s27 }
  0x1d   : > { %362 = vrot.lane.b32.xlu0 %v1002_v4, %s1030_s27  ;;  %369 = vrot.lane.b32.xlu1 %v1095_v2, %s1031_s28 }
  0x21   : > { %371 = vrot.lane.b32.xlu0 %v1002_v4, %s1031_s28  ;;  %358 = vrot.lane.b32.xlu1 %v1097_v3, %s1030_s27  ;;  %s955_s27 = smul.u32 24, %s1240_s18  ;;  %s1039_s18 = smov 19  }
  0x25   : > { %367 = vrot.lane.b32.xlu0 %v1097_v3, %s1031_s28  ;;  %378 = vrot.lane.b32.xlu1 %v1095_v2, %s1032_s29 }
  0x29   : > { %380 = vrot.lane.b32.xlu0 %v1002_v4, %s1032_s29  ;;  %387 = vrot.lane.b32.xlu1 %v1095_v2, %s1033_s30 }
  0x2d   : > { %389 = vrot.lane.b32.xlu0 %v1002_v4, %s1033_s30  ;;  %376 = vrot.lane.b32.xlu1 %v1097_v3, %s1032_s29 }
  0x31   : > { %385 = vrot.lane.b32.xlu0 %v1097_v3, %s1033_s30  ;;  %396 = vrot.lane.b32.xlu1 %v1095_v2, %s1034_s6  ;;  %s1165_s30 = scalar_lea.vmem %s1230_s5, %s955_s27 }
  0x32   : > { %711 = vst.msk [vmem:[%s1165_s30] sm:$0xf] %vm710_vm11, %v1037_v5  ;;  %712 = vst.msk [vmem:[%s1165_s30 + $0xc] sm:$0xf] %vm710_vm11, %v1037_v5 }
  0x35   : > { %398 = vrot.lane.b32.xlu0 %v1002_v4, %s1034_s6  ;;  %405 = vrot.lane.b32.xlu1 %v1095_v2, %s1035_s7 }
  0x39   : > { %407 = vrot.lane.b32.xlu0 %v1002_v4, %s1035_s7  ;;  %394 = vrot.lane.b32.xlu1 %v1097_v3, %s1034_s6 }
  0x3d   : > { %403 = vrot.lane.b32.xlu0 %v1097_v3, %s1035_s7  ;;  %412 = vrot.lane.b32.xlu1 %v1097_v3, %s1038_s8 }
  0x41   : > { %414 = vrot.lane.b32.xlu0 %v1095_v2, %s1038_s8  ;;  %416 = vrot.lane.b32.xlu1 %v1002_v4, %s1038_s8 }
  0x45   : > { %476 = vperm.xlu0 %998, %v472_v6   ;;  %481 = vperm.xlu1 %999, %v473_v7  }
  0x49   : > { %607 = vperm.xlu0 %998, %v599_v8   ;;  %602 = vperm.xlu1 %999, %v598_v9  }
  0x4d   : > { %625 = vperm.xlu0 %998, %v617_v10   ;;  %620 = vperm.xlu1 %999, %v616_v11  }
  0x87   : > { %v352_v12 = vpop.permute.xlu0 %351  ;;  %v350_v13 = vpop.permute.xlu1 %349 }
  0x88   : > { %v356_v14 = vsel %vm355_vm1, %v350_v13, %v352_v12 }
  0x89   : > { %v424_v20 = vsel %vm421_vm2, %v1097_v3, %v356_v14  ;;  %v634_v3 = vlaneseq }
  0x8b   : > { %v354_v15 = vpop.permute.xlu0 %353  ;;  %v361_v16 = vpop.permute.xlu1 %360 }
  0x8c   : > { %v357_v17 = vsel %vm355_vm1, %v352_v12, %v354_v15  ;;  %v432_v18 = vsel %vm421_vm2, %v1002_v4, %v354_v15  ;;  %v635_v4 = vand.u32 127, %v634_v3 }
  0x8d   : > { %941 = vmatpush3.bf16.msra.mxu1 %v432_v18  ;;  %v428_v19 = vsel %vm421_vm2, %v1095_v2, %v357_v17  ;;  %v1003_v2 = vld [vmem:[%s1226_s1] sm:$0xff]  }
  0x8e   : > { %502 = vmatprep.subr.bf16.mxu0 %v428_v19  ;;  %942 = vmatprep.subr.bf16.mxu1 %v1028_v0  ;;  %v637_v6 = vadd.s32 256, %v635_v4  ;;  %v636_v7 = vadd.s32 128, %v635_v4  ;;  %v638_v8 = vadd.s32 1, %v635_v4 }
  0x8f   : > { %v363_v21 = vpop.permute.xlu0 %362  ;;  %503 = vmatpush1.bf16.msra.mxu0 %v424_v20  ;;  %v370_v22 = vpop.permute.xlu1 %369 }
  0x90   : > { %v366_v25 = vsel %vm364_vm3, %v361_v16, %v363_v21  ;;  %v640_v9 = vadd.s32 1, %v637_v6  ;;  %v639_v10 = vadd.s32 1, %v636_v7 }
  0x91   : > { %v1171_v11 = vmul.u32.u64.low 3817748708, %v638_v8  ;;  %v1172_v12 = vmul.u32.u64.high 3817748708, %v638_v8, %v1171_v11 }
  0x92   : > { %v1174_v13 = vmul.u32.u64.low 3817748708, %v640_v9  ;;  %v1175_v14 = vmul.u32.u64.high 3817748708, %v640_v9, %v1174_v13 }
  0x93   : > { %v372_v23 = vpop.permute.xlu0 %371  ;;  %v359_v24 = vpop.permute.xlu1 %358  ;;  %v647_v17 = vshrl.u32 %v1172_v12, 4 }
  0x94   : > { %v375_v26 = vsel %vm373_vm4, %v370_v22, %v372_v23  ;;  %v444_v27 = vsel %vm421_vm2, %v363_v21, %v372_v23  ;;  %v365_v31 = vsel %vm364_vm3, %v359_v24, %v361_v16  ;;  %v669_v18 = vshrl.u32 %v1175_v14, 4 }
  0x95   : > { %943 = vmatpush3.bf16.msra.mxu1 %v444_v27  ;;  %v440_v28 = vsel %vm421_vm2, %v366_v25, %v375_v26  ;;  %v1177_v15 = vmul.u32.u64.low 3817748708, %v639_v10  ;;  %v1178_v16 = vmul.u32.u64.high 3817748708, %v639_v10, %v1177_v15  ;;  %v648_v20 = vmul.u32 18, %v647_v17 }
  0x96   : > { %504 = vmatprep.subr.bf16.mxu0 %v440_v28  ;;  %944 = vmatprep.subr.bf16.mxu1 %v1028_v0  ;;  %v670_v21 = vmul.u32 18, %v669_v18 }
  0x97   : > { %v368_v29 = vpop.permute.xlu0 %367  ;;  %v379_v30 = vpop.permute.xlu1 %378  ;;  %v658_v19 = vshrl.u32 %v1178_v16, 4  ;;  %v649_v23 = vsub.s32 %v638_v8, %v648_v20 }
  0x98   : > { %v374_v32 = vsel %vm373_vm4, %v368_v29, %v370_v22  ;;  %v671_v24 = vsub.s32 %v640_v9, %v670_v21 }
  0x99   : > { %v436_v33 = vsel %vm421_vm2, %v365_v31, %v374_v32  ;;  %v659_v22 = vmul.u32 18, %v658_v19  ;;  %vm674_vm12 = vcmp.ne.s32.totalorder %v649_v23, 0  ;;  %vm677_vm13 = vcmp.lt.s32.totalorder %v649_v23, 0 }
  0x9a   : > { %505 = vmatpush1.bf16.msra.mxu0 %v436_v33  ;;  %vm676_vm14 = vcmp.ne.s32.totalorder %v671_v24, 0  ;;  %vm679_vm15 = vcmp.lt.s32.totalorder %v671_v24, 0  ;;  %v683_v27 = vadd.s32 18, %v649_v23  ;;  %v685_v28 = vadd.s32 18, %v671_v24 }
  0x9b   : > { %v381_v34 = vpop.permute.xlu0 %380  ;;  %v388_v35 = vpop.permute.xlu1 %387  ;;  %v660_v25 = vsub.s32 %v639_v10, %v659_v22  ;;  %vm682_vm3 = vmand %vm679_vm15, %vm676_vm14  ;;  %vm748_vm14 = vcmask 1043608   ;;  %vm749_vm15 = vcmask 1047556  }
  0x9c   : > { %v384_v38 = vsel %vm382_vm5, %v379_v30, %v381_v34 }
  0x9d   : > { %vm675_vm0 = vcmp.ne.s32.totalorder %v660_v25, 0  ;;  %vm678_vm1 = vcmp.lt.s32.totalorder %v660_v25, 0 }
  0x9e   : > { %vm681_vm4 = vmand %vm678_vm1, %vm675_vm0  ;;  %vm739_vm0 = vcmask 154624  }
  0x9f   : > { %v390_v36 = vpop.permute.xlu0 %389  ;;  %v377_v37 = vpop.permute.xlu1 %376  ;;  %vm750_vm1 = vmor %vm749_vm15, %vm748_vm14 }
  0xa0   : > { %v393_v39 = vsel %vm391_vm6, %v388_v35, %v390_v36  ;;  %v456_v40 = vsel %vm421_vm2, %v381_v34, %v390_v36  ;;  %v383_v44 = vsel %vm382_vm5, %v377_v37, %v379_v30  ;;  %v684_v30 = vadd.s32 18, %v660_v25 }
  0xa1   : > { %945 = vmatpush3.bf16.msra.mxu1 %v456_v40  ;;  %v452_v41 = vsel %vm421_vm2, %v384_v38, %v393_v39  ;;  %v688_v40 = vsel %vm682_vm3, %v685_v28, %v671_v24  ;;  %vm756_vm3 = vcmask 552328  }
  0xa2   : > { %506 = vmatprep.subr.bf16.mxu0 %v452_v41  ;;  %946 = vmatprep.subr.bf16.mxu1 %v1028_v0  ;;  %vm694_vm11 = vcmp.le.s32.totalorder %v688_v40, 16 }
  0xa3   : > { %v386_v42 = vpop.permute.xlu0 %385  ;;  %v397_v43 = vpop.permute.xlu1 %396 }
  0xa4   : > { %v392_v45 = vsel %vm391_vm6, %v386_v42, %v388_v35 }
  0xa5   : > { %v448_v46 = vsel %vm421_vm2, %v383_v44, %v392_v45 }
  0xa6   : > { %507 = vmatpush1.bf16.msra.mxu0 %v448_v46  ;;  %v687_v46 = vsel %vm681_vm4, %v684_v30, %v660_v25 }
  0xa7   : > { %v399_v47 = vpop.permute.xlu0 %398  ;;  %v406_v48 = vpop.permute.xlu1 %405 }
  0xa8   : > { %v402_v51 = vsel %vm400_vm7, %v397_v43, %v399_v47 }
  0xab   : > { %v408_v49 = vpop.permute.xlu0 %407  ;;  %v395_v50 = vpop.permute.xlu1 %394 }
  0xac   : > { %v411_v52 = vsel %vm409_vm8, %v406_v48, %v408_v49  ;;  %v468_v53 = vsel %vm421_vm2, %v399_v47, %v408_v49  ;;  %v401_v57 = vsel %vm400_vm7, %v395_v50, %v397_v43  ;;  %vm690_vm7 = vcmp.ge.s32.totalorder %v687_v46, 1 }
  0xad   : > { %947 = vmatpush3.bf16.msra.mxu1 %v468_v53  ;;  %v464_v54 = vsel %vm421_vm2, %v402_v51, %v411_v52 }
  0xae   : > { %508 = vmatprep.subr.bf16.mxu0 %v464_v54  ;;  %948 = vmatprep.subr.bf16.mxu1 %v1028_v0 }
  0xaf   : > { %v404_v55 = vpop.permute.xlu0 %403  ;;  %v413_v56 = vpop.permute.xlu1 %412 }
  0xb0   : > { %v410_v58 = vsel %vm409_vm8, %v404_v55, %v406_v48  ;;  %vm693_vm8 = vcmp.le.s32.totalorder %v687_v46, 16 }
  0xb1   : > { %v460_v59 = vsel %vm421_vm2, %v401_v57, %v410_v58 }
  0xb2   : > { %509 = vmatpush1.bf16.msra.mxu0 %v460_v59 }
  0xb3   : > { %v415_v60 = vpop.permute.xlu0 %414  ;;  %v417_v61 = vpop.permute.xlu1 %416 }
  0xb4   : > { %v419_v62 = vsel %vm418_vm9, %v413_v56, %v415_v60  ;;  %v420_v63 = vsel %vm418_vm9, %v415_v60, %v417_v61  ;;  %v500_v1 = vsel %vm421_vm2, %v417_v61, 0  ;;  %vm691_vm9 = vcmp.ge.s32.totalorder %v688_v40, 1 }
  0xb5   : > { %921 = vmatprep.subr.msk.bf16.mxu0 %vm421_vm2, %v420_v63  ;;  %949 = vmatpush3.bf16.msra.mxu1 %v500_v1  ;;  %v494_v0 = vsel %vm421_vm2, %v419_v62, 0  ;;  %vm680_vm2 = vmand %vm677_vm13, %vm674_vm12 }
  0xb6   : > { %511 = vmatpush1.bf16.msra.mxu0 %v494_v0  ;;  %v686_v36 = vsel %vm680_vm2, %v683_v27, %v649_v23  ;;  %vm1191_vm12 = vmand %vm690_vm7, %vm693_vm8  ;;  %vm752_vm2 = vcmask 396288  }
  0xb7   : > { %vm689_vm5 = vcmp.ge.s32.totalorder %v686_v36, 1  ;;  %vm692_vm6 = vcmp.le.s32.totalorder %v686_v36, 16  ;;  %vm697_vm13 = vmand %vm691_vm9, %vm694_vm11 }
  0xb8   : > { %951 = vmatmul.mubr.msk.bf16.vlgmr.msra.gmra.mrb[0].mxu1 %vm489_vm10, %v1003_v2 }
  0xb9   : > { %922 = vmatmul.mubr.msk.bf16.vlgmr.msra.gmra.mrb[0].mxu0 %vm489_vm10, %v1003_v2  ;;  %vm1185_vm10 = vmand %vm689_vm5, %vm692_vm6 }
  0xc4   : > { %v482_v26 = vpop.permute.xlu1 %481  ;;  %v477_v29 = vpop.permute.xlu0 %476 }
  0xc8   : > { %v603_v32 = vpop.permute.xlu1 %602  ;;  %v608_v50 = vpop.permute.xlu0 %607 }
  0xcc   : > { %v621_v0 = vpop.permute.xlu1 %620  ;;  %v626_v8 = vpop.permute.xlu0 %625 }
 0x18b   : > { %v579_v31 = vpop.f32.mrb[0].mxu1 }
 0x18c   : > { %v580_v33 = vadd.f32 %v579_v31, %v477_v29  ;;  %v536_v34 = vpop.f32.mrb[0].mxu0  ;;  %v952_v35 = vpop.f32.mrb[1].mxu1 }
 0x18d   : > { %v537_v37 = vadd.f32 %v536_v34, %v477_v29  ;;  %v538_v38 = vpop.f32.mrb[1].mxu0  ;;  %v582_v39 = vpop.f32.mrb[2].mxu1 }
 0x18e   : > { %v588_v41 = vmul.f32 0.2, %v580_v33  ;;  %v539_v42 = vadd.f32 %v538_v38, %v477_v29  ;;  %v583_v43 = vadd.f32 %v582_v39, %v482_v26  ;;  %v540_v44 = vpop.f32.mrb[2].mxu0  ;;  %v953_v45 = vpop.f32.mrb[3].mxu1 }
 0x18f   : > { %v586_v47 = vmul.f32 0.2, %v537_v37  ;;  %v541_v48 = vadd.f32 %v540_v44, %v482_v26  ;;  %v542_v49 = vpop.f32.mrb[3].mxu0 }
 0x190   : > { %v594_v51 = vmax.f32 %v580_v33, %v588_v41  ;;  %v587_v52 = vmul.f32 0.2, %v539_v42  ;;  %v591_v53 = vmul.f32 0.2, %v583_v43  ;;  %v543_v54 = vadd.f32 %v542_v49, %v482_v26 }
 0x191   : > { %v592_v55 = vmax.f32 %v537_v37, %v586_v47  ;;  %v589_v56 = vmul.f32 0.2, %v541_v48 }
 0x192   : > { %v612_v57 = vmul.f32 %v603_v32, %v594_v51  ;;  %v593_v58 = vmax.f32 %v539_v42, %v587_v52  ;;  %v597_v59 = vmax.f32 %v583_v43, %v591_v53  ;;  %v590_v60 = vmul.f32 0.2, %v543_v54 }
 0x193   : > { %v610_v61 = vmul.f32 %v603_v32, %v592_v55  ;;  %v595_v62 = vmax.f32 %v541_v48, %v589_v56 }
 0x194   : > { %v611_v63 = vmul.f32 %v603_v32, %v593_v58  ;;  %v615_v1 = vmul.f32 %v608_v50, %v597_v59  ;;  %v596_v2 = vmax.f32 %v543_v54, %v590_v60  ;;  %v630_v11 = vadd.f32 %v621_v0, %v612_v57 }
 0x195   : > { %v613_v4 = vmul.f32 %v608_v50, %v595_v62  ;;  %v628_v6 = vadd.f32 %v621_v0, %v610_v61 }
 0x196   : > { %v614_v9 = vmul.f32 %v608_v50, %v596_v2  ;;  %v629_v10 = vadd.f32 %v621_v0, %v611_v63  ;;  %v633_v14 = vadd.f32 %v626_v8, %v615_v1  ;;  %v706_v20 = vsel %vm697_vm13, %v630_v11, 0.0 }
 0x197   : > { %v631_v12 = vadd.f32 %v626_v8, %v613_v4  ;;  %v704_v13 = vsel %vm1185_vm10, %v628_v6, 0.0  ;;  %v931_v23 = vpack.c.bf16 %v706_v20, %v706_v20 }
 0x198   : > { %v632_v15 = vadd.f32 %v626_v8, %v614_v9  ;;  %v705_v16 = vsel %vm1191_vm12, %v629_v10, 0.0  ;;  %v709_v22 = vsel %vm697_vm13, %v633_v14, 0.0 }
 0x199   : > { %v930_v17 = vpack.c.bf16 %v705_v16, %v704_v13  ;;  %v707_v18 = vsel %vm1185_vm10, %v631_v12, 0.0  ;;  %v933_v24 = vpack.c.bf16 %v709_v22, %v709_v22 }
 0x19a   : > { %v708_v19 = vsel %vm1191_vm12, %v632_v15, 0.0 }
 0x19b   : > { %729 = vrot.lane.b32.xlu1 %v930_v17, %s1039_s18  ;;  %v932_v21 = vpack.c.bf16 %v708_v19, %v707_v18 }
 0x19d   : > { %733 = vrot.lane.b32.xlu0 %v932_v21, %s1039_s18 }
 0x19f   : > { %731 = vrot.lane.b32.xlu1 %v931_v23, %s1039_s18 }
 0x1a1   : > { %735 = vrot.lane.b32.xlu0 %v933_v24, %s1039_s18 }
 0x20d   : > { %v730_v25 = vpop.permute.xlu1 %729 }
 0x20e   : > { %v737_v26 = vrot.slane %v730_v25, 4 }
 0x20f   : > { %v734_v27 = vpop.permute.xlu0 %733 }
 0x210   : > { %v740_v28 = vsel %vm739_vm0, %v737_v26, %v730_v25  ;;  %v738_v29 = vrot.slane %v734_v27, 4 }
 0x211   : > { %751 = vst.msk [vmem:[%s1165_s30] sm:$0xff] %vm750_vm1, %v740_v28  ;;  %v732_v30 = vpop.permute.xlu1 %731 }
 0x212   : > { %v742_v31 = vsel %vm739_vm0, %v738_v29, %v734_v27  ;;  %v741_v32 = vsel %vm739_vm0, %v737_v26, %v732_v30 }
 0x213   : > { %754 = vst.msk [vmem:[%s1165_s30 + $0xc] sm:$0xff] %vm750_vm1, %v742_v31  ;;  %v736_v33 = vpop.permute.xlu0 %735 }
 0x214   : > { %753 = vst.msk [vmem:[%s1165_s30 + $0x8] sm:$0xf] %vm752_vm2, %v741_v32  ;;  %v743_v34 = vsel %vm739_vm0, %v738_v29, %v736_v33 }
 0x215   : > { %757 = vst.msk [vmem:[%s1165_s30 + $0x8] sm:$0xf] %vm756_vm3, %v1037_v5 }
 0x216   : > { %755 = vst.msk [vmem:[%s1165_s30 + $0x14] sm:$0xf] %vm752_vm2, %v743_v34 }
 0x217   : > { %758 = vst.msk [vmem:[%s1165_s30 + $0x14] sm:$0xf] %vm756_vm3, %v1037_v5 }
 0x218 PF: > { %s15_s20 = sadd.s32 1, %s1026_s20   ;;  %s1235_s18 = smov %s1022_s19 }
 0x219   : > { %p12_p5 = scmp.ge.s32.totalorder %s15_s20, 4   ;;  %s1236_s19 = smov %s1238_s21 }
 0x21b   :  { %14 = sbr.rel (!%p12_p5) target bundleno = 2 (0x2), region = 82 }

// kernel: vanilla_ae_forward_pallas.12
= control target key start
LH: loop header
LB: loop body
LE: loop exit
PB: predicated region body
PF: predicated region fallthrough
CT: control target
= control target key end

     0   :  { %s992_s18 = smov 0   ;;  %s994_s19 = smov 0   ;;  %s1118_s0 = inlined_call_operand.vmem [shape: bf16[2,4,324], index: 0, kind: input, shape index: {}]   ;;  %s1119_s1 = inlined_call_operand.vmem [shape: bf16[8,36], index: 1, kind: input, shape index: {}]   ;;  %s1120_s2 = inlined_call_operand.vmem [shape: f32[8,1], index: 2, kind: input, shape index: {}]   ;;  %s1121_s3 = inlined_call_operand.vmem [shape: f32[8,1], index: 3, kind: input, shape index: {}]   ;;  %s1122_s4 = inlined_call_operand.vmem [shape: f32[8,1], index: 4, kind: input, shape index: {}]   ;;  %s1123_s5 = inlined_call_operand.vmem [shape: bf16[2,8,324], index: 5, kind: output, shape index: {}]  }
   0x1   :  { %s996_s20 = smov 0  }
   0x2 LB: > { %s27_s21 = sadd.s32 1, %s943_s19  ;;  %p850_p0 = scmp.ge.s32.totalorder %s947_s20, 1  ;;  %s947_s20 = sphi %s996_s20, %s15_s20   ;;  %s943_s19 = sphi %s994_s19, %s1127_s19   ;;  %s939_s18 = sphi %s992_s18, %s1126_s18  }
   0x3   : > { %p29_p1 = scmp.ge.s32.totalorder %s27_s21, 2  ;;  %p237_p2 = scmp.lt.s32.totalorder %s947_s20, 3 }
   0x5   : > { %s1129_s21 = smov (%p29_p1, %s27_s21), 0  ;;  %p238_p3 = pnand %p850_p0, %p237_p2 }
   0x6   : > { %p285_p4 = scmp.lt.s32.totalorder (!%p238_p3), %s939_s18, 1  ;;  %v322_v0 = vlaneseq (!%p238_p3)  ;;  %v949_v1 = vmov (!%p238_p3), 1983009808   ;;  %s950_s26 = smov (!%p238_p3), 126   ;;  %v952_v11 = vmov (!%p238_p3), 0.0   ;;  %vm957_vm0 = vmmov (!%p238_p3), 0  }
   0x7   : > { %241 = sbr.rel (%p238_p3) target bundleno = 532 (0x214), region = 40  ;;  %v320_v2 = vunpack.c.l.s4 (!%p238_p3), %v949_v1  ;;  %s951_s27 = smov (!%p238_p3), 127   ;;  %866 = vmatprep.subr.bf16.mxu1 (!%p238_p3), %v952_v11  ;;  %872 = vmatprep.mubr.msk.bf16.mxu1 (!%p238_p3), %vm957_vm0, %v952_v11  ;;  %v958_v18 = vmov (!%p238_p3), 0   ;;  %v470_v19 = vld [vmem:[%s1120_s2] sm:$0xff] (!%p238_p3)  ;;  %vm349_vm1 = vcmask (!%p238_p3), 1039360   ;;  %vm418_vm2 = vcmask (!%p238_p3), 1041408  }
   0x8   : > { %v323_v3 = vshrl.u32 (!%p238_p3), %v322_v0, 7  ;;  %s953_s28 = smov (!%p238_p3), 110   ;;  %s954_s29 = smov (!%p238_p3), 109   ;;  %521 = vmatprep.mubr.bf16.mxu0 (!%p238_p3), %v958_v18  ;;  %921 = vset.pattern.permute.xlu0 (!%p238_p3), %v958_v18  ;;  %v576_v20 = vld [vmem:[%s1121_s3] sm:$0xff] (!%p238_p3)  ;;  %vm370_vm3 = vcmask (!%p238_p3), 900096   ;;  %vm360_vm4 = vcmask (!%p238_p3), 1031168  }
   0x9   : > { %v321_v4 = vunpack.c.0.s8 (!%p238_p3), %v320_v2  ;;  %s955_s30 = smov (!%p238_p3), 108   ;;  %s956_s6 = smov (!%p238_p3), 92   ;;  %922 = vset.pattern.permute.xlu1 (!%p238_p3), %v958_v18  ;;  %v585_v21 = vld [vmem:[%s1122_s4] sm:$0xff] (!%p238_p3)  ;;  %vm435_vm5 = vcmask (!%p238_p3), 1045504   ;;  %vm428_vm6 = vcmask (!%p238_p3), 1043456   ;;  %vm388_vm7 = vcmask (!%p238_p3), 883712  }
   0xa   : > { %s959_s7 = smov (!%p238_p3), 91   ;;  %s960_s8 = smov (!%p238_p3), 90   ;;  %vm397_vm8 = vcmask (!%p238_p3), 752640   ;;  %vm379_vm9 = vcmask (!%p238_p3), 891904   ;;  %vm406_vm10 = vcmask (!%p238_p3), 744448   ;;  %vm415_vm11 = vcmask (!%p238_p3), 736256  }
   0xb   : > { %v324_v5 = vsub.s32 (!%p238_p3), %v321_v4, %v323_v3  ;;  %vm476_vm12 = vcmask (!%p238_p3), 293888  }
   0xe   : > { %s1131_s18 = smov (!%p285_p4, %s939_s18), 1 }
   0xf   : > { %s876_s22 = smul.u32 6, %s1131_s18 }
  0x10   : > { %s877_s17 = smul.u32 12, %s1131_s18  ;;  %s961_s18 = smov 19  }
  0x11   : > { %s289_s25 = scalar_lea.vmem %s1118_s0, %s876_s22 }
  0x12   : > { %v316_v6 = vld [vmem:[%s289_s25] sm:$0x3f]  ;;  %s1099_s24 = scalar_lea.vmem %s1123_s5, %s877_s17 }
  0x13   : > { %v1017_v7 = vrot.slane %v316_v6, %v324_v5  ;;  %v334_v8 = vcombine.low %v316_v6, %v316_v6  ;;  %v318_v10 = vcombine.high %v316_v6, %v316_v6 }
  0x15   : > { %356 = vrot.lane.b32.xlu1 %v1017_v7, %s950_s26  ;;  %347 = vrot.lane.b32.xlu0 %v1017_v7, %s951_s27  ;;  %v341_v9 = vrot.slane %v334_v8, %v324_v5  ;;  %v352_v13 = vcombine.low %v1017_v7, %v1017_v7  ;;  %v332_v14 = vrot.slane %v318_v10, %v324_v5 }
  0x16   : > { %v333_v16 = vcombine.high %v1017_v7, %v1017_v7 }
  0x17   : > { %v342_v12 = vcombine.high %v341_v9, %v341_v9  ;;  %v353_v15 = vcombine.low %v332_v14, %v332_v14  ;;  %v363_v17 = vcombine.low %v341_v9, %v341_v9 }
  0x19   : > { %343 = vrot.lane.b32.xlu1 %v341_v9, %s951_s27  ;;  %366 = vrot.lane.b32.xlu0 %v341_v9, %s953_s28 }
  0x1d   : > { %345 = vrot.lane.b32.xlu0 %v342_v12, %s951_s27  ;;  %354 = vrot.lane.b32.xlu1 %v352_v13, %s950_s26 }
  0x21   : > { %368 = vrot.lane.b32.xlu1 %v352_v13, %s953_s28  ;;  %358 = vrot.lane.b32.xlu0 %v353_v15, %s950_s26 }
  0x25   : > { %375 = vrot.lane.b32.xlu1 %v333_v16, %s954_s29  ;;  %364 = vrot.lane.b32.xlu0 %v363_v17, %s953_s28 }
  0x29   : > { %384 = vrot.lane.b32.xlu1 %v342_v12, %s955_s30  ;;  %377 = vrot.lane.b32.xlu0 %v332_v14, %s954_s29 }
  0x2d   : > { %373 = vrot.lane.b32.xlu1 %v1017_v7, %s954_s29  ;;  %386 = vrot.lane.b32.xlu0 %v1017_v7, %s955_s30 }
  0x31   : > { %393 = vrot.lane.b32.xlu1 %v1017_v7, %s956_s6  ;;  %382 = vrot.lane.b32.xlu0 %v341_v9, %s955_s30 }
  0x35   : > { %391 = vrot.lane.b32.xlu1 %v352_v13, %s956_s6  ;;  %395 = vrot.lane.b32.xlu0 %v353_v15, %s956_s6 }
  0x39   : > { %404 = vrot.lane.b32.xlu1 %v352_v13, %s959_s7  ;;  %402 = vrot.lane.b32.xlu0 %v341_v9, %s959_s7 }
  0x3d   : > { %409 = vrot.lane.b32.xlu1 %v1017_v7, %s960_s8  ;;  %400 = vrot.lane.b32.xlu0 %v363_v17, %s959_s7 }
  0x41   : > { %413 = vrot.lane.b32.xlu1 %v332_v14, %s960_s8  ;;  %411 = vrot.lane.b32.xlu0 %v333_v16, %s960_s8 }
  0x45   : > { %473 = vperm.xlu0 %921, %v470_v19   ;;  %579 = vperm.xlu1 %922, %v576_v20   ;;  %v469_v20 = vld [vmem:[%s1119_s1] sm:$0xf] }
  0x49   : > { %588 = vperm.xlu1 %922, %v585_v21   ;;  %v595_v21 = vand.u32 127, %v322_v0 }
  0x87   : > { %v357_v22 = vpop.permute.xlu1 %356  ;;  %v348_v23 = vpop.permute.xlu0 %347 }
  0x88   : > { %v427_v30 = vsel %vm418_vm2, %v332_v14, %v348_v23 }
  0x8b   : > { %v344_v24 = vpop.permute.xlu1 %343  ;;  %v367_v25 = vpop.permute.xlu0 %366 }
  0x8f   : > { %v346_v26 = vpop.permute.xlu0 %345  ;;  %v355_v27 = vpop.permute.xlu1 %354 }
  0x90   : > { %v351_v28 = vsel %vm349_vm1, %v346_v26, %v348_v23  ;;  %v350_v29 = vsel %vm349_vm1, %v344_v24, %v346_v26  ;;  %v361_v38 = vsel %vm360_vm4, %v355_v27, %v357_v22  ;;  %v596_v23 = vadd.s32 128, %v595_v21 }
  0x91   : > { %v424_v33 = vsel %vm418_vm2, %v333_v16, %v351_v28  ;;  %v421_v37 = vsel %vm418_vm2, %v1017_v7, %v350_v29 }
  0x92   : > { %v430_v45 = vsel %vm428_vm6, %v421_v37, %v361_v38  ;;  %v599_v26 = vadd.s32 1, %v596_v23 }
  0x93   : > { %v369_v31 = vpop.permute.xlu1 %368  ;;  %v359_v32 = vpop.permute.xlu0 %358 }
  0x94   : > { %v372_v34 = vsel %vm370_vm3, %v367_v25, %v369_v31  ;;  %v362_v35 = vsel %vm360_vm4, %v357_v22, %v359_v32  ;;  %v434_v36 = vsel %vm428_vm6, %v427_v30, %v359_v32  ;;  %v597_v22 = vadd.s32 256, %v595_v21 }
  0x95   : > { %v443_v39 = vsel %vm435_vm5, %v434_v36, %v369_v31  ;;  %v432_v40 = vsel %vm428_vm6, %v424_v33, %v362_v35  ;;  %v1085_v31 = vmul.u32.u64.low 3817748708, %v599_v26  ;;  %v1086_v32 = vmul.u32.u64.high 3817748708, %v599_v26, %v1085_v31 }
  0x96   : > { %867 = vmatpush3.bf16.msra.mxu1 %v443_v39  ;;  %v440_v41 = vsel %vm435_vm5, %v432_v40, %v372_v34  ;;  %v600_v24 = vadd.s32 1, %v597_v22 }
  0x97   : > { %v376_v42 = vpop.permute.xlu1 %375  ;;  %489 = vmatprep.subr.bf16.mxu0 %v440_v41  ;;  %v365_v43 = vpop.permute.xlu0 %364  ;;  %868 = vmatprep.subr.bf16.mxu1 %v952_v11  ;;  %v618_v0 = vshrl.u32 %v1086_v32, 4 }
  0x98   : > { %v371_v44 = vsel %vm370_vm3, %v365_v43, %v367_v25  ;;  %v598_v25 = vadd.s32 1, %v595_v21  ;;  %v1079_v27 = vmul.u32.u64.low 3817748708, %v600_v24  ;;  %v1080_v28 = vmul.u32.u64.high 3817748708, %v600_v24, %v1079_v27 }
  0x99   : > { %v437_v46 = vsel %vm435_vm5, %v430_v45, %v371_v44  ;;  %v619_v37 = vmul.u32 18, %v618_v0 }
  0x9a   : > { %490 = vmatpush1.bf16.msra.mxu0 %v437_v46  ;;  %v1082_v29 = vmul.u32.u64.low 3817748708, %v598_v25  ;;  %v1083_v30 = vmul.u32.u64.high 3817748708, %v598_v25, %v1082_v29  ;;  %v629_v33 = vshrl.u32 %v1080_v28, 4 }
  0x9b   : > { %v385_v47 = vpop.permute.xlu1 %384  ;;  %v378_v48 = vpop.permute.xlu0 %377  ;;  %v620_v40 = vsub.s32 %v599_v26, %v619_v37 }
  0x9c   : > { %v381_v57 = vsel %vm379_vm9, %v376_v42, %v378_v48  ;;  %v607_v34 = vshrl.u32 %v1083_v30, 4  ;;  %v630_v35 = vmul.u32 18, %v629_v33 }
  0x9d   : > { %vm635_vm1 = vcmp.ne.s32.totalorder %v620_v40, 0 }
  0x9e   : > { %v608_v36 = vmul.u32 18, %v607_v34  ;;  %v631_v38 = vsub.s32 %v600_v24, %v630_v35 }
  0x9f   : > { %v374_v49 = vpop.permute.xlu1 %373  ;;  %v387_v50 = vpop.permute.xlu0 %386 }
  0xa0   : > { %v390_v55 = vsel %vm388_vm7, %v385_v47, %v387_v50  ;;  %v453_v58 = vsel %vm418_vm2, %v378_v48, %v387_v50  ;;  %v380_v6 = vsel %vm379_vm9, %v374_v49, %v376_v42  ;;  %v609_v39 = vsub.s32 %v598_v25, %v608_v36 }
  0xa1   : > { %v450_v59 = vsel %vm418_vm2, %v381_v57, %v390_v55  ;;  %vm636_vm13 = vcmp.ne.s32.totalorder %v631_v38, 0  ;;  %vm639_vm14 = vcmp.lt.s32.totalorder %v631_v38, 0  ;;  %v645_v42 = vadd.s32 18, %v631_v38 }
  0xa2   : > { %vm634_vm15 = vcmp.ne.s32.totalorder %v609_v39, 0  ;;  %vm637_vm0 = vcmp.lt.s32.totalorder %v609_v39, 0  ;;  %vm642_vm3 = vmand %vm639_vm14, %vm636_vm13  ;;  %v643_v43 = vadd.s32 18, %v609_v39 }
  0xa3   : > { %v394_v51 = vpop.permute.xlu1 %393  ;;  %v383_v52 = vpop.permute.xlu0 %382  ;;  %vm1091_vm4 = vmand %vm637_vm0, %vm634_vm15  ;;  %vm690_vm0 = vcmask 1043608  }
  0xa4   : > { %v389_v63 = vsel %vm388_vm7, %v383_v52, %v385_v47  ;;  %v644_v47 = vadd.s32 18, %v620_v40 }
  0xa5   : > { %v447_v7 = vsel %vm418_vm2, %v380_v6, %v389_v63 }
  0xa7   : > { %v392_v53 = vpop.permute.xlu1 %391  ;;  %v396_v54 = vpop.permute.xlu0 %395 }
  0xa8   : > { %v399_v56 = vsel %vm397_vm8, %v394_v51, %v396_v54  ;;  %v459_v60 = vsel %vm428_vm6, %v453_v58, %v396_v54  ;;  %v398_v4 = vsel %vm397_vm8, %v392_v53, %v394_v51  ;;  %v648_v54 = vsel %vm642_vm3, %v645_v42, %v631_v38 }
  0xa9   : > { %v457_v3 = vsel %vm428_vm6, %v450_v59, %v399_v56  ;;  %v455_v12 = vsel %vm428_vm6, %v447_v7, %v398_v4  ;;  %v646_v59 = vsel %vm1091_vm4, %v643_v43, %v609_v39  ;;  %vm651_vm7 = vcmp.ge.s32.totalorder %v648_v54, 1 }
  0xaa   : > { %vm654_vm8 = vcmp.le.s32.totalorder %v648_v54, 16  ;;  %vm649_vm9 = vcmp.ge.s32.totalorder %v646_v59, 1  ;;  %vm694_vm4 = vcmask 396288  }
  0xab   : > { %v405_v61 = vpop.permute.xlu1 %404  ;;  %v403_v62 = vpop.permute.xlu0 %402  ;;  %vm657_vm13 = vmand %vm651_vm7, %vm654_vm8 }
  0xac   : > { %v408_v1 = vsel %vm406_vm10, %v403_v62, %v405_v61  ;;  %v467_v2 = vsel %vm435_vm5, %v459_v60, %v405_v61 }
  0xad   : > { %869 = vmatpush3.bf16.msra.mxu1 %v467_v2  ;;  %v464_v5 = vsel %vm435_vm5, %v457_v3, %v408_v1 }
  0xae   : > { %491 = vmatprep.subr.bf16.mxu0 %v464_v5  ;;  %870 = vmatprep.subr.bf16.mxu1 %v952_v11 }
  0xaf   : > { %v410_v8 = vpop.permute.xlu1 %409  ;;  %v401_v9 = vpop.permute.xlu0 %400 }
  0xb0   : > { %v407_v10 = vsel %vm406_vm10, %v401_v9, %v403_v62  ;;  %vm652_vm10 = vcmp.le.s32.totalorder %v646_v59, 16 }
  0xb1   : > { %v461_v13 = vsel %vm435_vm5, %v455_v12, %v407_v10  ;;  %vm667_vm5 = vcmask 150528   ;;  %vm655_vm14 = vmand %vm649_vm9, %vm652_vm10 }
  0xb2   : > { %492 = vmatpush1.bf16.msra.mxu0 %v461_v13  ;;  %668 = vst.msk [vmem:[%s1099_s24] sm:$0xf] %vm667_vm5, %v958_v18  ;;  %vm696_vm5 = vcmask 552328  }
  0xb3   : > { %v414_v14 = vpop.permute.xlu1 %413  ;;  %v412_v15 = vpop.permute.xlu0 %411 }
  0xb4   : > { %v416_v16 = vsel %vm415_vm11, %v410_v8, %v412_v15  ;;  %v417_v17 = vsel %vm415_vm11, %v412_v15, %v414_v14  ;;  %v487_v19 = vsel %vm418_vm2, %v414_v14, 0 }
  0xb5   : > { %853 = vmatprep.subr.msk.bf16.mxu0 %vm418_vm2, %v417_v17  ;;  %871 = vmatpush3.bf16.msra.mxu1 %v487_v19  ;;  %v481_v11 = vsel %vm418_vm2, %v416_v16, 0  ;;  %vm638_vm2 = vcmp.lt.s32.totalorder %v620_v40, 0 }
  0xb6   : > { %494 = vmatpush1.bf16.msra.mxu0 %v481_v11  ;;  %vm641_vm6 = vmand %vm638_vm2, %vm635_vm1  ;;  %vm691_vm1 = vcmask 1047556   ;;  %vm685_vm2 = vcmask 154624  }
  0xb7   : > { %v647_v62 = vsel %vm641_vm6, %v644_v47, %v620_v40  ;;  %vm692_vm3 = vmor %vm691_vm1, %vm690_vm0 }
  0xb8   : > { %873 = vmatmul.mubr.msk.bf16.vlgmr.msra.gmra.mrb[0].mxu1 %vm476_vm12, %v469_v20  ;;  %vm650_vm11 = vcmp.ge.s32.totalorder %v647_v62, 1 }
  0xb9   : > { %854 = vmatmul.mubr.msk.bf16.vlgmr.msra.gmra.mrb[0].mxu0 %vm476_vm12, %v469_v20  ;;  %vm653_vm12 = vcmp.le.s32.totalorder %v647_v62, 16 }
  0xba   : > { %vm656_vm15 = vmand %vm650_vm11, %vm653_vm12 }
  0xc4   : > { %v474_v41 = vpop.permute.xlu0 %473  ;;  %v580_v45 = vpop.permute.xlu1 %579 }
  0xc8   : > { %v589_v6 = vpop.permute.xlu1 %588 }
 0x18b   : > { %v564_v44 = vpop.f32.mrb[0].mxu1 }
 0x18c   : > { %v565_v48 = vadd.f32 %v564_v44, %v474_v41  ;;  %v523_v49 = vpop.f32.mrb[0].mxu0  ;;  %v874_v50 = vpop.f32.mrb[1].mxu1 }
 0x18d   : > { %v524_v51 = vadd.f32 %v523_v49, %v474_v41  ;;  %v525_v52 = vpop.f32.mrb[1].mxu0  ;;  %v567_v53 = vpop.f32.mrb[2].mxu1 }
 0x18e   : > { %v572_v55 = vmul.f32 0.2, %v565_v48  ;;  %v526_v56 = vadd.f32 %v525_v52, %v474_v41  ;;  %v527_v57 = vpop.f32.mrb[2].mxu0  ;;  %v875_v58 = vpop.f32.mrb[3].mxu1 }
 0x18f   : > { %v570_v60 = vmul.f32 0.2, %v524_v51  ;;  %v528_v61 = vpop.f32.mrb[3].mxu0 }
 0x190   : > { %v575_v63 = vmax.f32 %v565_v48, %v572_v55  ;;  %v571_v1 = vmul.f32 0.2, %v526_v56 }
 0x191   : > { %v573_v2 = vmax.f32 %v524_v51, %v570_v60 }
 0x192   : > { %v584_v3 = vmul.f32 %v580_v45, %v575_v63  ;;  %v574_v4 = vmax.f32 %v526_v56, %v571_v1 }
 0x193   : > { %v582_v5 = vmul.f32 %v580_v45, %v573_v2 }
 0x194   : > { %v583_v7 = vmul.f32 %v580_v45, %v574_v4  ;;  %v593_v8 = vadd.f32 %v589_v6, %v584_v3 }
 0x195   : > { %v591_v9 = vadd.f32 %v589_v6, %v582_v5 }
 0x196   : > { %v592_v10 = vadd.f32 %v589_v6, %v583_v7  ;;  %v666_v12 = vsel %vm657_vm13, %v593_v8, 0.0 }
 0x197   : > { %v861_v13 = vpack.c.bf16 %v666_v12, %v666_v12  ;;  %v664_v14 = vsel %vm655_vm14, %v591_v9, 0.0 }
 0x198   : > { %v665_v15 = vsel %vm656_vm15, %v592_v10, 0.0 }
 0x199   : > { %682 = vrot.lane.b32.xlu1 %v861_v13, %s961_s18  ;;  %v860_v16 = vpack.c.bf16 %v665_v15, %v664_v14 }
 0x19b   : > { %680 = vrot.lane.b32.xlu0 %v860_v16, %s961_s18 }
 0x20b   : > { %v683_v11 = vpop.permute.xlu1 %682 }
 0x20d   : > { %v681_v17 = vpop.permute.xlu0 %680 }
 0x20e   : > { %v684_v19 = vrot.slane %v681_v17, 4 }
 0x210   : > { %v686_v20 = vsel %vm685_vm2, %v684_v19, %v681_v17  ;;  %v687_v21 = vsel %vm685_vm2, %v684_v19, %v683_v11 }
 0x211   : > { %693 = vst.msk [vmem:[%s1099_s24] sm:$0xff] %vm692_vm3, %v686_v20 }
 0x212   : > { %695 = vst.msk [vmem:[%s1099_s24 + $0x8] sm:$0xf] %vm694_vm4, %v687_v21 }
 0x213   : > { %697 = vst.msk [vmem:[%s1099_s24 + $0x8] sm:$0xf] %vm696_vm5, %v958_v18 }
 0x214 PF: > { %s15_s20 = sadd.s32 1, %s947_s20   ;;  %s1126_s18 = smov %s943_s19 }
 0x215   : > { %p12_p5 = scmp.ge.s32.totalorder %s15_s20, 4   ;;  %s1127_s19 = smov %s1129_s21 }
 0x217   :  { %14 = sbr.rel (!%p12_p5) target bundleno = 2 (0x2), region = 82 }

// kernel: vanilla_ae_forward_pallas.14
= control target key start
LH: loop header
LB: loop body
LE: loop exit
PB: predicated region body
PF: predicated region fallthrough
CT: control target
= control target key end

     0   :  { %s1031_s18 = smov 0   ;;  %s1033_s19 = smov 0   ;;  %s1162_s0 = inlined_call_operand.vmem [shape: bf16[2,16,324], index: 0, kind: input, shape index: {}]   ;;  %s1163_s1 = inlined_call_operand.vmem [shape: bf16[16,144], index: 1, kind: input, shape index: {}]   ;;  %s1164_s2 = inlined_call_operand.vmem [shape: f32[16,1], index: 2, kind: input, shape index: {}]   ;;  %s1165_s3 = inlined_call_operand.vmem [shape: f32[16,1], index: 3, kind: input, shape index: {}]   ;;  %s1166_s4 = inlined_call_operand.vmem [shape: f32[16,1], index: 4, kind: input, shape index: {}]   ;;  %s1167_s5 = inlined_call_operand.vmem [shape: bf16[2,16,324], index: 5, kind: output, shape index: {}]  }
   0x1   :  { %s1035_s20 = smov 0  }
   0x2 LB: > { %s27_s21 = sadd.s32 1, %s985_s19  ;;  %p897_p0 = scmp.ge.s32.totalorder %s989_s20, 1  ;;  %s989_s20 = sphi %s1035_s20, %s15_s20   ;;  %s985_s19 = sphi %s1033_s19, %s1175_s19   ;;  %s981_s18 = sphi %s1031_s18, %s1174_s18  }
   0x3   : > { %p29_p1 = scmp.ge.s32.totalorder %s27_s21, 2  ;;  %p246_p2 = scmp.lt.s32.totalorder %s989_s20, 3 }
   0x5   : > { %s1177_s21 = smov (%p29_p1, %s27_s21), 0  ;;  %p247_p3 = pnand %p897_p0, %p246_p2 }
   0x6   : > { %p300_p4 = scmp.lt.s32.totalorder (!%p247_p3), %s981_s18, 1  ;;  %v991_v0 = vmov (!%p247_p3), 0   ;;  %s992_s26 = smov (!%p247_p3), 127   ;;  %v966_v4 = vld [vmem:[%s1163_s1 + $0x4] ss:$8 sps:$4 sm:$0xff] (!%p247_p3)   ;;  %vm481_vm0 = vcmask (!%p247_p3), 130048   ;;  %v617_v52 = vlaneseq (!%p247_p3) }
   0x7   : > { %250 = sbr.rel (%p247_p3) target bundleno = 534 (0x216), region = 40  ;;  %528 = vmatprep.subr.bf16.mxu1 (!%p247_p3), %v991_v0  ;;  %959 = vset.pattern.permute.xlu1 (!%p247_p3), %v991_v0  ;;  %s993_s27 = smov (!%p247_p3), 126   ;;  %v460_v5 = vld [vmem:[%s1164_s2] sm:$0xff] (!%p247_p3)  ;;  %v461_v6 = vld [vmem:[%s1164_s2 + $0x8] sm:$0xff] (!%p247_p3)  ;;  %vm368_vm1 = vcmask (!%p247_p3), 1039360   ;;  %vm380_vm2 = vcmask (!%p247_p3), 1031168  }
   0x8   : > { %958 = vset.pattern.permute.xlu0 (!%p247_p3), %v991_v0  ;;  %s994_s28 = smov (!%p247_p3), 110   ;;  %s995_s29 = smov (!%p247_p3), 109   ;;  %906 = vmatprep.mubr.msk.bf16.mxu1 (!%p247_p3), %vm481_vm0, %v966_v4  ;;  %v582_v7 = vld [vmem:[%s1165_s3 + $0x8] sm:$0xff] (!%p247_p3)  ;;  %v581_v8 = vld [vmem:[%s1165_s3] sm:$0xff] (!%p247_p3)  ;;  %vm392_vm3 = vcmask (!%p247_p3), 900096   ;;  %vm404_vm4 = vcmask (!%p247_p3), 891904  }
   0x9   : > { %s996_s30 = smov (!%p247_p3), 108   ;;  %s997_s6 = smov (!%p247_p3), 92   ;;  %905 = vmatprep.mubr.msk.bf16.mxu0 (!%p247_p3), %vm481_vm0, %v966_v4  ;;  %v600_v9 = vld [vmem:[%s1166_s4 + $0x8] sm:$0xff] (!%p247_p3)  ;;  %v599_v10 = vld [vmem:[%s1166_s4] sm:$0xff] (!%p247_p3)  ;;  %vm416_vm5 = vcmask (!%p247_p3), 883712   ;;  %vm428_vm6 = vcmask (!%p247_p3), 752640  }
   0xa   : > { %s998_s9 = smov (!%p247_p3), 91   ;;  %s999_s10 = smov (!%p247_p3), 90   ;;  %vm440_vm7 = vcmask (!%p247_p3), 744448   ;;  %vm452_vm8 = vcmask (!%p247_p3), 736256   ;;  %v964_v48 = vld [vmem:[%s1163_s1] ss:$8 sps:$4 sm:$0xff] (!%p247_p3)  }
   0xb   : > { %vm693_vm9 = vcmask (!%p247_p3), 150528   ;;  %v618_v53 = vand.u32 (!%p247_p3), 127, %v617_v52 }
   0xd   : > { %v620_v54 = vadd.s32 (!%p247_p3), 256, %v618_v53  ;;  %v619_v55 = vadd.s32 (!%p247_p3), 128, %v618_v53  ;;  %v621_v57 = vadd.s32 (!%p247_p3), 1, %v618_v53 }
   0xe   : > { %s1179_s18 = smov (!%p300_p4, %s981_s18), 1 }
   0xf   : > { %s917_s22 = smul.u32 24, %s1179_s18  ;;  %v623_v56 = vadd.s32 1, %v620_v54  ;;  %v622_v58 = vadd.s32 1, %v619_v55  ;;  %v1106_v61 = vmul.u32.u64.low 3817748708, %v621_v57  ;;  %v1107_v62 = vmul.u32.u64.high 3817748708, %v621_v57, %v1106_v61  ;;  %s1000_s18 = smov 19  }
  0x11   : > { %s304_s25 = scalar_lea.vmem %s1162_s0, %s917_s22  ;;  %s1097_s7 = scalar_lea.vmem %s1167_s5, %s917_s22  ;;  %v1103_v59 = vmul.u32.u64.low 3817748708, %v623_v56  ;;  %v1104_v60 = vmul.u32.u64.high 3817748708, %v623_v56, %v1103_v59 }
  0x12   : > { %v960_v1 = vld [vmem:[%s304_s25 + $0x4] ss:$12 sps:$4 sm:$0xff]   ;;  %v962_v2 = vld [vmem:[%s304_s25] ss:$12 sps:$4 sm:$0xff]   ;;  %v963_v3 = vld [vmem:[%s304_s25 + $0x8] ss:$12 sps:$4 sm:$0xff]  }
  0x13   : > { %364 = vrot.lane.b32.xlu0 %v960_v1, %s992_s26  ;;  %485 = vmatprep.subr.bf16.mxu0 %v960_v1  ;;  %694 = vst.msk [vmem:[%s1097_s7] sm:$0xf] %vm693_vm9, %v991_v0  ;;  %695 = vst.msk [vmem:[%s1097_s7 + $0xc] sm:$0xf] %vm693_vm9, %v991_v0 }
  0x14   : > { %362 = vrot.lane.b32.xlu1 %v962_v2, %s992_s26  ;;  %486 = vmatpush1.bf16.msra.mxu0 %v962_v2 }
  0x15   : > { %529 = vmatpush1.bf16.msra.mxu1 %v963_v3 }
  0x16   : > { %530 = vmatprep.subr.bf16.mxu1 %v991_v0 }
  0x17   : > { %366 = vrot.lane.b32.xlu0 %v963_v3, %s992_s26 }
  0x18   : > { %376 = vrot.lane.b32.xlu1 %v960_v1, %s993_s27 }
  0x1b   : > { %378 = vrot.lane.b32.xlu0 %v963_v3, %s993_s27 }
  0x1c   : > { %374 = vrot.lane.b32.xlu1 %v962_v2, %s993_s27 }
  0x1f   : > { %388 = vrot.lane.b32.xlu0 %v960_v1, %s994_s28 }
  0x20   : > { %390 = vrot.lane.b32.xlu1 %v963_v3, %s994_s28 }
  0x23   : > { %386 = vrot.lane.b32.xlu0 %v962_v2, %s994_s28 }
  0x24   : > { %400 = vrot.lane.b32.xlu1 %v960_v1, %s995_s29 }
  0x27   : > { %402 = vrot.lane.b32.xlu0 %v963_v3, %s995_s29 }
  0x28   : > { %398 = vrot.lane.b32.xlu1 %v962_v2, %s995_s29 }
  0x2b   : > { %412 = vrot.lane.b32.xlu0 %v960_v1, %s996_s30 }
  0x2c   : > { %414 = vrot.lane.b32.xlu1 %v963_v3, %s996_s30 }
  0x2f   : > { %410 = vrot.lane.b32.xlu0 %v962_v2, %s996_s30 }
  0x30   : > { %424 = vrot.lane.b32.xlu1 %v960_v1, %s997_s6 }
  0x33   : > { %426 = vrot.lane.b32.xlu0 %v963_v3, %s997_s6 }
  0x34   : > { %422 = vrot.lane.b32.xlu1 %v962_v2, %s997_s6 }
  0x37   : > { %436 = vrot.lane.b32.xlu0 %v960_v1, %s998_s9 }
  0x38   : > { %438 = vrot.lane.b32.xlu1 %v963_v3, %s998_s9 }
  0x3b   : > { %434 = vrot.lane.b32.xlu0 %v962_v2, %s998_s9 }
  0x3c   : > { %448 = vrot.lane.b32.xlu1 %v960_v1, %s999_s10  ;;  %v1109_v63 = vmul.u32.u64.low 3817748708, %v622_v58  ;;  %v1110_v1 = vmul.u32.u64.high 3817748708, %v622_v58, %v1109_v63 }
  0x3e   : > { %v641_v4 = vshrl.u32 %v1110_v1, 4 }
  0x3f   : > { %450 = vrot.lane.b32.xlu0 %v963_v3, %s999_s10  ;;  %v630_v3 = vshrl.u32 %v1107_v62, 4 }
  0x40   : > { %446 = vrot.lane.b32.xlu1 %v962_v2, %s999_s10  ;;  %v652_v2 = vshrl.u32 %v1104_v60, 4 }
  0x43   : > { %464 = vperm.xlu0 %958, %v460_v5   ;;  %v653_v5 = vmul.u32 18, %v652_v2 }
  0x44   : > { %469 = vperm.xlu1 %959, %v461_v6   ;;  %v631_v6 = vmul.u32 18, %v630_v3 }
  0x47   : > { %590 = vperm.xlu0 %958, %v582_v7   ;;  %v642_v7 = vmul.u32 18, %v641_v4 }
  0x48   : > { %585 = vperm.xlu1 %959, %v581_v8   ;;  %v654_v8 = vsub.s32 %v623_v56, %v653_v5 }
  0x4a   : > { %vm659_vm10 = vcmp.ne.s32.totalorder %v654_v8, 0  ;;  %vm662_vm11 = vcmp.lt.s32.totalorder %v654_v8, 0 }
  0x4b   : > { %608 = vperm.xlu0 %958, %v600_v9   ;;  %v632_v9 = vsub.s32 %v621_v57, %v631_v6  ;;  %vm1115_vm0 = vmand %vm662_vm11, %vm659_vm10 }
  0x4c   : > { %603 = vperm.xlu1 %959, %v599_v10   ;;  %v643_v10 = vsub.s32 %v622_v58, %v642_v7 }
  0x4d   : > { %vm657_vm12 = vcmp.ne.s32.totalorder %v632_v9, 0  ;;  %vm660_vm13 = vcmp.lt.s32.totalorder %v632_v9, 0 }
  0x4e   : > { %vm658_vm14 = vcmp.ne.s32.totalorder %v643_v10, 0  ;;  %vm661_vm15 = vcmp.lt.s32.totalorder %v643_v10, 0 }
  0x85   : > { %v365_v11 = vpop.permute.xlu0 %364 }
  0x86   : > { %v363_v12 = vpop.permute.xlu1 %362 }
  0x87   : > { %v369_v16 = vsel %vm368_vm1, %v363_v12, %v365_v11  ;;  %v666_v12 = vadd.s32 18, %v632_v9 }
  0x89   : > { %v367_v13 = vpop.permute.xlu0 %366 }
  0x8a   : > { %v377_v14 = vpop.permute.xlu1 %376  ;;  %531 = vmatpush1.bf16.msra.mxu1 %v367_v13  ;;  %v370_v15 = vsel %vm368_vm1, %v365_v11, %v367_v13  ;;  %vm663_vm1 = vmand %vm660_vm13, %vm657_vm12  ;;  %vm731_vm12 = vcmask 1043608   ;;  %vm732_vm13 = vcmask 1047556  }
  0x8b   : > { %487 = vmatprep.subr.bf16.mxu0 %v370_v15  ;;  %532 = vmatprep.subr.bf16.mxu1 %v991_v0 }
  0x8c   : > { %488 = vmatpush1.bf16.msra.mxu0 %v369_v16  ;;  %v667_v16 = vadd.s32 18, %v643_v10 }
  0x8d   : > { %v379_v17 = vpop.permute.xlu0 %378 }
  0x8e   : > { %v375_v18 = vpop.permute.xlu1 %374  ;;  %533 = vmatpush1.bf16.msra.mxu1 %v379_v17  ;;  %v382_v19 = vsel %vm380_vm2, %v377_v14, %v379_v17  ;;  %v668_v17 = vadd.s32 18, %v654_v8 }
  0x8f   : > { %489 = vmatprep.subr.bf16.mxu0 %v382_v19  ;;  %v381_v20 = vsel %vm380_vm2, %v375_v18, %v377_v14  ;;  %534 = vmatprep.subr.bf16.mxu1 %v991_v0  ;;  %vm664_vm2 = vmand %vm661_vm15, %vm658_vm14  ;;  %vm722_vm14 = vcmask 154624  }
  0x90   : > { %490 = vmatpush1.bf16.msra.mxu0 %v381_v20  ;;  %vm733_vm15 = vmor %vm732_vm13, %vm731_vm12 }
  0x91   : > { %v389_v21 = vpop.permute.xlu0 %388 }
  0x92   : > { %v391_v22 = vpop.permute.xlu1 %390 }
  0x93   : > { %v394_v23 = vsel %vm392_vm3, %v389_v21, %v391_v22  ;;  %535 = vmatpush1.bf16.msra.mxu1 %v391_v22 }
  0x94   : > { %491 = vmatprep.subr.bf16.mxu0 %v394_v23  ;;  %536 = vmatprep.subr.bf16.mxu1 %v991_v0 }
  0x95   : > { %v387_v24 = vpop.permute.xlu0 %386 }
  0x96   : > { %v401_v25 = vpop.permute.xlu1 %400  ;;  %v393_v26 = vsel %vm392_vm3, %v387_v24, %v389_v21 }
  0x97   : > { %492 = vmatpush1.bf16.msra.mxu0 %v393_v26 }
  0x99   : > { %v403_v27 = vpop.permute.xlu0 %402 }
  0x9a   : > { %v399_v28 = vpop.permute.xlu1 %398  ;;  %537 = vmatpush1.bf16.msra.mxu1 %v403_v27  ;;  %v406_v29 = vsel %vm404_vm4, %v401_v25, %v403_v27  ;;  %v669_v27 = vsel %vm663_vm1, %v666_v12, %v632_v9  ;;  %vm739_vm1 = vcmask 552328  }
  0x9b   : > { %493 = vmatprep.subr.bf16.mxu0 %v406_v29  ;;  %v405_v30 = vsel %vm404_vm4, %v399_v28, %v401_v25  ;;  %538 = vmatprep.subr.bf16.mxu1 %v991_v0  ;;  %vm672_vm3 = vcmp.ge.s32.totalorder %v669_v27, 1  ;;  %vm675_vm4 = vcmp.le.s32.totalorder %v669_v27, 16 }
  0x9c   : > { %494 = vmatpush1.bf16.msra.mxu0 %v405_v30 }
  0x9d   : > { %v413_v31 = vpop.permute.xlu0 %412 }
  0x9e   : > { %v415_v32 = vpop.permute.xlu1 %414 }
  0x9f   : > { %v418_v33 = vsel %vm416_vm5, %v413_v31, %v415_v32  ;;  %539 = vmatpush1.bf16.msra.mxu1 %v415_v32  ;;  %v671_v32 = vsel %vm1115_vm0, %v668_v17, %v654_v8  ;;  %vm735_vm0 = vcmask 396288  }
  0xa0   : > { %495 = vmatprep.subr.bf16.mxu0 %v418_v33  ;;  %540 = vmatprep.subr.bf16.mxu1 %v991_v0  ;;  %vm677_vm9 = vcmp.le.s32.totalorder %v671_v32, 16 }
  0xa1   : > { %v411_v34 = vpop.permute.xlu0 %410 }
  0xa2   : > { %v425_v35 = vpop.permute.xlu1 %424  ;;  %v417_v36 = vsel %vm416_vm5, %v411_v34, %v413_v31  ;;  %v670_v31 = vsel %vm664_vm2, %v667_v16, %v643_v10 }
  0xa3   : > { %496 = vmatpush1.bf16.msra.mxu0 %v417_v36  ;;  %vm673_vm5 = vcmp.ge.s32.totalorder %v670_v31, 1 }
  0xa5   : > { %v427_v37 = vpop.permute.xlu0 %426 }
  0xa6   : > { %v423_v38 = vpop.permute.xlu1 %422  ;;  %541 = vmatpush1.bf16.msra.mxu1 %v427_v37  ;;  %v430_v39 = vsel %vm428_vm6, %v425_v35, %v427_v37 }
  0xa7   : > { %497 = vmatprep.subr.bf16.mxu0 %v430_v39  ;;  %v429_v40 = vsel %vm428_vm6, %v423_v38, %v425_v35  ;;  %542 = vmatprep.subr.bf16.mxu1 %v991_v0  ;;  %vm676_vm6 = vcmp.le.s32.totalorder %v670_v31, 16 }
  0xa8   : > { %498 = vmatpush1.bf16.msra.mxu0 %v429_v40  ;;  %vm1128_vm10 = vmand %vm673_vm5, %vm676_vm6 }
  0xa9   : > { %v437_v41 = vpop.permute.xlu0 %436 }
  0xaa   : > { %v439_v42 = vpop.permute.xlu1 %438 }
  0xab   : > { %v442_v43 = vsel %vm440_vm7, %v437_v41, %v439_v42  ;;  %543 = vmatpush1.bf16.msra.mxu1 %v439_v42 }
  0xac   : > { %499 = vmatprep.subr.bf16.mxu0 %v442_v43  ;;  %544 = vmatprep.subr.bf16.mxu1 %v991_v0 }
  0xad   : > { %v435_v44 = vpop.permute.xlu0 %434 }
  0xae   : > { %v449_v45 = vpop.permute.xlu1 %448  ;;  %v441_v46 = vsel %vm440_vm7, %v435_v44, %v437_v41  ;;  %vm674_vm7 = vcmp.ge.s32.totalorder %v671_v32, 1 }
  0xaf   : > { %500 = vmatpush1.bf16.msra.mxu0 %v441_v46  ;;  %vm680_vm11 = vmand %vm674_vm7, %vm677_vm9 }
  0xb1   : > { %v451_v47 = vpop.permute.xlu0 %450 }
  0xb2   : > { %v447_v49 = vpop.permute.xlu1 %446  ;;  %545 = vmatpush1.bf16.msra.mxu1 %v451_v47  ;;  %v454_v50 = vsel %vm452_vm8, %v449_v45, %v451_v47 }
  0xb3   : > { %501 = vmatprep.subr.bf16.mxu0 %v454_v50  ;;  %v453_v51 = vsel %vm452_vm8, %v447_v49, %v449_v45  ;;  %vm1123_vm8 = vmand %vm672_vm3, %vm675_vm4 }
  0xb4   : > { %502 = vmatpush1.bf16.msra.mxu0 %v453_v51 }
  0xb5   : > { %561 = vmatmul.mubr.bf16.vlgmr.msra.gmra.mrb[0].mxu1 %v964_v48 }
  0xb7   : > { %518 = vmatmul.mubr.bf16.vlgmr.msra.gmra.mrb[0].mxu0 %v964_v48 }
  0xc2   : > { %v465_v14 = vpop.permute.xlu0 %464 }
  0xc3   : > { %v470_v11 = vpop.permute.xlu1 %469 }
  0xc6   : > { %v591_v38 = vpop.permute.xlu0 %590 }
  0xc7   : > { %v586_v28 = vpop.permute.xlu1 %585 }
  0xca   : > { %v609_v57 = vpop.permute.xlu0 %608 }
  0xcb   : > { %v604_v51 = vpop.permute.xlu1 %603 }
 0x188   : > { %v562_v15 = vpop.f32.mrb[0].mxu1 }
 0x189   : > { %v563_v18 = vadd.f32 %v562_v15, %v465_v14  ;;  %v564_v19 = vpop.f32.mrb[1].mxu1 }
 0x18a   : > { %v519_v20 = vpop.f32.mrb[0].mxu0  ;;  %v565_v21 = vpop.f32.mrb[2].mxu1 }
 0x18b   : > { %v571_v22 = vmul.f32 0.2, %v563_v18  ;;  %v520_v23 = vadd.f32 %v519_v20, %v465_v14  ;;  %v566_v24 = vadd.f32 %v565_v21, %v470_v11  ;;  %v521_v25 = vpop.f32.mrb[1].mxu0  ;;  %v567_v26 = vpop.f32.mrb[3].mxu1 }
 0x18c   : > { %v522_v29 = vadd.f32 %v521_v25, %v465_v14  ;;  %v523_v30 = vpop.f32.mrb[2].mxu0 }
 0x18d   : > { %v577_v33 = vmax.f32 %v563_v18, %v571_v22  ;;  %v569_v34 = vmul.f32 0.2, %v520_v23  ;;  %v574_v35 = vmul.f32 0.2, %v566_v24  ;;  %v524_v36 = vadd.f32 %v523_v30, %v470_v11  ;;  %v525_v37 = vpop.f32.mrb[3].mxu0 }
 0x18e   : > { %v570_v39 = vmul.f32 0.2, %v522_v29  ;;  %v526_v40 = vadd.f32 %v525_v37, %v470_v11 }
 0x18f   : > { %v575_v41 = vmax.f32 %v520_v23, %v569_v34  ;;  %v580_v42 = vmax.f32 %v566_v24, %v574_v35  ;;  %v572_v43 = vmul.f32 0.2, %v524_v36  ;;  %v595_v44 = vmul.f32 %v586_v28, %v577_v33 }
 0x190   : > { %v576_v45 = vmax.f32 %v522_v29, %v570_v39  ;;  %v573_v46 = vmul.f32 0.2, %v526_v40 }
 0x191   : > { %v593_v47 = vmul.f32 %v586_v28, %v575_v41  ;;  %v578_v48 = vmax.f32 %v524_v36, %v572_v43  ;;  %v598_v49 = vmul.f32 %v591_v38, %v580_v42  ;;  %v613_v59 = vadd.f32 %v604_v51, %v595_v44 }
 0x192   : > { %v594_v50 = vmul.f32 %v586_v28, %v576_v45  ;;  %v579_v52 = vmax.f32 %v526_v40, %v573_v46 }
 0x193   : > { %v596_v54 = vmul.f32 %v591_v38, %v578_v48  ;;  %v611_v55 = vadd.f32 %v604_v51, %v593_v47  ;;  %v616_v63 = vadd.f32 %v609_v57, %v598_v49  ;;  %v689_v6 = vsel %vm680_vm11, %v613_v59, 0.0 }
 0x194   : > { %v612_v58 = vadd.f32 %v604_v51, %v594_v50  ;;  %v597_v60 = vmul.f32 %v591_v38, %v579_v52  ;;  %v914_v9 = vpack.c.bf16 %v689_v6, %v689_v6 }
 0x195   : > { %v614_v61 = vadd.f32 %v609_v57, %v596_v54  ;;  %v687_v62 = vsel %vm1123_vm8, %v611_v55, 0.0  ;;  %v692_v8 = vsel %vm680_vm11, %v616_v63, 0.0 }
 0x196   : > { %v615_v1 = vadd.f32 %v609_v57, %v597_v60  ;;  %v688_v2 = vsel %vm1128_vm10, %v612_v58, 0.0  ;;  %v916_v10 = vpack.c.bf16 %v692_v8, %v692_v8 }
 0x197   : > { %v913_v3 = vpack.c.bf16 %v688_v2, %v687_v62  ;;  %v690_v4 = vsel %vm1123_vm8, %v614_v61, 0.0 }
 0x198   : > { %v691_v5 = vsel %vm1128_vm10, %v615_v1, 0.0 }
 0x199   : > { %712 = vrot.lane.b32.xlu1 %v913_v3, %s1000_s18  ;;  %v915_v7 = vpack.c.bf16 %v691_v5, %v690_v4 }
 0x19b   : > { %716 = vrot.lane.b32.xlu0 %v915_v7, %s1000_s18 }
 0x19d   : > { %714 = vrot.lane.b32.xlu1 %v914_v9, %s1000_s18 }
 0x19f   : > { %718 = vrot.lane.b32.xlu0 %v916_v10, %s1000_s18 }
 0x20b   : > { %v713_v11 = vpop.permute.xlu1 %712 }
 0x20c   : > { %v720_v12 = vrot.slane %v713_v11, 4 }
 0x20d   : > { %v717_v13 = vpop.permute.xlu0 %716 }
 0x20e   : > { %v723_v14 = vsel %vm722_vm14, %v720_v12, %v713_v11  ;;  %v721_v15 = vrot.slane %v717_v13, 4 }
 0x20f   : > { %734 = vst.msk [vmem:[%s1097_s7] sm:$0xff] %vm733_vm15, %v723_v14  ;;  %v715_v16 = vpop.permute.xlu1 %714 }
 0x210   : > { %v725_v17 = vsel %vm722_vm14, %v721_v15, %v717_v13  ;;  %v724_v18 = vsel %vm722_vm14, %v720_v12, %v715_v16 }
 0x211   : > { %737 = vst.msk [vmem:[%s1097_s7 + $0xc] sm:$0xff] %vm733_vm15, %v725_v17  ;;  %v719_v19 = vpop.permute.xlu0 %718 }
 0x212   : > { %736 = vst.msk [vmem:[%s1097_s7 + $0x8] sm:$0xf] %vm735_vm0, %v724_v18  ;;  %v726_v20 = vsel %vm722_vm14, %v721_v15, %v719_v19 }
 0x213   : > { %740 = vst.msk [vmem:[%s1097_s7 + $0x8] sm:$0xf] %vm739_vm1, %v991_v0 }
 0x214   : > { %738 = vst.msk [vmem:[%s1097_s7 + $0x14] sm:$0xf] %vm735_vm0, %v726_v20 }
 0x215   : > { %741 = vst.msk [vmem:[%s1097_s7 + $0x14] sm:$0xf] %vm739_vm1, %v991_v0 }
 0x216 PF: > { %s15_s20 = sadd.s32 1, %s989_s20   ;;  %s1174_s18 = smov %s985_s19 }
 0x217   : > { %p12_p5 = scmp.ge.s32.totalorder %s15_s20, 4   ;;  %s1175_s19 = smov %s1177_s21 }
 0x219   :  { %14 = sbr.rel (!%p12_p5) target bundleno = 2 (0x2), region = 82 }

// kernel: vanilla_ae_forward_pallas.15
= control target key start
LH: loop header
LB: loop body
LE: loop exit
PB: predicated region body
PF: predicated region fallthrough
CT: control target
= control target key end

     0   :  { %s505_s9 = smov 0   ;;  %s770_s0 = inlined_call_operand.vmem [shape: bf16[2,128,16], index: 0, kind: input, shape index: {}]   ;;  %s771_s1 = inlined_call_operand.vmem [shape: bf16[2,128,16], index: 1, kind: input, shape index: {}]   ;;  %s772_s2 = inlined_call_operand.vmem [shape: bf16[2,128,8], index: 2, kind: output, shape index: {}]  }
   0x1 LB: > { %s456_s10 = sadd.s32 4294967295, %s487_s9   ;;  %p460_p0 = scmp.ge.s32.totalorder %s487_s9, 1  ;;  %s487_s9 = sphi %s505_s9, %s12_s9  }
   0x2   : > { %p122_p1 = scmp.lt.s32.totalorder %s487_s9, 3 }
   0x4   : > { %p123_p2 = pnand %p460_p0, %p122_p1 }
   0x5   : > { %p149_p3 = scmp.lt.s32.totalorder (!%p123_p2), %s456_s10, 1  ;;  %s489_s15 = smov (!%p123_p2), 120   ;;  %vm372_vm0 = vcmask (!%p123_p2), 60416  }
   0x6   : > { %126 = sbr.rel (%p123_p2) target bundleno = 197 (0xc5), region = 28 }
   0xd   : > { %s774_s10 = smov (!%p149_p3, %s456_s10), 1 }
   0xe   : > { %s513_s11 = sshll.u32 %s774_s10, 6 }
   0xf   : > { %s519_s14 = scalar_lea.vmem %s770_s0, %s513_s11  ;;  %s601_s18 = scalar_lea.vmem %s771_s1, %s513_s11 }
  0x10   : > { %v522_v0 = vld [vmem:[%s519_s14 + $0x8] sm:$0xf]  ;;  %v525_v1 = vld [vmem:[%s519_s14] sm:$0xf]  ;;  %v532_v2 = vld [vmem:[%s519_s14 + $0xc] sm:$0xf]  ;;  %s699_s21 = scalar_lea.vmem %s772_s2, %s513_s11 }
  0x11   : > { %200 = vrot.lane.b32.xlu1 %v522_v0, %s489_s15  ;;  %196 = vrot.lane.b32.xlu0 %v525_v1, %s489_s15  ;;  %v535_v3 = vld [vmem:[%s519_s14 + $0x4] sm:$0xf]  ;;  %v542_v4 = vld [vmem:[%s519_s14 + $0x14] sm:$0xf] }
  0x12   : > { %v545_v5 = vld [vmem:[%s519_s14 + $0x10] sm:$0xf]  ;;  %v552_v6 = vld [vmem:[%s519_s14 + $0x1c] sm:$0xf]  ;;  %v555_v7 = vld [vmem:[%s519_s14 + $0x18] sm:$0xf] }
  0x13   : > { %v562_v8 = vld [vmem:[%s519_s14 + $0x24] sm:$0xf]  ;;  %v565_v9 = vld [vmem:[%s519_s14 + $0x20] sm:$0xf]  ;;  %v572_v10 = vld [vmem:[%s519_s14 + $0x2c] sm:$0xf] }
  0x14   : > { %v575_v11 = vld [vmem:[%s519_s14 + $0x28] sm:$0xf]  ;;  %v582_v12 = vld [vmem:[%s519_s14 + $0x34] sm:$0xf]  ;;  %v585_v13 = vld [vmem:[%s519_s14 + $0x30] sm:$0xf] }
  0x15   : > { %202 = vrot.lane.b32.xlu1 %v532_v2, %s489_s15  ;;  %198 = vrot.lane.b32.xlu0 %v535_v3, %s489_s15  ;;  %v592_v14 = vld [vmem:[%s519_s14 + $0x3c] sm:$0xf]  ;;  %v595_v15 = vld [vmem:[%s519_s14 + $0x38] sm:$0xf] }
  0x16   : > { %v261_v16 = vld [vmem:[%s601_s18 + $0x4] sm:$0xf]  ;;  %v260_v17 = vld [vmem:[%s601_s18] sm:$0xf]  ;;  %v612_v18 = vld [vmem:[%s601_s18 + $0xc] sm:$0xf] }
  0x17   : > { %v615_v19 = vld [vmem:[%s601_s18 + $0x8] sm:$0xf]  ;;  %v622_v20 = vld [vmem:[%s601_s18 + $0x14] sm:$0xf]  ;;  %v625_v21 = vld [vmem:[%s601_s18 + $0x10] sm:$0xf] }
  0x18   : > { %v632_v22 = vld [vmem:[%s601_s18 + $0x1c] sm:$0xf]  ;;  %v635_v23 = vld [vmem:[%s601_s18 + $0x18] sm:$0xf]  ;;  %v642_v24 = vld [vmem:[%s601_s18 + $0x24] sm:$0xf] }
  0x19   : > { %206 = vrot.lane.b32.xlu1 %v542_v4, %s489_s15  ;;  %204 = vrot.lane.b32.xlu0 %v545_v5, %s489_s15  ;;  %v645_v25 = vld [vmem:[%s601_s18 + $0x20] sm:$0xf]  ;;  %v652_v26 = vld [vmem:[%s601_s18 + $0x2c] sm:$0xf] }
  0x1a   : > { %v655_v27 = vld [vmem:[%s601_s18 + $0x28] sm:$0xf]  ;;  %v662_v28 = vld [vmem:[%s601_s18 + $0x34] sm:$0xf]  ;;  %v665_v29 = vld [vmem:[%s601_s18 + $0x30] sm:$0xf] }
  0x1b   : > { %v672_v30 = vld [vmem:[%s601_s18 + $0x3c] sm:$0xf]  ;;  %v675_v31 = vld [vmem:[%s601_s18 + $0x38] sm:$0xf] }
  0x1d   : > { %210 = vrot.lane.b32.xlu1 %v552_v6, %s489_s15  ;;  %208 = vrot.lane.b32.xlu0 %v555_v7, %s489_s15 }
  0x21   : > { %214 = vrot.lane.b32.xlu1 %v562_v8, %s489_s15  ;;  %212 = vrot.lane.b32.xlu0 %v565_v9, %s489_s15 }
  0x25   : > { %218 = vrot.lane.b32.xlu1 %v572_v10, %s489_s15  ;;  %216 = vrot.lane.b32.xlu0 %v575_v11, %s489_s15 }
  0x29   : > { %222 = vrot.lane.b32.xlu1 %v582_v12, %s489_s15  ;;  %220 = vrot.lane.b32.xlu0 %v585_v13, %s489_s15 }
  0x2d   : > { %226 = vrot.lane.b32.xlu1 %v592_v14, %s489_s15  ;;  %224 = vrot.lane.b32.xlu0 %v595_v15, %s489_s15 }
  0x31   : > { %294 = vrot.lane.b32.xlu1 %v261_v16, %s489_s15  ;;  %292 = vrot.lane.b32.xlu0 %v260_v17, %s489_s15 }
  0x35   : > { %298 = vrot.lane.b32.xlu1 %v612_v18, %s489_s15  ;;  %296 = vrot.lane.b32.xlu0 %v615_v19, %s489_s15 }
  0x39   : > { %302 = vrot.lane.b32.xlu1 %v622_v20, %s489_s15  ;;  %300 = vrot.lane.b32.xlu0 %v625_v21, %s489_s15 }
  0x3d   : > { %306 = vrot.lane.b32.xlu1 %v632_v22, %s489_s15  ;;  %304 = vrot.lane.b32.xlu0 %v635_v23, %s489_s15 }
  0x41   : > { %310 = vrot.lane.b32.xlu1 %v642_v24, %s489_s15  ;;  %308 = vrot.lane.b32.xlu0 %v645_v25, %s489_s15 }
  0x45   : > { %314 = vrot.lane.b32.xlu1 %v652_v26, %s489_s15  ;;  %312 = vrot.lane.b32.xlu0 %v655_v27, %s489_s15 }
  0x49   : > { %318 = vrot.lane.b32.xlu1 %v662_v28, %s489_s15  ;;  %316 = vrot.lane.b32.xlu0 %v665_v29, %s489_s15 }
  0x4d   : > { %322 = vrot.lane.b32.xlu1 %v672_v30, %s489_s15  ;;  %320 = vrot.lane.b32.xlu0 %v675_v31, %s489_s15 }
  0x83   : > { %v201_v32 = vpop.permute.xlu1 %200  ;;  %v197_v33 = vpop.permute.xlu0 %196 }
  0x84   : > { %v244_v50 = vmax.bf16 %v197_v33, %v525_v1  ;;  %v246_v58 = vmax.bf16 %v201_v32, %v522_v0 }
  0x87   : > { %v203_v34 = vpop.permute.xlu1 %202  ;;  %v199_v35 = vpop.permute.xlu0 %198 }
  0x88   : > { %v245_v51 = vmax.bf16 %v199_v35, %v535_v3  ;;  %v247_v59 = vmax.bf16 %v203_v34, %v532_v2 }
  0x8b   : > { %v207_v36 = vpop.permute.xlu1 %206  ;;  %v205_v37 = vpop.permute.xlu0 %204 }
  0x8c   : > { %v248_v0 = vmax.bf16 %v205_v37, %v545_v5 }
  0x8f   : > { %v211_v38 = vpop.permute.xlu1 %210  ;;  %v209_v39 = vpop.permute.xlu0 %208 }
  0x90   : > { %v251_v34 = vmax.bf16 %v211_v38, %v552_v6 }
  0x93   : > { %v215_v40 = vpop.permute.xlu1 %214  ;;  %v213_v41 = vpop.permute.xlu0 %212 }
  0x94   : > { %v252_v6 = vmax.bf16 %v213_v41, %v565_v9 }
  0x97   : > { %v681_v42 = vpop.permute.xlu1 %218  ;;  %v683_v43 = vpop.permute.xlu0 %216 }
  0x9b   : > { %v685_v44 = vpop.permute.xlu1 %222  ;;  %v687_v45 = vpop.permute.xlu0 %220 }
  0x9f   : > { %v689_v46 = vpop.permute.xlu1 %226  ;;  %v691_v47 = vpop.permute.xlu0 %224 }
  0xa3   : > { %v295_v48 = vpop.permute.xlu1 %294  ;;  %v293_v49 = vpop.permute.xlu0 %292 }
  0xa4   : > { %v341_v52 = vmax.bf16 %v295_v48, %v261_v16  ;;  %v340_v53 = vmax.bf16 %v293_v49, %v260_v17  ;;  %v249_v16 = vmax.bf16 %v207_v36, %v542_v4  ;;  %v250_v4 = vmax.bf16 %v209_v39, %v555_v7 }
  0xa5   : > { %v253_v48 = vmax.bf16 %v215_v40, %v562_v8  ;;  %v254_v8 = vmax.bf16 %v683_v43, %v575_v11  ;;  %v256_v11 = vmax.bf16 %v687_v45, %v585_v13  ;;  %v258_v13 = vmax.bf16 %v691_v47, %v595_v15 }
  0xa6   : > { %v357_v54 = vmax.bf16 %v341_v52, %v245_v51  ;;  %v356_v55 = vmax.bf16 %v340_v53, %v244_v50  ;;  %v255_v50 = vmax.bf16 %v681_v42, %v572_v10  ;;  %v257_v10 = vmax.bf16 %v685_v44, %v582_v12 }
  0xa7   : > { %v299_v56 = vpop.permute.xlu1 %298  ;;  %v297_v57 = vpop.permute.xlu0 %296  ;;  %v259_v12 = vmax.bf16 %v689_v46, %v592_v14 }
  0xa8   : > { %374 = vst.msk [vmem:[%s699_s21 + $0x4] sm:$0xf] %vm372_vm0, %v357_v54  ;;  %373 = vst.msk [vmem:[%s699_s21] sm:$0xf] %vm372_vm0, %v356_v55  ;;  %v343_v60 = vmax.bf16 %v299_v56, %v612_v18  ;;  %v342_v61 = vmax.bf16 %v297_v57, %v615_v19 }
  0xaa   : > { %v359_v62 = vmax.bf16 %v343_v60, %v247_v59  ;;  %v358_v63 = vmax.bf16 %v342_v61, %v246_v58 }
  0xab   : > { %v303_v1 = vpop.permute.xlu1 %302  ;;  %v301_v3 = vpop.permute.xlu0 %300 }
  0xac   : > { %376 = vst.msk [vmem:[%s699_s21 + $0xc] sm:$0xf] %vm372_vm0, %v359_v62  ;;  %375 = vst.msk [vmem:[%s699_s21 + $0x8] sm:$0xf] %vm372_vm0, %v358_v63  ;;  %v345_v2 = vmax.bf16 %v303_v1, %v622_v20  ;;  %v344_v17 = vmax.bf16 %v301_v3, %v625_v21 }
  0xae   : > { %v361_v18 = vmax.bf16 %v345_v2, %v249_v16  ;;  %v360_v19 = vmax.bf16 %v344_v17, %v248_v0 }
  0xaf   : > { %v307_v32 = vpop.permute.xlu1 %306  ;;  %v305_v33 = vpop.permute.xlu0 %304 }
  0xb0   : > { %378 = vst.msk [vmem:[%s699_s21 + $0x14] sm:$0xf] %vm372_vm0, %v361_v18  ;;  %377 = vst.msk [vmem:[%s699_s21 + $0x10] sm:$0xf] %vm372_vm0, %v360_v19  ;;  %v347_v5 = vmax.bf16 %v307_v32, %v632_v22  ;;  %v346_v20 = vmax.bf16 %v305_v33, %v635_v23 }
  0xb2   : > { %v363_v35 = vmax.bf16 %v347_v5, %v251_v34  ;;  %v362_v21 = vmax.bf16 %v346_v20, %v250_v4 }
  0xb3   : > { %v311_v36 = vpop.permute.xlu1 %310  ;;  %v309_v37 = vpop.permute.xlu0 %308 }
  0xb4   : > { %380 = vst.msk [vmem:[%s699_s21 + $0x1c] sm:$0xf] %vm372_vm0, %v363_v35  ;;  %379 = vst.msk [vmem:[%s699_s21 + $0x18] sm:$0xf] %vm372_vm0, %v362_v21  ;;  %v349_v7 = vmax.bf16 %v311_v36, %v642_v24  ;;  %v348_v22 = vmax.bf16 %v309_v37, %v645_v25 }
  0xb6   : > { %v365_v38 = vmax.bf16 %v349_v7, %v253_v48  ;;  %v364_v23 = vmax.bf16 %v348_v22, %v252_v6 }
  0xb7   : > { %v315_v39 = vpop.permute.xlu1 %314  ;;  %v313_v49 = vpop.permute.xlu0 %312 }
  0xb8   : > { %382 = vst.msk [vmem:[%s699_s21 + $0x24] sm:$0xf] %vm372_vm0, %v365_v38  ;;  %381 = vst.msk [vmem:[%s699_s21 + $0x20] sm:$0xf] %vm372_vm0, %v364_v23  ;;  %v351_v9 = vmax.bf16 %v315_v39, %v652_v26  ;;  %v350_v24 = vmax.bf16 %v313_v49, %v655_v27 }
  0xba   : > { %v367_v25 = vmax.bf16 %v351_v9, %v255_v50  ;;  %v366_v40 = vmax.bf16 %v350_v24, %v254_v8 }
  0xbb   : > { %v319_v41 = vpop.permute.xlu1 %318  ;;  %v317_v51 = vpop.permute.xlu0 %316 }
  0xbc   : > { %384 = vst.msk [vmem:[%s699_s21 + $0x2c] sm:$0xf] %vm372_vm0, %v367_v25  ;;  %383 = vst.msk [vmem:[%s699_s21 + $0x28] sm:$0xf] %vm372_vm0, %v366_v40  ;;  %v353_v26 = vmax.bf16 %v319_v41, %v662_v28  ;;  %v352_v27 = vmax.bf16 %v317_v51, %v665_v29 }
  0xbe   : > { %v369_v42 = vmax.bf16 %v353_v26, %v257_v10  ;;  %v368_v43 = vmax.bf16 %v352_v27, %v256_v11 }
  0xbf   : > { %v323_v52 = vpop.permute.xlu1 %322  ;;  %v321_v53 = vpop.permute.xlu0 %320 }
  0xc0   : > { %386 = vst.msk [vmem:[%s699_s21 + $0x34] sm:$0xf] %vm372_vm0, %v369_v42  ;;  %385 = vst.msk [vmem:[%s699_s21 + $0x30] sm:$0xf] %vm372_vm0, %v368_v43  ;;  %v355_v44 = vmax.bf16 %v323_v52, %v672_v30  ;;  %v354_v28 = vmax.bf16 %v321_v53, %v675_v31 }
  0xc2   : > { %v371_v45 = vmax.bf16 %v355_v44, %v259_v12  ;;  %v370_v29 = vmax.bf16 %v354_v28, %v258_v13 }
  0xc4   : > { %388 = vst.msk [vmem:[%s699_s21 + $0x3c] sm:$0xf] %vm372_vm0, %v371_v45  ;;  %387 = vst.msk [vmem:[%s699_s21 + $0x38] sm:$0xf] %vm372_vm0, %v370_v29 }
  0xc5 PF: > { %s12_s9 = sadd.s32 1, %s487_s9  }
  0xc6   : > { %p9_p4 = scmp.ge.s32.totalorder %s12_s9, 4  }
  0xc8   :  { %11 = sbr.rel (!%p9_p4) target bundleno = 1 (0x1), region = 61 }

// kernel: vanilla_ae_forward_pallas.16
= control target key start
LH: loop header
LB: loop body
LE: loop exit
PB: predicated region body
PF: predicated region fallthrough
CT: control target
= control target key end

     0   :  { %s905_s18 = smov 0   ;;  %s907_s19 = smov 0   ;;  %s1036_s0 = inlined_call_operand.vmem [shape: bf16[2,16,100], index: 0, kind: input, shape index: {}]   ;;  %s1037_s1 = inlined_call_operand.vmem [shape: bf16[32,144], index: 1, kind: input, shape index: {}]   ;;  %s1038_s2 = inlined_call_operand.vmem [shape: f32[32,1], index: 2, kind: input, shape index: {}]   ;;  %s1039_s3 = inlined_call_operand.vmem [shape: f32[32,1], index: 3, kind: input, shape index: {}]   ;;  %s1040_s4 = inlined_call_operand.vmem [shape: f32[32,1], index: 4, kind: input, shape index: {}]   ;;  %s1041_s5 = inlined_call_operand.vmem [shape: bf16[2,32,100], index: 5, kind: output, shape index: {}]  }
   0x1   :  { %s909_s20 = smov 0  }
   0x2 LB: > { %s27_s21 = sadd.s32 1, %s859_s19  ;;  %p754_p0 = scmp.ge.s32.totalorder %s863_s20, 1  ;;  %s863_s20 = sphi %s909_s20, %s15_s20   ;;  %s859_s19 = sphi %s907_s19, %s1043_s19   ;;  %s855_s18 = sphi %s905_s18, %s1042_s18  }
   0x3   : > { %p29_p1 = scmp.ge.s32.totalorder %s27_s21, 2  ;;  %p246_p2 = scmp.lt.s32.totalorder %s863_s20, 3 }
   0x5   : > { %s1045_s21 = smov (%p29_p1, %s27_s21), 0  ;;  %p247_p3 = pnand %p754_p0, %p246_p2 }
   0x6   : > { %p299_p4 = scmp.lt.s32.totalorder (!%p247_p3), %s855_s18, 1  ;;  %v865_v0 = vmov (!%p247_p3), 0   ;;  %s866_s26 = smov (!%p247_p3), 127   ;;  %v837_v2 = vld [vmem:[%s1037_s1 + $0x4] ss:$8 sps:$4 sm:$0xff] (!%p247_p3)   ;;  %vm418_vm0 = vcmask (!%p247_p3), 130048   ;;  %v538_v26 = vlaneseq (!%p247_p3) }
   0x7   : > { %250 = sbr.rel (%p247_p3) target bundleno = 512 (0x200), region = 40  ;;  %425 = vmatprep.subr.bf16.mxu0 (!%p247_p3), %v865_v0  ;;  %778 = vmatprep.subr.bf16.mxu1 (!%p247_p3), %v865_v0  ;;  %s867_s27 = smov (!%p247_p3), 118   ;;  %v840_v3 = vld [vmem:[%s1037_s1 + $0x14] ss:$8 sps:$4 sm:$0xff] (!%p247_p3)   ;;  %v377_v4 = vld [vmem:[%s1038_s2 + $0x8] sm:$0xff] (!%p247_p3)  ;;  %v376_v5 = vld [vmem:[%s1038_s2] sm:$0xff] (!%p247_p3) }
   0x8   : > { %833 = vset.pattern.permute.xlu1 (!%p247_p3), %v865_v0  ;;  %832 = vset.pattern.permute.xlu0 (!%p247_p3), %v865_v0  ;;  %s868_s28 = smov (!%p247_p3), 126   ;;  %s869_s29 = smov (!%p247_p3), 117   ;;  %v378_v6 = vld [vmem:[%s1038_s2 + $0x10] sm:$0xff] (!%p247_p3)  ;;  %v379_v7 = vld [vmem:[%s1038_s2 + $0x18] sm:$0xff] (!%p247_p3)  ;;  %v482_v8 = vld [vmem:[%s1039_s3] sm:$0xff] (!%p247_p3)  ;;  %vm566_vm1 = vcmask (!%p247_p3), 84992  }
   0x9   : > { %s870_s30 = smov (!%p247_p3), 116   ;;  %s871_s6 = smov (!%p247_p3), 108   ;;  %764 = vmatprep.mubr.msk.bf16.mxu0 (!%p247_p3), %vm418_vm0, %v837_v2  ;;  %765 = vmatprep.mubr.msk.bf16.mxu1 (!%p247_p3), %vm418_vm0, %v840_v3  ;;  %v483_v9 = vld [vmem:[%s1039_s3 + $0x8] sm:$0xff] (!%p247_p3)  ;;  %v484_v10 = vld [vmem:[%s1039_s3 + $0x10] sm:$0xff] (!%p247_p3)  ;;  %v485_v11 = vld [vmem:[%s1039_s3 + $0x18] sm:$0xff] (!%p247_p3)  ;;  %v539_v27 = vand.u32 (!%p247_p3), 127, %v538_v26 }
   0xa   : > { %s872_s7 = smov (!%p247_p3), 107   ;;  %s873_s8 = smov (!%p247_p3), 106   ;;  %v510_v12 = vld [vmem:[%s1040_s4] sm:$0xff] (!%p247_p3)  ;;  %v511_v13 = vld [vmem:[%s1040_s4 + $0x8] sm:$0xff] (!%p247_p3)  ;;  %v512_v14 = vld [vmem:[%s1040_s4 + $0x10] sm:$0xff] (!%p247_p3)  ;;  %vm595_vm8 = vcmask (!%p247_p3), 724056  }
   0xb   : > { %v513_v15 = vld [vmem:[%s1040_s4 + $0x18] sm:$0xff] (!%p247_p3)  ;;  %v835_v24 = vld [vmem:[%s1037_s1] ss:$8 sps:$4 sm:$0xff] (!%p247_p3)   ;;  %v540_v28 = vadd.s32 (!%p247_p3), 1, %v539_v27  ;;  %vm600_vm9 = vcmask (!%p247_p3), 814792  }
   0xc   : > { %v838_v25 = vld [vmem:[%s1037_s1 + $0x10] ss:$8 sps:$4 sm:$0xff] (!%p247_p3)  }
   0xd   : > { %v1011_v30 = vmul.u32.u64.low (!%p247_p3), 3435973837, %v540_v28  ;;  %v1012_v31 = vmul.u32.u64.high 3435973837, %v540_v28, %v1011_v30 }
   0xe   : > { %s1047_s18 = smov (!%p299_p4, %s855_s18), 1 }
   0xf   : > { %s772_s22 = sshll.u32 %s1047_s18, 3  ;;  %s773_s24 = sshll.u32 %s1047_s18, 4  ;;  %v547_v34 = vshrl.u32 %v1012_v31, 3 }
  0x10   : > { %s303_s25 = scalar_lea.vmem %s1036_s0, %s772_s22  ;;  %s874_s18 = smov 11  }
  0x11   : > { %v834_v1 = vld [vmem:[%s303_s25] sm:$0xff]   ;;  %v548_v37 = vmul.u32 10, %v547_v34 }
  0x12   : > { %348 = vrot.lane.b32.xlu0 %v834_v1, %s866_s26  ;;  %354 = vrot.lane.b32.xlu1 %v834_v1, %s867_s27  ;;  %s1001_s27 = scalar_lea.vmem %s1041_s5, %s773_s24 }
  0x13   : > { %426 = vmatpush1.bf16.msra.mxu0 %v834_v1  ;;  %787 = vmatpush1.bf16.msra.mxu1 %v834_v1  ;;  %567 = vst.msk [vmem:[%s1001_s27] sm:$0xf] %vm566_vm1, %v865_v0  ;;  %568 = vst.msk [vmem:[%s1001_s27 + $0x4] sm:$0xf] %vm566_vm1, %v865_v0  ;;  %v549_v38 = vsub.s32 %v540_v28, %v548_v37 }
  0x14   : > { %427 = vmatprep.subr.bf16.mxu0 %v865_v0  ;;  %779 = vmatprep.subr.bf16.mxu1 %v865_v0  ;;  %569 = vst.msk [vmem:[%s1001_s27 + $0x8] sm:$0xf] %vm566_vm1, %v865_v0  ;;  %570 = vst.msk [vmem:[%s1001_s27 + $0xc] sm:$0xf] %vm566_vm1, %v865_v0 }
  0x15   : > { %vm552_vm2 = vcmp.ne.s32.totalorder %v549_v38, 0  ;;  %vm553_vm3 = vcmp.lt.s32.totalorder %v549_v38, 0  ;;  %v555_v41 = vadd.s32 10, %v549_v38 }
  0x16   : > { %351 = vrot.lane.b32.xlu0 %v834_v1, %s868_s28  ;;  %357 = vrot.lane.b32.xlu1 %v834_v1, %s869_s29  ;;  %vm554_vm4 = vmand %vm553_vm3, %vm552_vm2 }
  0x17   : > { %v556_v50 = vsel %vm554_vm4, %v555_v41, %v549_v38 }
  0x18   : > { %vm557_vm5 = vcmp.ge.s32.totalorder %v556_v50, 1  ;;  %vm558_vm6 = vcmp.le.s32.totalorder %v556_v50, 8 }
  0x19   : > { %vm559_vm7 = vmand %vm557_vm5, %vm558_vm6 }
  0x1a   : > { %360 = vrot.lane.b32.xlu0 %v834_v1, %s870_s30  ;;  %363 = vrot.lane.b32.xlu1 %v834_v1, %s871_s6 }
  0x1e   : > { %366 = vrot.lane.b32.xlu0 %v834_v1, %s872_s7  ;;  %369 = vrot.lane.b32.xlu1 %v834_v1, %s873_s8 }
  0x22   : > { %387 = vperm.xlu1 %833, %v377_v4   ;;  %382 = vperm.xlu0 %832, %v376_v5  }
  0x26   : > { %392 = vperm.xlu1 %833, %v378_v6   ;;  %397 = vperm.xlu0 %832, %v379_v7  }
  0x2a   : > { %488 = vperm.xlu1 %833, %v482_v8   ;;  %493 = vperm.xlu0 %832, %v483_v9  }
  0x2e   : > { %498 = vperm.xlu1 %833, %v484_v10   ;;  %503 = vperm.xlu0 %832, %v485_v11  }
  0x32   : > { %516 = vperm.xlu1 %833, %v510_v12   ;;  %521 = vperm.xlu0 %832, %v511_v13  }
  0x36   : > { %526 = vperm.xlu1 %833, %v512_v14   ;;  %531 = vperm.xlu0 %832, %v513_v15  }
  0x84   : > { %v349_v16 = vpop.permute.xlu0 %348  ;;  %v355_v18 = vpop.permute.xlu1 %354 }
  0x85   : > { %428 = vmatpush1.bf16.msra.mxu0 %v349_v16  ;;  %788 = vmatpush1.bf16.msra.mxu1 %v349_v16 }
  0x86   : > { %429 = vmatprep.subr.bf16.mxu0 %v865_v0  ;;  %780 = vmatprep.subr.bf16.mxu1 %v865_v0 }
  0x88   : > { %v352_v17 = vpop.permute.xlu0 %351  ;;  %v358_v19 = vpop.permute.xlu1 %357 }
  0x89   : > { %430 = vmatpush1.bf16.msra.mxu0 %v352_v17  ;;  %789 = vmatpush1.bf16.msra.mxu1 %v352_v17 }
  0x8a   : > { %431 = vmatprep.subr.bf16.mxu0 %v865_v0  ;;  %781 = vmatprep.subr.bf16.mxu1 %v865_v0 }
  0x8c   : > { %v361_v20 = vpop.permute.xlu0 %360  ;;  %v364_v21 = vpop.permute.xlu1 %363 }
  0x8d   : > { %432 = vmatpush1.bf16.msra.mxu0 %v355_v18  ;;  %790 = vmatpush1.bf16.msra.mxu1 %v355_v18 }
  0x8e   : > { %433 = vmatprep.subr.bf16.mxu0 %v865_v0  ;;  %782 = vmatprep.subr.bf16.mxu1 %v865_v0 }
  0x90   : > { %v367_v22 = vpop.permute.xlu0 %366  ;;  %v370_v23 = vpop.permute.xlu1 %369 }
  0x91   : > { %434 = vmatpush1.bf16.msra.mxu0 %v358_v19  ;;  %791 = vmatpush1.bf16.msra.mxu1 %v358_v19 }
  0x92   : > { %435 = vmatprep.subr.bf16.mxu0 %v865_v0  ;;  %783 = vmatprep.subr.bf16.mxu1 %v865_v0 }
  0x95   : > { %436 = vmatpush1.bf16.msra.mxu0 %v361_v20  ;;  %792 = vmatpush1.bf16.msra.mxu1 %v361_v20 }
  0x96   : > { %437 = vmatprep.subr.bf16.mxu0 %v865_v0  ;;  %784 = vmatprep.subr.bf16.mxu1 %v865_v0 }
  0x99   : > { %438 = vmatpush1.bf16.msra.mxu0 %v364_v21  ;;  %793 = vmatpush1.bf16.msra.mxu1 %v364_v21 }
  0x9a   : > { %439 = vmatprep.subr.bf16.mxu0 %v865_v0  ;;  %785 = vmatprep.subr.bf16.mxu1 %v865_v0 }
  0x9d   : > { %440 = vmatpush1.bf16.msra.mxu0 %v367_v22  ;;  %794 = vmatpush1.bf16.msra.mxu1 %v367_v22 }
  0x9e   : > { %441 = vmatprep.subr.bf16.mxu0 %v865_v0  ;;  %786 = vmatprep.subr.bf16.mxu1 %v865_v0 }
  0xa1   : > { %442 = vmatpush1.bf16.msra.mxu0 %v370_v23  ;;  %795 = vmatpush1.bf16.msra.mxu1 %v370_v23  ;;  %v388_v29 = vpop.permute.xlu1 %387  ;;  %v383_v32 = vpop.permute.xlu0 %382 }
  0xa4   : > { %458 = vmatmul.mubr.bf16.vlgmr.msra.gmra.mrb[0].mxu0 %v835_v24  ;;  %466 = vmatmul.mubr.bf16.vlgmr.msra.gmra.mrb[0].mxu1 %v838_v25 }
  0xa5   : > { %v393_v33 = vpop.permute.xlu1 %392  ;;  %v398_v35 = vpop.permute.xlu0 %397 }
  0xa9   : > { %v489_v36 = vpop.permute.xlu1 %488  ;;  %v494_v39 = vpop.permute.xlu0 %493 }
  0xad   : > { %v499_v40 = vpop.permute.xlu1 %498  ;;  %v504_v42 = vpop.permute.xlu0 %503 }
  0xb1   : > { %v517_v43 = vpop.permute.xlu1 %516  ;;  %v522_v59 = vpop.permute.xlu0 %521 }
  0xb5   : > { %v527_v5 = vpop.permute.xlu1 %526  ;;  %v532_v10 = vpop.permute.xlu0 %531 }
 0x177   : > { %v459_v44 = vpop.f32.mrb[0].mxu0  ;;  %v467_v45 = vpop.f32.mrb[0].mxu1 }
 0x178   : > { %v460_v46 = vadd.f32 %v459_v44, %v383_v32  ;;  %v468_v47 = vadd.f32 %v467_v45, %v393_v33  ;;  %v461_v48 = vpop.f32.mrb[1].mxu0  ;;  %v469_v49 = vpop.f32.mrb[1].mxu1 }
 0x179   : > { %v462_v51 = vpop.f32.mrb[2].mxu0  ;;  %v470_v52 = vpop.f32.mrb[2].mxu1 }
 0x17a   : > { %v474_v53 = vmul.f32 0.2, %v460_v46  ;;  %v476_v54 = vmul.f32 0.2, %v468_v47  ;;  %v463_v55 = vadd.f32 %v462_v51, %v388_v29  ;;  %v471_v56 = vadd.f32 %v470_v52, %v398_v35  ;;  %v464_v57 = vpop.f32.mrb[3].mxu0  ;;  %v472_v58 = vpop.f32.mrb[3].mxu1 }
 0x17c   : > { %v478_v60 = vmax.f32 %v460_v46, %v474_v53  ;;  %v480_v61 = vmax.f32 %v468_v47, %v476_v54  ;;  %v475_v62 = vmul.f32 0.2, %v463_v55  ;;  %v477_v63 = vmul.f32 0.2, %v471_v56 }
 0x17e   : > { %v506_v1 = vmul.f32 %v489_v36, %v478_v60  ;;  %v508_v2 = vmul.f32 %v499_v40, %v480_v61  ;;  %v479_v3 = vmax.f32 %v463_v55, %v475_v62  ;;  %v481_v4 = vmax.f32 %v471_v56, %v477_v63 }
 0x180   : > { %v507_v6 = vmul.f32 %v494_v39, %v479_v3  ;;  %v509_v7 = vmul.f32 %v504_v42, %v481_v4  ;;  %v534_v8 = vadd.f32 %v517_v43, %v506_v1  ;;  %v536_v9 = vadd.f32 %v527_v5, %v508_v2 }
 0x182   : > { %v562_v11 = vsel %vm559_vm7, %v534_v8, 0.0  ;;  %v535_v12 = vadd.f32 %v522_v59, %v507_v6  ;;  %v537_v13 = vadd.f32 %v532_v10, %v509_v7  ;;  %v564_v16 = vsel %vm559_vm7, %v536_v9, 0.0 }
 0x183   : > { %v774_v14 = vpack.c.bf16 %v562_v11, %v562_v11  ;;  %v776_v19 = vpack.c.bf16 %v564_v16, %v564_v16 }
 0x184   : > { %v563_v15 = vsel %vm559_vm7, %v535_v12, 0.0  ;;  %v565_v18 = vsel %vm559_vm7, %v537_v13, 0.0 }
 0x185   : > { %583 = vrot.lane.b32.xlu1 %v774_v14, %s874_s18  ;;  %v775_v17 = vpack.c.bf16 %v563_v15, %v563_v15  ;;  %v777_v20 = vpack.c.bf16 %v565_v18, %v565_v18 }
 0x187   : > { %585 = vrot.lane.b32.xlu0 %v775_v17, %s874_s18 }
 0x189   : > { %587 = vrot.lane.b32.xlu1 %v776_v19, %s874_s18 }
 0x18b   : > { %589 = vrot.lane.b32.xlu0 %v777_v20, %s874_s18 }
 0x1f7   : > { %v584_v21 = vpop.permute.xlu1 %583 }
 0x1f8   : > { %596 = vst.msk [vmem:[%s1001_s27] sm:$0xf] %vm595_vm8, %v584_v21 }
 0x1f9   : > { %601 = vst.msk [vmem:[%s1001_s27] sm:$0xf] %vm600_vm9, %v865_v0  ;;  %v586_v22 = vpop.permute.xlu0 %585 }
 0x1fa   : > { %597 = vst.msk [vmem:[%s1001_s27 + $0x4] sm:$0xf] %vm595_vm8, %v586_v22 }
 0x1fb   : > { %602 = vst.msk [vmem:[%s1001_s27 + $0x4] sm:$0xf] %vm600_vm9, %v865_v0  ;;  %v588_v23 = vpop.permute.xlu1 %587 }
 0x1fc   : > { %598 = vst.msk [vmem:[%s1001_s27 + $0x8] sm:$0xf] %vm595_vm8, %v588_v23 }
 0x1fd   : > { %603 = vst.msk [vmem:[%s1001_s27 + $0x8] sm:$0xf] %vm600_vm9, %v865_v0  ;;  %v590_v24 = vpop.permute.xlu0 %589 }
 0x1fe   : > { %599 = vst.msk [vmem:[%s1001_s27 + $0xc] sm:$0xf] %vm595_vm8, %v590_v24 }
 0x1ff   : > { %604 = vst.msk [vmem:[%s1001_s27 + $0xc] sm:$0xf] %vm600_vm9, %v865_v0 }
 0x200 PF: > { %s15_s20 = sadd.s32 1, %s863_s20   ;;  %s1042_s18 = smov %s859_s19 }
 0x201   : > { %p12_p5 = scmp.ge.s32.totalorder %s15_s20, 4   ;;  %s1043_s19 = smov %s1045_s21 }
 0x203   :  { %14 = sbr.rel (!%p12_p5) target bundleno = 2 (0x2), region = 82 }

// kernel: vanilla_ae_forward_pallas.17
= control target key start
LH: loop header
LB: loop body
LE: loop exit
PB: predicated region body
PF: predicated region fallthrough
CT: control target
= control target key end

     0   :  { %s505_s9 = smov 0   ;;  %s770_s0 = inlined_call_operand.vmem [shape: bf16[2,128,8], index: 0, kind: input, shape index: {}]   ;;  %s771_s1 = inlined_call_operand.vmem [shape: bf16[2,128,8], index: 1, kind: input, shape index: {}]   ;;  %s772_s2 = inlined_call_operand.vmem [shape: bf16[2,128,4], index: 2, kind: output, shape index: {}]  }
   0x1 LB: > { %s456_s10 = sadd.s32 4294967295, %s487_s9   ;;  %p460_p0 = scmp.ge.s32.totalorder %s487_s9, 1  ;;  %s487_s9 = sphi %s505_s9, %s12_s9  }
   0x2   : > { %p122_p1 = scmp.lt.s32.totalorder %s487_s9, 3 }
   0x4   : > { %p123_p2 = pnand %p460_p0, %p122_p1 }
   0x5   : > { %p149_p3 = scmp.lt.s32.totalorder (!%p123_p2), %s456_s10, 1  ;;  %s489_s15 = smov (!%p123_p2), 124   ;;  %vm372_vm0 = vcmask (!%p123_p2), 27648  }
   0x6   : > { %126 = sbr.rel (%p123_p2) target bundleno = 197 (0xc5), region = 28 }
   0xd   : > { %s774_s10 = smov (!%p149_p3, %s456_s10), 1 }
   0xe   : > { %s513_s11 = sshll.u32 %s774_s10, 6 }
   0xf   : > { %s519_s14 = scalar_lea.vmem %s770_s0, %s513_s11  ;;  %s601_s18 = scalar_lea.vmem %s771_s1, %s513_s11 }
  0x10   : > { %v522_v0 = vld [vmem:[%s519_s14 + $0x8] sm:$0xf]  ;;  %v525_v1 = vld [vmem:[%s519_s14] sm:$0xf]  ;;  %v532_v2 = vld [vmem:[%s519_s14 + $0xc] sm:$0xf]  ;;  %s699_s21 = scalar_lea.vmem %s772_s2, %s513_s11 }
  0x11   : > { %200 = vrot.lane.b32.xlu1 %v522_v0, %s489_s15  ;;  %196 = vrot.lane.b32.xlu0 %v525_v1, %s489_s15  ;;  %v535_v3 = vld [vmem:[%s519_s14 + $0x4] sm:$0xf]  ;;  %v542_v4 = vld [vmem:[%s519_s14 + $0x14] sm:$0xf] }
  0x12   : > { %v545_v5 = vld [vmem:[%s519_s14 + $0x10] sm:$0xf]  ;;  %v552_v6 = vld [vmem:[%s519_s14 + $0x1c] sm:$0xf]  ;;  %v555_v7 = vld [vmem:[%s519_s14 + $0x18] sm:$0xf] }
  0x13   : > { %v562_v8 = vld [vmem:[%s519_s14 + $0x24] sm:$0xf]  ;;  %v565_v9 = vld [vmem:[%s519_s14 + $0x20] sm:$0xf]  ;;  %v572_v10 = vld [vmem:[%s519_s14 + $0x2c] sm:$0xf] }
  0x14   : > { %v575_v11 = vld [vmem:[%s519_s14 + $0x28] sm:$0xf]  ;;  %v582_v12 = vld [vmem:[%s519_s14 + $0x34] sm:$0xf]  ;;  %v585_v13 = vld [vmem:[%s519_s14 + $0x30] sm:$0xf] }
  0x15   : > { %202 = vrot.lane.b32.xlu1 %v532_v2, %s489_s15  ;;  %198 = vrot.lane.b32.xlu0 %v535_v3, %s489_s15  ;;  %v592_v14 = vld [vmem:[%s519_s14 + $0x3c] sm:$0xf]  ;;  %v595_v15 = vld [vmem:[%s519_s14 + $0x38] sm:$0xf] }
  0x16   : > { %v261_v16 = vld [vmem:[%s601_s18 + $0x4] sm:$0xf]  ;;  %v260_v17 = vld [vmem:[%s601_s18] sm:$0xf]  ;;  %v612_v18 = vld [vmem:[%s601_s18 + $0xc] sm:$0xf] }
  0x17   : > { %v615_v19 = vld [vmem:[%s601_s18 + $0x8] sm:$0xf]  ;;  %v622_v20 = vld [vmem:[%s601_s18 + $0x14] sm:$0xf]  ;;  %v625_v21 = vld [vmem:[%s601_s18 + $0x10] sm:$0xf] }
  0x18   : > { %v632_v22 = vld [vmem:[%s601_s18 + $0x1c] sm:$0xf]  ;;  %v635_v23 = vld [vmem:[%s601_s18 + $0x18] sm:$0xf]  ;;  %v642_v24 = vld [vmem:[%s601_s18 + $0x24] sm:$0xf] }
  0x19   : > { %206 = vrot.lane.b32.xlu1 %v542_v4, %s489_s15  ;;  %204 = vrot.lane.b32.xlu0 %v545_v5, %s489_s15  ;;  %v645_v25 = vld [vmem:[%s601_s18 + $0x20] sm:$0xf]  ;;  %v652_v26 = vld [vmem:[%s601_s18 + $0x2c] sm:$0xf] }
  0x1a   : > { %v655_v27 = vld [vmem:[%s601_s18 + $0x28] sm:$0xf]  ;;  %v662_v28 = vld [vmem:[%s601_s18 + $0x34] sm:$0xf]  ;;  %v665_v29 = vld [vmem:[%s601_s18 + $0x30] sm:$0xf] }
  0x1b   : > { %v672_v30 = vld [vmem:[%s601_s18 + $0x3c] sm:$0xf]  ;;  %v675_v31 = vld [vmem:[%s601_s18 + $0x38] sm:$0xf] }
  0x1d   : > { %210 = vrot.lane.b32.xlu1 %v552_v6, %s489_s15  ;;  %208 = vrot.lane.b32.xlu0 %v555_v7, %s489_s15 }
  0x21   : > { %214 = vrot.lane.b32.xlu1 %v562_v8, %s489_s15  ;;  %212 = vrot.lane.b32.xlu0 %v565_v9, %s489_s15 }
  0x25   : > { %218 = vrot.lane.b32.xlu1 %v572_v10, %s489_s15  ;;  %216 = vrot.lane.b32.xlu0 %v575_v11, %s489_s15 }
  0x29   : > { %222 = vrot.lane.b32.xlu1 %v582_v12, %s489_s15  ;;  %220 = vrot.lane.b32.xlu0 %v585_v13, %s489_s15 }
  0x2d   : > { %226 = vrot.lane.b32.xlu1 %v592_v14, %s489_s15  ;;  %224 = vrot.lane.b32.xlu0 %v595_v15, %s489_s15 }
  0x31   : > { %294 = vrot.lane.b32.xlu1 %v261_v16, %s489_s15  ;;  %292 = vrot.lane.b32.xlu0 %v260_v17, %s489_s15 }
  0x35   : > { %298 = vrot.lane.b32.xlu1 %v612_v18, %s489_s15  ;;  %296 = vrot.lane.b32.xlu0 %v615_v19, %s489_s15 }
  0x39   : > { %302 = vrot.lane.b32.xlu1 %v622_v20, %s489_s15  ;;  %300 = vrot.lane.b32.xlu0 %v625_v21, %s489_s15 }
  0x3d   : > { %306 = vrot.lane.b32.xlu1 %v632_v22, %s489_s15  ;;  %304 = vrot.lane.b32.xlu0 %v635_v23, %s489_s15 }
  0x41   : > { %310 = vrot.lane.b32.xlu1 %v642_v24, %s489_s15  ;;  %308 = vrot.lane.b32.xlu0 %v645_v25, %s489_s15 }
  0x45   : > { %314 = vrot.lane.b32.xlu1 %v652_v26, %s489_s15  ;;  %312 = vrot.lane.b32.xlu0 %v655_v27, %s489_s15 }
  0x49   : > { %318 = vrot.lane.b32.xlu1 %v662_v28, %s489_s15  ;;  %316 = vrot.lane.b32.xlu0 %v665_v29, %s489_s15 }
  0x4d   : > { %322 = vrot.lane.b32.xlu1 %v672_v30, %s489_s15  ;;  %320 = vrot.lane.b32.xlu0 %v675_v31, %s489_s15 }
  0x83   : > { %v201_v32 = vpop.permute.xlu1 %200  ;;  %v197_v33 = vpop.permute.xlu0 %196 }
  0x84   : > { %v244_v50 = vmax.bf16 %v197_v33, %v525_v1  ;;  %v246_v58 = vmax.bf16 %v201_v32, %v522_v0 }
  0x87   : > { %v203_v34 = vpop.permute.xlu1 %202  ;;  %v199_v35 = vpop.permute.xlu0 %198 }
  0x88   : > { %v245_v51 = vmax.bf16 %v199_v35, %v535_v3  ;;  %v247_v59 = vmax.bf16 %v203_v34, %v532_v2 }
  0x8b   : > { %v207_v36 = vpop.permute.xlu1 %206  ;;  %v205_v37 = vpop.permute.xlu0 %204 }
  0x8c   : > { %v248_v0 = vmax.bf16 %v205_v37, %v545_v5 }
  0x8f   : > { %v211_v38 = vpop.permute.xlu1 %210  ;;  %v209_v39 = vpop.permute.xlu0 %208 }
  0x90   : > { %v251_v34 = vmax.bf16 %v211_v38, %v552_v6 }
  0x93   : > { %v215_v40 = vpop.permute.xlu1 %214  ;;  %v213_v41 = vpop.permute.xlu0 %212 }
  0x94   : > { %v252_v6 = vmax.bf16 %v213_v41, %v565_v9 }
  0x97   : > { %v681_v42 = vpop.permute.xlu1 %218  ;;  %v683_v43 = vpop.permute.xlu0 %216 }
  0x9b   : > { %v685_v44 = vpop.permute.xlu1 %222  ;;  %v687_v45 = vpop.permute.xlu0 %220 }
  0x9f   : > { %v689_v46 = vpop.permute.xlu1 %226  ;;  %v691_v47 = vpop.permute.xlu0 %224 }
  0xa3   : > { %v295_v48 = vpop.permute.xlu1 %294  ;;  %v293_v49 = vpop.permute.xlu0 %292 }
  0xa4   : > { %v341_v52 = vmax.bf16 %v295_v48, %v261_v16  ;;  %v340_v53 = vmax.bf16 %v293_v49, %v260_v17  ;;  %v249_v16 = vmax.bf16 %v207_v36, %v542_v4  ;;  %v250_v4 = vmax.bf16 %v209_v39, %v555_v7 }
  0xa5   : > { %v253_v48 = vmax.bf16 %v215_v40, %v562_v8  ;;  %v254_v8 = vmax.bf16 %v683_v43, %v575_v11  ;;  %v256_v11 = vmax.bf16 %v687_v45, %v585_v13  ;;  %v258_v13 = vmax.bf16 %v691_v47, %v595_v15 }
  0xa6   : > { %v357_v54 = vmax.bf16 %v341_v52, %v245_v51  ;;  %v356_v55 = vmax.bf16 %v340_v53, %v244_v50  ;;  %v255_v50 = vmax.bf16 %v681_v42, %v572_v10  ;;  %v257_v10 = vmax.bf16 %v685_v44, %v582_v12 }
  0xa7   : > { %v299_v56 = vpop.permute.xlu1 %298  ;;  %v297_v57 = vpop.permute.xlu0 %296  ;;  %v259_v12 = vmax.bf16 %v689_v46, %v592_v14 }
  0xa8   : > { %374 = vst.msk [vmem:[%s699_s21 + $0x4] sm:$0xf] %vm372_vm0, %v357_v54  ;;  %373 = vst.msk [vmem:[%s699_s21] sm:$0xf] %vm372_vm0, %v356_v55  ;;  %v343_v60 = vmax.bf16 %v299_v56, %v612_v18  ;;  %v342_v61 = vmax.bf16 %v297_v57, %v615_v19 }
  0xaa   : > { %v359_v62 = vmax.bf16 %v343_v60, %v247_v59  ;;  %v358_v63 = vmax.bf16 %v342_v61, %v246_v58 }
  0xab   : > { %v303_v1 = vpop.permute.xlu1 %302  ;;  %v301_v3 = vpop.permute.xlu0 %300 }
  0xac   : > { %376 = vst.msk [vmem:[%s699_s21 + $0xc] sm:$0xf] %vm372_vm0, %v359_v62  ;;  %375 = vst.msk [vmem:[%s699_s21 + $0x8] sm:$0xf] %vm372_vm0, %v358_v63  ;;  %v345_v2 = vmax.bf16 %v303_v1, %v622_v20  ;;  %v344_v17 = vmax.bf16 %v301_v3, %v625_v21 }
  0xae   : > { %v361_v18 = vmax.bf16 %v345_v2, %v249_v16  ;;  %v360_v19 = vmax.bf16 %v344_v17, %v248_v0 }
  0xaf   : > { %v307_v32 = vpop.permute.xlu1 %306  ;;  %v305_v33 = vpop.permute.xlu0 %304 }
  0xb0   : > { %378 = vst.msk [vmem:[%s699_s21 + $0x14] sm:$0xf] %vm372_vm0, %v361_v18  ;;  %377 = vst.msk [vmem:[%s699_s21 + $0x10] sm:$0xf] %vm372_vm0, %v360_v19  ;;  %v347_v5 = vmax.bf16 %v307_v32, %v632_v22  ;;  %v346_v20 = vmax.bf16 %v305_v33, %v635_v23 }
  0xb2   : > { %v363_v35 = vmax.bf16 %v347_v5, %v251_v34  ;;  %v362_v21 = vmax.bf16 %v346_v20, %v250_v4 }
  0xb3   : > { %v311_v36 = vpop.permute.xlu1 %310  ;;  %v309_v37 = vpop.permute.xlu0 %308 }
  0xb4   : > { %380 = vst.msk [vmem:[%s699_s21 + $0x1c] sm:$0xf] %vm372_vm0, %v363_v35  ;;  %379 = vst.msk [vmem:[%s699_s21 + $0x18] sm:$0xf] %vm372_vm0, %v362_v21  ;;  %v349_v7 = vmax.bf16 %v311_v36, %v642_v24  ;;  %v348_v22 = vmax.bf16 %v309_v37, %v645_v25 }
  0xb6   : > { %v365_v38 = vmax.bf16 %v349_v7, %v253_v48  ;;  %v364_v23 = vmax.bf16 %v348_v22, %v252_v6 }
  0xb7   : > { %v315_v39 = vpop.permute.xlu1 %314  ;;  %v313_v49 = vpop.permute.xlu0 %312 }
  0xb8   : > { %382 = vst.msk [vmem:[%s699_s21 + $0x24] sm:$0xf] %vm372_vm0, %v365_v38  ;;  %381 = vst.msk [vmem:[%s699_s21 + $0x20] sm:$0xf] %vm372_vm0, %v364_v23  ;;  %v351_v9 = vmax.bf16 %v315_v39, %v652_v26  ;;  %v350_v24 = vmax.bf16 %v313_v49, %v655_v27 }
  0xba   : > { %v367_v25 = vmax.bf16 %v351_v9, %v255_v50  ;;  %v366_v40 = vmax.bf16 %v350_v24, %v254_v8 }
  0xbb   : > { %v319_v41 = vpop.permute.xlu1 %318  ;;  %v317_v51 = vpop.permute.xlu0 %316 }
  0xbc   : > { %384 = vst.msk [vmem:[%s699_s21 + $0x2c] sm:$0xf] %vm372_vm0, %v367_v25  ;;  %383 = vst.msk [vmem:[%s699_s21 + $0x28] sm:$0xf] %vm372_vm0, %v366_v40  ;;  %v353_v26 = vmax.bf16 %v319_v41, %v662_v28  ;;  %v352_v27 = vmax.bf16 %v317_v51, %v665_v29 }
  0xbe   : > { %v369_v42 = vmax.bf16 %v353_v26, %v257_v10  ;;  %v368_v43 = vmax.bf16 %v352_v27, %v256_v11 }
  0xbf   : > { %v323_v52 = vpop.permute.xlu1 %322  ;;  %v321_v53 = vpop.permute.xlu0 %320 }
  0xc0   : > { %386 = vst.msk [vmem:[%s699_s21 + $0x34] sm:$0xf] %vm372_vm0, %v369_v42  ;;  %385 = vst.msk [vmem:[%s699_s21 + $0x30] sm:$0xf] %vm372_vm0, %v368_v43  ;;  %v355_v44 = vmax.bf16 %v323_v52, %v672_v30  ;;  %v354_v28 = vmax.bf16 %v321_v53, %v675_v31 }
  0xc2   : > { %v371_v45 = vmax.bf16 %v355_v44, %v259_v12  ;;  %v370_v29 = vmax.bf16 %v354_v28, %v258_v13 }
  0xc4   : > { %388 = vst.msk [vmem:[%s699_s21 + $0x3c] sm:$0xf] %vm372_vm0, %v371_v45  ;;  %387 = vst.msk [vmem:[%s699_s21 + $0x38] sm:$0xf] %vm372_vm0, %v370_v29 }
  0xc5 PF: > { %s12_s9 = sadd.s32 1, %s487_s9  }
  0xc6   : > { %p9_p4 = scmp.ge.s32.totalorder %s12_s9, 4  }
  0xc8   :  { %11 = sbr.rel (!%p9_p4) target bundleno = 1 (0x1), region = 61 }

// kernel: tile.27
= control target key start
LH: loop header
LB: loop body
LE: loop exit
PB: predicated region body
PF: predicated region fallthrough
CT: control target
= control target key end

     0   :  { %s22_s0 = inlined_call_operand.vmem [shape: f32[16], index: 0, kind: input, shape index: {}]   ;;  %s23_s1 = inlined_call_operand.vmem [shape: f32[4,16], index: 1, kind: output, shape index: {}]  }
   0x1   :  { %v4_v0 = vld [vmem:[%s22_s0] ss:$0 sm:$0xff] }
   0x2   :  { %5 = vst [vmem:[%s23_s1] sm:$0xf] %v4_v0 }

// kernel: tile.1
= control target key start
LH: loop header
LB: loop body
LE: loop exit
PB: predicated region body
PF: predicated region fallthrough
CT: control target
= control target key end

     0   :  { %s176_s8 = smov 125   ;;  %s177_s9 = smov 126   ;;  %vm7_vm0 = vcmask 7168   ;;  %s331_s0 = inlined_call_operand.vmem [shape: f32[4,16], index: 0, kind: input, shape index: {}]   ;;  %s332_s1 = inlined_call_operand.vmem [shape: f32[64,1], index: 1, kind: output, shape index: {}]  }
   0x1   :  { %v4_v0 = vld [vmem:[%s331_s0] sm:$0xf]  ;;  %s175_s0 = smov 127   ;;  %s178_s10 = smov 124  }
   0x2   :  { %5 = vst [vmem:[#allocation0] sm:$0xf] %v4_v0  ;;  %s179_s11 = smov 123   ;;  %s180_s12 = smov 122  }
   0x3   :  { %s181_s13 = smov 121   ;;  %s182_s14 = smov 120  }
   0x4   :  { %s183_s19 = smov 119   ;;  %s184_s20 = smov 118  }
   0x5   :  { %s185_s21 = smov 117   ;;  %s186_s22 = smov 116  }
   0x6   :  { %s187_s23 = smov 115   ;;  %s188_s24 = smov 114  }
   0x7   :  { %s189_s25 = smov 113  }
   0x9   :  { %v10_v1 = vld [vmem:[#allocation0] sm:$0xf]  }
   0xa   :  { %v26_v2 = vld [vmem:[#allocation0] sm:$0xf]   ;;  %11 = vrot.lane.b32.xlu0 %v10_v1, %s175_s0 }
   0xb   :  { %27 = vrot.lane.b32.xlu1 %v26_v2, %s176_s8  ;;  %v18_v3 = vld [vmem:[#allocation0] sm:$0xf]  }
   0xc   :  { %v34_v4 = vld [vmem:[#allocation0] sm:$0xf]  }
   0xd   :  { %v42_v5 = vld [vmem:[#allocation0] sm:$0xf]  }
   0xe   :  { %19 = vrot.lane.b32.xlu0 %v18_v3, %s177_s9  ;;  %v50_v6 = vld [vmem:[#allocation0] sm:$0xf]  }
   0xf   :  { %35 = vrot.lane.b32.xlu1 %v34_v4, %s178_s10  ;;  %v58_v7 = vld [vmem:[#allocation0] sm:$0xf]  }
  0x10   :  { %v66_v8 = vld [vmem:[#allocation0] sm:$0xf]  }
  0x11   :  { %v74_v9 = vld [vmem:[#allocation0] sm:$0xf]  }
  0x12   :  { %43 = vrot.lane.b32.xlu0 %v42_v5, %s179_s11  ;;  %v82_v10 = vld [vmem:[#allocation0] sm:$0xf]  }
  0x13   :  { %51 = vrot.lane.b32.xlu1 %v50_v6, %s180_s12  ;;  %v6_v11 = vld [vmem:[#allocation0] sm:$0xf]  }
  0x14   :  { %8 = vst.msk [vmem:[%s332_s1] ss:$16 sm:$0x3] %vm7_vm0, %v6_v11   ;;  %9 = vst.msk [vmem:[%s332_s1] ss:$16 sm:$0xc] %vm7_vm0, %v6_v11  }
  0x15   :  { %v90_v12 = vld [vmem:[#allocation0] sm:$0xf]  }
  0x16   :  { %59 = vrot.lane.b32.xlu0 %v58_v7, %s181_s13  ;;  %v98_v13 = vld [vmem:[#allocation0] sm:$0xf]  }
  0x17   :  { %67 = vrot.lane.b32.xlu1 %v66_v8, %s182_s14  ;;  %v106_v14 = vld [vmem:[#allocation0] sm:$0xf]  }
  0x18   :  { %v114_v15 = vld [vmem:[#allocation0] sm:$0xf]  }
  0x19   :  { %v122_v16 = vld [vmem:[#allocation0] sm:$0xf]  }
  0x1a   :  { %75 = vrot.lane.b32.xlu0 %v74_v9, %s183_s19 }
  0x1b   :  { %83 = vrot.lane.b32.xlu1 %v82_v10, %s184_s20 }
  0x1e   :  { %91 = vrot.lane.b32.xlu0 %v90_v12, %s185_s21 }
  0x1f   :  { %99 = vrot.lane.b32.xlu1 %v98_v13, %s186_s22 }
  0x22   :  { %107 = vrot.lane.b32.xlu0 %v106_v14, %s187_s23 }
  0x23   :  { %115 = vrot.lane.b32.xlu1 %v114_v15, %s188_s24 }
  0x26   :  { %123 = vrot.lane.b32.xlu0 %v122_v16, %s189_s25 }
  0x7c   :  { %v12_v17 = vpop.permute.xlu0 %11  }
  0x7d   :  { %v28_v18 = vpop.permute.xlu1 %27   ;;  %130 = vst.msk [vmem:[%s332_s1 + $0x1] ss:$16 sm:$0x3] %vm7_vm0, %v12_v17   ;;  %131 = vst.msk [vmem:[%s332_s1 + $0x1] ss:$16 sm:$0xc] %vm7_vm0, %v12_v17  }
  0x7e   :  { %134 = vst.msk [vmem:[%s332_s1 + $0x3] ss:$16 sm:$0x3] %vm7_vm0, %v28_v18   ;;  %135 = vst.msk [vmem:[%s332_s1 + $0x3] ss:$16 sm:$0xc] %vm7_vm0, %v28_v18  }
  0x80   :  { %v20_v19 = vpop.permute.xlu0 %19  }
  0x81   :  { %v36_v20 = vpop.permute.xlu1 %35   ;;  %132 = vst.msk [vmem:[%s332_s1 + $0x2] ss:$16 sm:$0x3] %vm7_vm0, %v20_v19   ;;  %133 = vst.msk [vmem:[%s332_s1 + $0x2] ss:$16 sm:$0xc] %vm7_vm0, %v20_v19  }
  0x82   :  { %136 = vst.msk [vmem:[%s332_s1 + $0x4] ss:$16 sm:$0x3] %vm7_vm0, %v36_v20   ;;  %137 = vst.msk [vmem:[%s332_s1 + $0x4] ss:$16 sm:$0xc] %vm7_vm0, %v36_v20  }
  0x84   :  { %v44_v21 = vpop.permute.xlu0 %43  }
  0x85   :  { %v52_v22 = vpop.permute.xlu1 %51   ;;  %138 = vst.msk [vmem:[%s332_s1 + $0x5] ss:$16 sm:$0x3] %vm7_vm0, %v44_v21   ;;  %139 = vst.msk [vmem:[%s332_s1 + $0x5] ss:$16 sm:$0xc] %vm7_vm0, %v44_v21  }
  0x86   :  { %140 = vst.msk [vmem:[%s332_s1 + $0x6] ss:$16 sm:$0x3] %vm7_vm0, %v52_v22   ;;  %141 = vst.msk [vmem:[%s332_s1 + $0x6] ss:$16 sm:$0xc] %vm7_vm0, %v52_v22  }
  0x88   :  { %v60_v23 = vpop.permute.xlu0 %59  }
  0x89   :  { %v68_v24 = vpop.permute.xlu1 %67   ;;  %142 = vst.msk [vmem:[%s332_s1 + $0x7] ss:$16 sm:$0x3] %vm7_vm0, %v60_v23   ;;  %143 = vst.msk [vmem:[%s332_s1 + $0x7] ss:$16 sm:$0xc] %vm7_vm0, %v60_v23  }
  0x8a   :  { %144 = vst.msk [vmem:[%s332_s1 + $0x8] ss:$16 sm:$0x3] %vm7_vm0, %v68_v24   ;;  %145 = vst.msk [vmem:[%s332_s1 + $0x8] ss:$16 sm:$0xc] %vm7_vm0, %v68_v24  }
  0x8c   :  { %v76_v25 = vpop.permute.xlu0 %75  }
  0x8d   :  { %v84_v26 = vpop.permute.xlu1 %83   ;;  %146 = vst.msk [vmem:[%s332_s1 + $0x9] ss:$16 sm:$0x3] %vm7_vm0, %v76_v25   ;;  %147 = vst.msk [vmem:[%s332_s1 + $0x9] ss:$16 sm:$0xc] %vm7_vm0, %v76_v25  }
  0x8e   :  { %148 = vst.msk [vmem:[%s332_s1 + $0xa] ss:$16 sm:$0x3] %vm7_vm0, %v84_v26   ;;  %149 = vst.msk [vmem:[%s332_s1 + $0xa] ss:$16 sm:$0xc] %vm7_vm0, %v84_v26  }
  0x90   :  { %v92_v27 = vpop.permute.xlu0 %91  }
  0x91   :  { %v100_v28 = vpop.permute.xlu1 %99   ;;  %150 = vst.msk [vmem:[%s332_s1 + $0xb] ss:$16 sm:$0x3] %vm7_vm0, %v92_v27   ;;  %151 = vst.msk [vmem:[%s332_s1 + $0xb] ss:$16 sm:$0xc] %vm7_vm0, %v92_v27  }
  0x92   :  { %152 = vst.msk [vmem:[%s332_s1 + $0xc] ss:$16 sm:$0x3] %vm7_vm0, %v100_v28   ;;  %153 = vst.msk [vmem:[%s332_s1 + $0xc] ss:$16 sm:$0xc] %vm7_vm0, %v100_v28  }
  0x94   :  { %v108_v29 = vpop.permute.xlu0 %107  }
  0x95   :  { %v116_v30 = vpop.permute.xlu1 %115   ;;  %154 = vst.msk [vmem:[%s332_s1 + $0xd] ss:$16 sm:$0x3] %vm7_vm0, %v108_v29   ;;  %155 = vst.msk [vmem:[%s332_s1 + $0xd] ss:$16 sm:$0xc] %vm7_vm0, %v108_v29  }
  0x96   :  { %156 = vst.msk [vmem:[%s332_s1 + $0xe] ss:$16 sm:$0x3] %vm7_vm0, %v116_v30   ;;  %157 = vst.msk [vmem:[%s332_s1 + $0xe] ss:$16 sm:$0xc] %vm7_vm0, %v116_v30  }
  0x98   :  { %v124_v31 = vpop.permute.xlu0 %123  }
  0x99   :  { %158 = vst.msk [vmem:[%s332_s1 + $0xf] ss:$16 sm:$0x3] %vm7_vm0, %v124_v31   ;;  %159 = vst.msk [vmem:[%s332_s1 + $0xf] ss:$16 sm:$0xc] %vm7_vm0, %v124_v31  }

// kernel: vanilla_ae_forward_pallas.18
= control target key start
LH: loop header
LB: loop body
LE: loop exit
PB: predicated region body
PF: predicated region fallthrough
CT: control target
= control target key end

     0   :  { %s1030_s18 = smov 0   ;;  %s1032_s19 = smov 0   ;;  %s1166_s0 = inlined_call_operand.vmem [shape: bf16[2,32,36], index: 0, kind: input, shape index: {}]   ;;  %s1167_s1 = inlined_call_operand.vmem [shape: bf16[32,288], index: 1, kind: input, shape index: {}]   ;;  %s1168_s2 = inlined_call_operand.vmem [shape: f32[32,1], index: 2, kind: input, shape index: {}]   ;;  %s1169_s3 = inlined_call_operand.vmem [shape: f32[32,1], index: 3, kind: input, shape index: {}]   ;;  %s1170_s4 = inlined_call_operand.vmem [shape: f32[32,1], index: 4, kind: input, shape index: {}]   ;;  %s1171_s5 = inlined_call_operand.vmem [shape: bf16[2,32,36], index: 5, kind: output, shape index: {}]  }
   0x1   :  { %s1034_s20 = smov 0  }
   0x2 LB: > { %s27_s21 = sadd.s32 1, %s984_s19  ;;  %p851_p0 = scmp.ge.s32.totalorder %s988_s20, 1  ;;  %s988_s20 = sphi %s1034_s20, %s15_s20   ;;  %s984_s19 = sphi %s1032_s19, %s1175_s19   ;;  %s980_s18 = sphi %s1030_s18, %s1174_s18  }
   0x3   : > { %p29_p1 = scmp.ge.s32.totalorder %s27_s21, 2  ;;  %p246_p2 = scmp.lt.s32.totalorder %s988_s20, 3 }
   0x5   : > { %s1177_s21 = smov (%p29_p1, %s27_s21), 0  ;;  %p247_p3 = pnand %p851_p0, %p246_p2 }
   0x6   : > { %p299_p4 = scmp.lt.s32.totalorder (!%p247_p3), %s980_s18, 1  ;;  %s990_s26 = smov (!%p247_p3), 121   ;;  %v960_v2 = vld [vmem:[%s1167_s1 + $0x4] ss:$12 sps:$4 sm:$0xff] (!%p247_p3)   ;;  %v961_v3 = vld [vmem:[%s1167_s1 + $0x8] ss:$12 sps:$4 sm:$0xff] (!%p247_p3)   ;;  %v635_v37 = vlaneseq (!%p247_p3) }
   0x7   : > { %250 = sbr.rel (%p247_p3) target bundleno = 522 (0x20a), region = 40  ;;  %s991_s27 = smov (!%p247_p3), 120   ;;  %505 = vmatprep.mubr.bf16.mxu0 (!%p247_p3), %v960_v2  ;;  %vm466_vm0 = vcmask (!%p247_p3), 261120   ;;  %v998_v4 = vmov (!%p247_p3), 0   ;;  %v413_v5 = vld [vmem:[%s1168_s2 + $0x8] sm:$0xff] (!%p247_p3)  ;;  %v412_v6 = vld [vmem:[%s1168_s2] sm:$0xff] (!%p247_p3) }
   0x8   : > { %s992_s28 = smov (!%p247_p3), 127   ;;  %s993_s29 = smov (!%p247_p3), 116   ;;  %914 = vmatprep.mubr.msk.bf16.mxu1 (!%p247_p3), %vm466_vm0, %v961_v3  ;;  %955 = vset.pattern.permute.xlu1 (!%p247_p3), %v998_v4  ;;  %v414_v7 = vld [vmem:[%s1168_s2 + $0x10] sm:$0xff] (!%p247_p3)  ;;  %v415_v8 = vld [vmem:[%s1168_s2 + $0x18] sm:$0xff] (!%p247_p3)  ;;  %v579_v9 = vld [vmem:[%s1169_s3] sm:$0xff] (!%p247_p3)  ;;  %vm663_vm1 = vcmask (!%p247_p3), 52224  }
   0x9   : > { %s994_s30 = smov (!%p247_p3), 126   ;;  %s995_s8 = smov (!%p247_p3), 115   ;;  %954 = vset.pattern.permute.xlu0 (!%p247_p3), %v998_v4  ;;  %v580_v10 = vld [vmem:[%s1169_s3 + $0x8] sm:$0xff] (!%p247_p3)  ;;  %v581_v11 = vld [vmem:[%s1169_s3 + $0x10] sm:$0xff] (!%p247_p3)  ;;  %v582_v12 = vld [vmem:[%s1169_s3 + $0x18] sm:$0xff] (!%p247_p3)  ;;  %v636_v38 = vand.u32 (!%p247_p3), 127, %v635_v37 }
   0xa   : > { %s996_s9 = smov (!%p247_p3), 122   ;;  %s997_s12 = smov (!%p247_p3), 114   ;;  %v607_v13 = vld [vmem:[%s1170_s4] sm:$0xff] (!%p247_p3)  ;;  %v608_v14 = vld [vmem:[%s1170_s4 + $0x8] sm:$0xff] (!%p247_p3)  ;;  %v609_v15 = vld [vmem:[%s1170_s4 + $0x10] sm:$0xff] (!%p247_p3)  ;;  %vm692_vm8 = vcmask (!%p247_p3), 232504  }
   0xb   : > { %v610_v16 = vld [vmem:[%s1170_s4 + $0x18] sm:$0xff] (!%p247_p3)  ;;  %v958_v33 = vld [vmem:[%s1167_s1] ss:$12 sps:$4 sm:$0xff] (!%p247_p3)   ;;  %v637_v39 = vadd.s32 (!%p247_p3), 1, %v636_v38  ;;  %vm697_vm9 = vcmask (!%p247_p3), 290024  }
   0xc   : > { %v963_v34 = vld [vmem:[%s1167_s1 + $0x1c] ss:$12 sps:$4 sm:$0xff] (!%p247_p3)   ;;  %v962_v35 = vld [vmem:[%s1167_s1 + $0x20] ss:$12 sps:$4 sm:$0xff] (!%p247_p3)   ;;  %v965_v36 = vld [vmem:[%s1167_s1 + $0x18] ss:$12 sps:$4 sm:$0xff] (!%p247_p3)  }
   0xd   : > { %v1129_v40 = vmul.u32.u64.low (!%p247_p3), 2863311531, %v637_v39  ;;  %v1130_v41 = vmul.u32.u64.high 2863311531, %v637_v39, %v1129_v40 }
   0xe   : > { %s1179_s18 = smov (!%p299_p4, %s980_s18), 1 }
   0xf   : > { %s872_s22 = sshll.u32 %s1179_s18, 4  ;;  %v644_v42 = vshrl.u32 %v1130_v41, 2  ;;  %s999_s18 = smov 7  }
  0x10   : > { %s303_s25 = scalar_lea.vmem %s1166_s0, %s872_s22  ;;  %s1119_s7 = scalar_lea.vmem %s1171_s5, %s872_s22 }
  0x11   : > { %v956_v0 = vld [vmem:[%s303_s25] sm:$0xff]   ;;  %v957_v1 = vld [vmem:[%s303_s25 + $0x8] sm:$0xff]   ;;  %664 = vst.msk [vmem:[%s1119_s7] sm:$0xf] %vm663_vm1, %v998_v4  ;;  %665 = vst.msk [vmem:[%s1119_s7 + $0x4] sm:$0xf] %vm663_vm1, %v998_v4 }
  0x12   : > { %374 = vrot.lane.b32.xlu0 %v956_v0, %s990_s26  ;;  %380 = vrot.lane.b32.xlu1 %v956_v0, %s991_s27  ;;  %666 = vst.msk [vmem:[%s1119_s7 + $0x8] sm:$0xf] %vm663_vm1, %v998_v4  ;;  %667 = vst.msk [vmem:[%s1119_s7 + $0xc] sm:$0xf] %vm663_vm1, %v998_v4  ;;  %v645_v45 = vmul.u32 6, %v644_v42 }
  0x14   : > { %v646_v47 = vsub.s32 %v637_v39, %v645_v45 }
  0x16   : > { %376 = vrot.lane.b32.xlu0 %v957_v1, %s990_s26  ;;  %356 = vrot.lane.b32.xlu1 %v956_v0, %s992_s28  ;;  %vm649_vm2 = vcmp.ne.s32.totalorder %v646_v47, 0  ;;  %vm650_vm3 = vcmp.lt.s32.totalorder %v646_v47, 0  ;;  %v652_v54 = vadd.s32 6, %v646_v47 }
  0x17   : > { %vm651_vm4 = vmand %vm650_vm3, %vm649_vm2 }
  0x1a   : > { %382 = vrot.lane.b32.xlu0 %v957_v1, %s991_s27  ;;  %358 = vrot.lane.b32.xlu1 %v957_v1, %s992_s28 }
  0x1e   : > { %386 = vrot.lane.b32.xlu0 %v956_v0, %s993_s29  ;;  %362 = vrot.lane.b32.xlu1 %v956_v0, %s994_s30 }
  0x22   : > { %388 = vrot.lane.b32.xlu0 %v957_v1, %s993_s29  ;;  %364 = vrot.lane.b32.xlu1 %v957_v1, %s994_s30 }
  0x26   : > { %392 = vrot.lane.b32.xlu0 %v956_v0, %s995_s8  ;;  %368 = vrot.lane.b32.xlu1 %v956_v0, %s996_s9 }
  0x2a   : > { %394 = vrot.lane.b32.xlu0 %v957_v1, %s995_s8  ;;  %370 = vrot.lane.b32.xlu1 %v957_v1, %s996_s9 }
  0x2e   : > { %398 = vrot.lane.b32.xlu0 %v956_v0, %s997_s12  ;;  %400 = vrot.lane.b32.xlu1 %v957_v1, %s997_s12 }
  0x32   : > { %423 = vperm.xlu1 %955, %v413_v5   ;;  %418 = vperm.xlu0 %954, %v412_v6  }
  0x36   : > { %428 = vperm.xlu1 %955, %v414_v7   ;;  %433 = vperm.xlu0 %954, %v415_v8  }
  0x3a   : > { %585 = vperm.xlu1 %955, %v579_v9   ;;  %590 = vperm.xlu0 %954, %v580_v10  }
  0x3e   : > { %595 = vperm.xlu1 %955, %v581_v11   ;;  %600 = vperm.xlu0 %954, %v582_v12  }
  0x42   : > { %613 = vperm.xlu1 %955, %v607_v13   ;;  %618 = vperm.xlu0 %954, %v608_v14  }
  0x46   : > { %623 = vperm.xlu1 %955, %v609_v15   ;;  %628 = vperm.xlu0 %954, %v610_v16  }
  0x84   : > { %v375_v17 = vpop.permute.xlu0 %374  ;;  %v381_v18 = vpop.permute.xlu1 %380 }
  0x85   : > { %878 = vmatprep.subr.bf16.mxu0 %v375_v17 }
  0x86   : > { %879 = vmatpush3.bf16.msra.mxu0 %v956_v0  ;;  %v653_v0 = vsel %vm651_vm4, %v652_v54, %v646_v47 }
  0x87   : > { %vm654_vm5 = vcmp.ge.s32.totalorder %v653_v0, 1  ;;  %vm655_vm6 = vcmp.le.s32.totalorder %v653_v0, 4 }
  0x88   : > { %v377_v19 = vpop.permute.xlu0 %376  ;;  %v357_v20 = vpop.permute.xlu1 %356  ;;  %vm1133_vm7 = vmand %vm654_vm5, %vm655_vm6 }
  0x89   : > { %880 = vmatprep.subr.bf16.mxu0 %v377_v19 }
  0x8a   : > { %881 = vmatpush3.bf16.msra.mxu0 %v957_v1 }
  0x8b   : > { %882 = vmatprep.subr.bf16.mxu0 %v381_v18 }
  0x8c   : > { %v383_v21 = vpop.permute.xlu0 %382  ;;  %v359_v22 = vpop.permute.xlu1 %358 }
  0x8e   : > { %883 = vmatpush3.bf16.msra.mxu0 %v357_v20 }
  0x8f   : > { %884 = vmatprep.subr.bf16.mxu0 %v383_v21 }
  0x90   : > { %v387_v23 = vpop.permute.xlu0 %386  ;;  %v363_v24 = vpop.permute.xlu1 %362 }
  0x92   : > { %885 = vmatpush3.bf16.msra.mxu0 %v359_v22 }
  0x93   : > { %886 = vmatprep.subr.bf16.mxu0 %v387_v23 }
  0x94   : > { %v389_v25 = vpop.permute.xlu0 %388  ;;  %v365_v26 = vpop.permute.xlu1 %364 }
  0x96   : > { %887 = vmatpush3.bf16.msra.mxu0 %v363_v24 }
  0x97   : > { %888 = vmatprep.subr.bf16.mxu0 %v389_v25 }
  0x98   : > { %v393_v27 = vpop.permute.xlu0 %392  ;;  %v369_v28 = vpop.permute.xlu1 %368 }
  0x9a   : > { %889 = vmatpush3.bf16.msra.mxu0 %v365_v26 }
  0x9b   : > { %890 = vmatprep.subr.bf16.mxu0 %v393_v27 }
  0x9c   : > { %v395_v29 = vpop.permute.xlu0 %394  ;;  %v371_v30 = vpop.permute.xlu1 %370 }
  0x9e   : > { %891 = vmatpush3.bf16.msra.mxu0 %v369_v28 }
  0x9f   : > { %892 = vmatprep.subr.bf16.mxu0 %v395_v29 }
  0xa0   : > { %v399_v31 = vpop.permute.xlu0 %398  ;;  %v401_v32 = vpop.permute.xlu1 %400 }
  0xa1   : > { %910 = vmatprep.subr.bf16.mxu1 %v399_v31 }
  0xa2   : > { %893 = vmatpush3.bf16.msra.mxu0 %v371_v30  ;;  %911 = vmatpush3.bf16.msra.mxu1 %v399_v31 }
  0xa3   : > { %912 = vmatprep.subr.bf16.mxu1 %v401_v32 }
  0xa5   : > { %506 = vmatmul.mubr.bf16.vlgmr.msra.gmra.mrb[0].mxu0 %v958_v33 }
  0xa6   : > { %913 = vmatpush3.bf16.msra.mxu1 %v401_v32  ;;  %513 = vmatprep.mubr.bf16.mxu0 %v963_v34 }
  0xa9   : > { %915 = vmatmul.mubr.msk.bf16.vlgmr.msra.gmra.mrb[0].mxu1 %vm466_vm0, %v962_v35 }
  0xad   : > { %514 = vmatmul.mubr.bf16.gmra.mrb[4].mxu0 %v965_v36 }
  0xb1   : > { %v424_v43 = vpop.permute.xlu1 %423  ;;  %v419_v44 = vpop.permute.xlu0 %418 }
  0xb5   : > { %v429_v46 = vpop.permute.xlu1 %428  ;;  %v434_v48 = vpop.permute.xlu0 %433 }
  0xb9   : > { %v586_v50 = vpop.permute.xlu1 %585  ;;  %v591_v55 = vpop.permute.xlu0 %590 }
  0xbd   : > { %v596_v1 = vpop.permute.xlu1 %595  ;;  %v601_v7 = vpop.permute.xlu0 %600 }
  0xc1   : > { %v614_v18 = vpop.permute.xlu1 %613  ;;  %v619_v24 = vpop.permute.xlu0 %618 }
  0xc5   : > { %v624_v36 = vpop.permute.xlu1 %623  ;;  %v629_v39 = vpop.permute.xlu0 %628 }
 0x178   : > { %v894_v49 = vpop.f32.mrb[0].mxu0 }
 0x179   : > { %v895_v51 = vpop.f32.mrb[1].mxu0 }
 0x17a   : > { %v896_v52 = vadd.f32 %v895_v51, %v894_v49  ;;  %v897_v53 = vpop.f32.mrb[2].mxu0 }
 0x17b   : > { %v898_v56 = vpop.f32.mrb[3].mxu0 }
 0x17c   : > { %v899_v57 = vadd.f32 %v898_v56, %v897_v53  ;;  %v916_v58 = vpop.f32.mrb[0].mxu1  ;;  %v508_v59 = vadd.f32 %v896_v52, %v419_v44 }
 0x17d   : > { %v556_v60 = vpop.f32.mrb[1].mxu1 }
 0x17e   : > { %v557_v61 = vadd.f32 %v556_v60, %v508_v59  ;;  %v917_v62 = vpop.f32.mrb[2].mxu1  ;;  %v511_v63 = vadd.f32 %v899_v57, %v424_v43 }
 0x17f   : > { %v559_v2 = vpop.f32.mrb[3].mxu1 }
 0x180   : > { %v571_v3 = vmul.f32 0.2, %v557_v61  ;;  %v560_v5 = vadd.f32 %v559_v2, %v511_v63  ;;  %v900_v6 = vpop.f32.mrb[4].mxu0 }
 0x181   : > { %v901_v8 = vpop.f32.mrb[5].mxu0 }
 0x182   : > { %v575_v9 = vmax.f32 %v557_v61, %v571_v3  ;;  %v572_v10 = vmul.f32 0.2, %v560_v5  ;;  %v902_v11 = vadd.f32 %v901_v8, %v900_v6  ;;  %v903_v12 = vpop.f32.mrb[6].mxu0 }
 0x183   : > { %v904_v13 = vpop.f32.mrb[7].mxu0 }
 0x184   : > { %v603_v14 = vmul.f32 %v586_v50, %v575_v9  ;;  %v576_v15 = vmax.f32 %v560_v5, %v572_v10  ;;  %v516_v16 = vadd.f32 %v902_v11, %v429_v46  ;;  %v905_v17 = vadd.f32 %v904_v13, %v903_v12 }
 0x186   : > { %v604_v20 = vmul.f32 %v591_v55, %v576_v15  ;;  %v565_v21 = vadd.f32 %v916_v58, %v516_v16  ;;  %v519_v22 = vadd.f32 %v905_v17, %v434_v48  ;;  %v631_v23 = vadd.f32 %v614_v18, %v603_v14 }
 0x188   : > { %v573_v25 = vmul.f32 0.2, %v565_v21  ;;  %v568_v26 = vadd.f32 %v917_v62, %v519_v22  ;;  %v659_v27 = vsel %vm1133_vm7, %v631_v23, 0.0  ;;  %v632_v28 = vadd.f32 %v619_v24, %v604_v20 }
 0x189   : > { %v874_v29 = vpack.c.bf16 %v659_v27, %v659_v27 }
 0x18a   : > { %v577_v30 = vmax.f32 %v565_v21, %v573_v25  ;;  %v574_v31 = vmul.f32 0.2, %v568_v26  ;;  %v660_v32 = vsel %vm1133_vm7, %v632_v28, 0.0 }
 0x18b   : > { %680 = vrot.lane.b32.xlu1 %v874_v29, %s999_s18  ;;  %v875_v33 = vpack.c.bf16 %v660_v32, %v660_v32 }
 0x18c   : > { %v578_v34 = vmax.f32 %v568_v26, %v574_v31  ;;  %v605_v35 = vmul.f32 %v596_v1, %v577_v30 }
 0x18d   : > { %682 = vrot.lane.b32.xlu0 %v875_v33, %s999_s18 }
 0x18e   : > { %v633_v37 = vadd.f32 %v624_v36, %v605_v35  ;;  %v606_v38 = vmul.f32 %v601_v7, %v578_v34 }
 0x190   : > { %v661_v40 = vsel %vm1133_vm7, %v633_v37, 0.0  ;;  %v634_v41 = vadd.f32 %v629_v39, %v606_v38 }
 0x191   : > { %v876_v42 = vpack.c.bf16 %v661_v40, %v661_v40 }
 0x192   : > { %v662_v43 = vsel %vm1133_vm7, %v634_v41, 0.0 }
 0x193   : > { %684 = vrot.lane.b32.xlu1 %v876_v42, %s999_s18  ;;  %v877_v44 = vpack.c.bf16 %v662_v43, %v662_v43 }
 0x195   : > { %686 = vrot.lane.b32.xlu0 %v877_v44, %s999_s18 }
 0x1fd   : > { %v681_v45 = vpop.permute.xlu1 %680 }
 0x1fe   : > { %693 = vst.msk [vmem:[%s1119_s7] sm:$0xf] %vm692_vm8, %v681_v45 }
 0x1ff   : > { %698 = vst.msk [vmem:[%s1119_s7] sm:$0xf] %vm697_vm9, %v998_v4  ;;  %v683_v46 = vpop.permute.xlu0 %682 }
 0x200   : > { %694 = vst.msk [vmem:[%s1119_s7 + $0x4] sm:$0xf] %vm692_vm8, %v683_v46 }
 0x201   : > { %699 = vst.msk [vmem:[%s1119_s7 + $0x4] sm:$0xf] %vm697_vm9, %v998_v4 }
 0x205   : > { %v685_v47 = vpop.permute.xlu1 %684 }
 0x206   : > { %695 = vst.msk [vmem:[%s1119_s7 + $0x8] sm:$0xf] %vm692_vm8, %v685_v47 }
 0x207   : > { %700 = vst.msk [vmem:[%s1119_s7 + $0x8] sm:$0xf] %vm697_vm9, %v998_v4  ;;  %v687_v48 = vpop.permute.xlu0 %686 }
 0x208   : > { %696 = vst.msk [vmem:[%s1119_s7 + $0xc] sm:$0xf] %vm692_vm8, %v687_v48 }
 0x209   : > { %701 = vst.msk [vmem:[%s1119_s7 + $0xc] sm:$0xf] %vm697_vm9, %v998_v4 }
 0x20a PF: > { %s15_s20 = sadd.s32 1, %s988_s20   ;;  %s1174_s18 = smov %s984_s19 }
 0x20b   : > { %p12_p5 = scmp.ge.s32.totalorder %s15_s20, 4   ;;  %s1175_s19 = smov %s1177_s21 }
 0x20d   :  { %14 = sbr.rel (!%p12_p5) target bundleno = 2 (0x2), region = 82 }

// kernel: vanilla_ae_forward_pallas.20
= control target key start
LH: loop header
LB: loop body
LE: loop exit
PB: predicated region body
PF: predicated region fallthrough
CT: control target
= control target key end

     0   :  { %s913_s18 = smov 0   ;;  %s915_s19 = smov 0   ;;  %s998_s0 = inlined_call_operand.vmem [shape: bf16[2,32,36], index: 0, kind: input, shape index: {}]   ;;  %s999_s1 = inlined_call_operand.vmem [shape: bf16[16,288], index: 1, kind: input, shape index: {}]   ;;  %s1000_s2 = inlined_call_operand.vmem [shape: f32[16,1], index: 2, kind: input, shape index: {}]   ;;  %s1001_s3 = inlined_call_operand.vmem [shape: f32[16,1], index: 3, kind: input, shape index: {}]   ;;  %s1002_s4 = inlined_call_operand.vmem [shape: f32[16,1], index: 4, kind: input, shape index: {}]   ;;  %s1003_s5 = inlined_call_operand.vmem [shape: bf16[2,16,36], index: 5, kind: output, shape index: {}]  }
   0x1   :  { %s917_s20 = smov 0  }
   0x2 LB: > { %s27_s21 = sadd.s32 1, %s865_s19  ;;  %p749_p0 = scmp.ge.s32.totalorder %s869_s20, 1  ;;  %s869_s20 = sphi %s917_s20, %s15_s20   ;;  %s865_s19 = sphi %s915_s19, %s1005_s19   ;;  %s861_s18 = sphi %s913_s18, %s1004_s18  }
   0x3   : > { %p29_p1 = scmp.ge.s32.totalorder %s27_s21, 2  ;;  %p246_p2 = scmp.lt.s32.totalorder %s869_s20, 3 }
   0x5   : > { %s1007_s21 = smov (%p29_p1, %s27_s21), 0  ;;  %p247_p3 = pnand %p749_p0, %p246_p2 }
   0x6   : > { %p299_p4 = scmp.lt.s32.totalorder (!%p247_p3), %s861_s18, 1  ;;  %s871_s26 = smov (!%p247_p3), 121   ;;  %v876_v2 = vmov (!%p247_p3), 0.0   ;;  %v845_v3 = vld [vmem:[%s999_s1 + $0x4] ss:$12 sps:$4 sm:$0xff] (!%p247_p3)   ;;  %vm879_vm0 = vmmov (!%p247_p3), 0   ;;  %v553_v29 = vlaneseq (!%p247_p3) }
   0x7   : > { %250 = sbr.rel (%p247_p3) target bundleno = 514 (0x202), region = 40  ;;  %s872_s27 = smov (!%p247_p3), 120   ;;  %793 = vmatprep.subr.bf16.mxu1 (!%p247_p3), %v876_v2  ;;  %471 = vmatprep.mubr.bf16.mxu0 (!%p247_p3), %v845_v3  ;;  %v880_v4 = vmov (!%p247_p3), 0   ;;  %v409_v5 = vld [vmem:[%s1000_s2 + $0x8] sm:$0xff] (!%p247_p3)  ;;  %v408_v6 = vld [vmem:[%s1000_s2] sm:$0xff] (!%p247_p3)  ;;  %vm435_vm1 = vcmask (!%p247_p3), 261120  }
   0x8   : > { %s873_s28 = smov (!%p247_p3), 127   ;;  %s874_s29 = smov (!%p247_p3), 116   ;;  %797 = vmatprep.mubr.msk.bf16.mxu1 (!%p247_p3), %vm879_vm0, %v876_v2  ;;  %840 = vset.pattern.permute.xlu1 (!%p247_p3), %v880_v4  ;;  %v525_v7 = vld [vmem:[%s1001_s3] sm:$0xff] (!%p247_p3)  ;;  %v526_v8 = vld [vmem:[%s1001_s3 + $0x8] sm:$0xff] (!%p247_p3)  ;;  %vm579_vm2 = vcmask (!%p247_p3), 52224   ;;  %v554_v30 = vand.u32 (!%p247_p3), 127, %v553_v29 }
   0x9   : > { %s875_s30 = smov (!%p247_p3), 126   ;;  %s877_s8 = smov (!%p247_p3), 115   ;;  %839 = vset.pattern.permute.xlu0 (!%p247_p3), %v880_v4  ;;  %v539_v9 = vld [vmem:[%s1002_s4] sm:$0xff] (!%p247_p3)  ;;  %v540_v10 = vld [vmem:[%s1002_s4 + $0x8] sm:$0xff] (!%p247_p3)  ;;  %vm594_vm9 = vcmask (!%p247_p3), 232504   ;;  %vm597_vm10 = vcmask (!%p247_p3), 290024  }
   0xa   : > { %s878_s9 = smov (!%p247_p3), 122   ;;  %s881_s10 = smov (!%p247_p3), 114   ;;  %v843_v26 = vld [vmem:[%s999_s1] ss:$12 sps:$4 sm:$0xff] (!%p247_p3)   ;;  %v846_v28 = vld [vmem:[%s999_s1 + $0x8] ss:$12 sps:$4 sm:$0xff] (!%p247_p3)  }
   0xb   : > { %v555_v31 = vadd.s32 (!%p247_p3), 1, %v554_v30 }
   0xd   : > { %v979_v32 = vmul.u32.u64.low (!%p247_p3), 2863311531, %v555_v31  ;;  %v980_v33 = vmul.u32.u64.high 2863311531, %v555_v31, %v979_v32 }
   0xe   : > { %s1009_s18 = smov (!%p299_p4, %s861_s18), 1 }
   0xf   : > { %s764_s22 = sshll.u32 %s1009_s18, 4  ;;  %s765_s6 = sshll.u32 %s1009_s18, 3  ;;  %v562_v34 = vshrl.u32 %v980_v33, 2 }
  0x10   : > { %s303_s25 = scalar_lea.vmem %s998_s0, %s764_s22  ;;  %s882_s18 = smov 7  }
  0x11   : > { %v841_v0 = vld [vmem:[%s303_s25] sm:$0xff]   ;;  %v842_v1 = vld [vmem:[%s303_s25 + $0x8] sm:$0xff]   ;;  %v563_v35 = vmul.u32 6, %v562_v34 }
  0x12   : > { %374 = vrot.lane.b32.xlu0 %v841_v0, %s871_s26  ;;  %380 = vrot.lane.b32.xlu1 %v841_v0, %s872_s27 }
  0x13   : > { %v564_v36 = vsub.s32 %v555_v31, %v563_v35 }
  0x15   : > { %vm567_vm3 = vcmp.ne.s32.totalorder %v564_v36, 0  ;;  %vm568_vm4 = vcmp.lt.s32.totalorder %v564_v36, 0  ;;  %v570_v45 = vadd.s32 6, %v564_v36 }
  0x16   : > { %376 = vrot.lane.b32.xlu0 %v842_v1, %s871_s26  ;;  %356 = vrot.lane.b32.xlu1 %v841_v0, %s873_s28  ;;  %vm569_vm5 = vmand %vm568_vm4, %vm567_vm3 }
  0x17   : > { %v571_v54 = vsel %vm569_vm5, %v570_v45, %v564_v36 }
  0x18   : > { %vm572_vm6 = vcmp.ge.s32.totalorder %v571_v54, 1  ;;  %vm573_vm7 = vcmp.le.s32.totalorder %v571_v54, 4 }
  0x19   : > { %vm574_vm8 = vmand %vm572_vm6, %vm573_vm7 }
  0x1a   : > { %382 = vrot.lane.b32.xlu0 %v842_v1, %s872_s27  ;;  %358 = vrot.lane.b32.xlu1 %v842_v1, %s873_s28 }
  0x1e   : > { %386 = vrot.lane.b32.xlu0 %v841_v0, %s874_s29  ;;  %362 = vrot.lane.b32.xlu1 %v841_v0, %s875_s30 }
  0x22   : > { %388 = vrot.lane.b32.xlu0 %v842_v1, %s874_s29  ;;  %364 = vrot.lane.b32.xlu1 %v842_v1, %s875_s30 }
  0x26   : > { %392 = vrot.lane.b32.xlu0 %v841_v0, %s877_s8  ;;  %368 = vrot.lane.b32.xlu1 %v841_v0, %s878_s9 }
  0x2a   : > { %394 = vrot.lane.b32.xlu0 %v842_v1, %s877_s8  ;;  %370 = vrot.lane.b32.xlu1 %v842_v1, %s878_s9  ;;  %s973_s9 = scalar_lea.vmem %s1003_s5, %s765_s6 }
  0x2b   : > { %580 = vst.msk [vmem:[%s973_s9] sm:$0xf] %vm579_vm2, %v880_v4  ;;  %581 = vst.msk [vmem:[%s973_s9 + $0x4] sm:$0xf] %vm579_vm2, %v880_v4 }
  0x2e   : > { %398 = vrot.lane.b32.xlu0 %v841_v0, %s881_s10  ;;  %400 = vrot.lane.b32.xlu1 %v842_v1, %s881_s10 }
  0x32   : > { %417 = vperm.xlu1 %840, %v409_v5   ;;  %412 = vperm.xlu0 %839, %v408_v6  }
  0x36   : > { %529 = vperm.xlu1 %840, %v525_v7   ;;  %534 = vperm.xlu0 %839, %v526_v8  }
  0x3a   : > { %543 = vperm.xlu1 %840, %v539_v9   ;;  %548 = vperm.xlu0 %839, %v540_v10  }
  0x84   : > { %v375_v11 = vpop.permute.xlu0 %374  ;;  %v381_v12 = vpop.permute.xlu1 %380 }
  0x85   : > { %768 = vmatprep.subr.bf16.mxu0 %v375_v11 }
  0x86   : > { %769 = vmatpush3.bf16.msra.mxu0 %v841_v0 }
  0x88   : > { %v377_v13 = vpop.permute.xlu0 %376  ;;  %v357_v14 = vpop.permute.xlu1 %356 }
  0x89   : > { %770 = vmatprep.subr.bf16.mxu0 %v377_v13 }
  0x8a   : > { %771 = vmatpush3.bf16.msra.mxu0 %v842_v1 }
  0x8b   : > { %772 = vmatprep.subr.bf16.mxu0 %v381_v12 }
  0x8c   : > { %v383_v15 = vpop.permute.xlu0 %382  ;;  %v359_v16 = vpop.permute.xlu1 %358 }
  0x8e   : > { %773 = vmatpush3.bf16.msra.mxu0 %v357_v14 }
  0x8f   : > { %774 = vmatprep.subr.bf16.mxu0 %v383_v15 }
  0x90   : > { %v387_v17 = vpop.permute.xlu0 %386  ;;  %v363_v18 = vpop.permute.xlu1 %362 }
  0x92   : > { %775 = vmatpush3.bf16.msra.mxu0 %v359_v16 }
  0x93   : > { %776 = vmatprep.subr.bf16.mxu0 %v387_v17 }
  0x94   : > { %v389_v19 = vpop.permute.xlu0 %388  ;;  %v365_v20 = vpop.permute.xlu1 %364 }
  0x96   : > { %777 = vmatpush3.bf16.msra.mxu0 %v363_v18 }
  0x97   : > { %778 = vmatprep.subr.bf16.mxu0 %v389_v19 }
  0x98   : > { %v393_v21 = vpop.permute.xlu0 %392  ;;  %v369_v22 = vpop.permute.xlu1 %368 }
  0x9a   : > { %779 = vmatpush3.bf16.msra.mxu0 %v365_v20 }
  0x9b   : > { %780 = vmatprep.subr.bf16.mxu0 %v393_v21 }
  0x9c   : > { %v395_v23 = vpop.permute.xlu0 %394  ;;  %v371_v24 = vpop.permute.xlu1 %370 }
  0x9e   : > { %781 = vmatpush3.bf16.msra.mxu0 %v369_v22 }
  0x9f   : > { %782 = vmatprep.subr.bf16.mxu0 %v395_v23 }
  0xa0   : > { %v399_v25 = vpop.permute.xlu0 %398  ;;  %v401_v27 = vpop.permute.xlu1 %400 }
  0xa1   : > { %794 = vmatpush3.bf16.msra.mxu1 %v399_v25 }
  0xa2   : > { %783 = vmatpush3.bf16.msra.mxu0 %v371_v24  ;;  %795 = vmatprep.subr.bf16.mxu1 %v876_v2 }
  0xa5   : > { %472 = vmatmul.mubr.bf16.vlgmr.msra.gmra.mrb[0].mxu0 %v843_v26  ;;  %796 = vmatpush3.bf16.msra.mxu1 %v401_v27 }
  0xa8   : > { %798 = vmatmul.mubr.msk.bf16.vlgmr.msra.gmra.mrb[0].mxu1 %vm435_vm1, %v846_v28 }
  0xb1   : > { %v418_v38 = vpop.permute.xlu1 %417  ;;  %v413_v40 = vpop.permute.xlu0 %412 }
  0xb5   : > { %v530_v53 = vpop.permute.xlu1 %529  ;;  %v535_v57 = vpop.permute.xlu0 %534 }
  0xb9   : > { %v544_v62 = vpop.permute.xlu1 %543  ;;  %v549_v1 = vpop.permute.xlu0 %548 }
 0x178   : > { %v784_v37 = vpop.f32.mrb[0].mxu0 }
 0x179   : > { %v785_v39 = vpop.f32.mrb[1].mxu0 }
 0x17a   : > { %v786_v41 = vadd.f32 %v785_v39, %v784_v37  ;;  %v787_v42 = vpop.f32.mrb[2].mxu0 }
 0x17b   : > { %v788_v43 = vpop.f32.mrb[3].mxu0  ;;  %v514_v44 = vpop.f32.mrb[0].mxu1 }
 0x17c   : > { %v789_v46 = vadd.f32 %v788_v43, %v787_v42  ;;  %v474_v47 = vadd.f32 %v786_v41, %v413_v40  ;;  %v799_v48 = vpop.f32.mrb[1].mxu1 }
 0x17d   : > { %v517_v49 = vpop.f32.mrb[2].mxu1 }
 0x17e   : > { %v515_v50 = vadd.f32 %v514_v44, %v474_v47  ;;  %v477_v51 = vadd.f32 %v789_v46, %v418_v38  ;;  %v800_v52 = vpop.f32.mrb[3].mxu1 }
 0x180   : > { %v521_v55 = vmul.f32 0.2, %v515_v50  ;;  %v518_v56 = vadd.f32 %v517_v49, %v477_v51 }
 0x182   : > { %v523_v58 = vmax.f32 %v515_v50, %v521_v55  ;;  %v522_v59 = vmul.f32 0.2, %v518_v56 }
 0x184   : > { %v537_v60 = vmul.f32 %v530_v53, %v523_v58  ;;  %v524_v61 = vmax.f32 %v518_v56, %v522_v59 }
 0x186   : > { %v551_v63 = vadd.f32 %v544_v62, %v537_v60  ;;  %v538_v0 = vmul.f32 %v535_v57, %v524_v61 }
 0x188   : > { %v577_v2 = vsel %vm574_vm8, %v551_v63, 0.0  ;;  %v552_v3 = vadd.f32 %v549_v1, %v538_v0 }
 0x189   : > { %v766_v5 = vpack.c.bf16 %v577_v2, %v577_v2 }
 0x18a   : > { %v578_v6 = vsel %vm574_vm8, %v552_v3, 0.0 }
 0x18b   : > { %v767_v7 = vpack.c.bf16 %v578_v6, %v578_v6  ;;  %588 = vrot.lane.b32.xlu1 %v766_v5, %s882_s18 }
 0x18d   : > { %590 = vrot.lane.b32.xlu0 %v767_v7, %s882_s18 }
 0x1fd   : > { %v589_v8 = vpop.permute.xlu1 %588 }
 0x1fe   : > { %595 = vst.msk [vmem:[%s973_s9] sm:$0xf] %vm594_vm9, %v589_v8 }
 0x1ff   : > { %598 = vst.msk [vmem:[%s973_s9] sm:$0xf] %vm597_vm10, %v880_v4  ;;  %v591_v9 = vpop.permute.xlu0 %590 }
 0x200   : > { %596 = vst.msk [vmem:[%s973_s9 + $0x4] sm:$0xf] %vm594_vm9, %v591_v9 }
 0x201   : > { %599 = vst.msk [vmem:[%s973_s9 + $0x4] sm:$0xf] %vm597_vm10, %v880_v4 }
 0x202 PF: > { %s15_s20 = sadd.s32 1, %s869_s20   ;;  %s1004_s18 = smov %s865_s19 }
 0x203   : > { %p12_p5 = scmp.ge.s32.totalorder %s15_s20, 4   ;;  %s1005_s19 = smov %s1007_s21 }
 0x205   :  { %14 = sbr.rel (!%p12_p5) target bundleno = 2 (0x2), region = 82 }

// kernel: vanilla_ae_forward_pallas.21
= control target key start
LH: loop header
LB: loop body
LE: loop exit
PB: predicated region body
PF: predicated region fallthrough
CT: control target
= control target key end

     0   :  { %s1061_s18 = smov 0   ;;  %s1063_s19 = smov 0   ;;  %s1274_s0 = inlined_call_operand.vmem [shape: bf16[2,16,36], index: 0, kind: input, shape index: {}]   ;;  %s1275_s1 = inlined_call_operand.vmem [shape: bf16[64,64], index: 1, kind: input, shape index: {}]   ;;  %s1276_s2 = inlined_call_operand.vmem [shape: f32[64,1], index: 2, kind: input, shape index: {}]   ;;  %s1277_s3 = inlined_call_operand.vmem [shape: f32[64,1], index: 3, kind: input, shape index: {}]   ;;  %s1278_s4 = inlined_call_operand.vmem [shape: f32[64,1], index: 4, kind: input, shape index: {}]   ;;  %s1279_s5 = inlined_call_operand.vmem [shape: bf16[2,64,36], index: 5, kind: output, shape index: {}]  }
   0x1   :  { %s1065_s20 = smov 0  }
   0x2 LB: > { %s27_s21 = sadd.s32 1, %s1020_s19  ;;  %p898_p0 = scmp.ge.s32.totalorder %s1024_s20, 1  ;;  %s1024_s20 = sphi %s1065_s20, %s15_s20   ;;  %s1020_s19 = sphi %s1063_s19, %s1283_s19   ;;  %s1016_s18 = sphi %s1061_s18, %s1282_s18  }
   0x3   : > { %p29_p1 = scmp.ge.s32.totalorder %s27_s21, 2  ;;  %p245_p2 = scmp.lt.s32.totalorder %s1024_s20, 3 }
   0x5   : > { %s1285_s21 = smov (%p29_p1, %s27_s21), 0  ;;  %p246_p3 = pnand %p898_p0, %p245_p2 }
   0x6   : > { %p297_p4 = scmp.lt.s32.totalorder (!%p246_p3), %s1016_s18, 1  ;;  %s1026_s26 = smov (!%p246_p3), 127   ;;  %v998_v1 = vld [vmem:[%s1275_s1] sm:$0xff] (!%p246_p3)   ;;  %vm436_vm0 = vcmask (!%p246_p3), 523264   ;;  %v999_v2 = vld [vmem:[%s1275_s1 + $0x10] sm:$0xff] (!%p246_p3)   ;;  %v1029_v5 = vmov (!%p246_p3), 0   ;;  %v642_v41 = vlaneseq (!%p246_p3) }
   0x7   : > { %249 = sbr.rel (%p246_p3) target bundleno = 616 (0x268), region = 40  ;;  %s1027_s27 = smov (!%p246_p3), 121   ;;  %948 = vmatprep.mubr.msk.bf16.mxu0 (!%p246_p3), %vm436_vm0, %v998_v1  ;;  %952 = vmatprep.mubr.msk.bf16.mxu1 (!%p246_p3), %vm436_vm0, %v999_v2  ;;  %v359_v7 = vld [vmem:[%s1276_s2 + $0x8] sm:$0xff] (!%p246_p3)  ;;  %v358_v8 = vld [vmem:[%s1276_s2] sm:$0xff] (!%p246_p3)  ;;  %v360_v9 = vld [vmem:[%s1276_s2 + $0x10] sm:$0xff] (!%p246_p3)  ;;  %vm674_vm1 = vcmask (!%p246_p3), 52224  }
   0x8   : > { %s1028_s28 = smov (!%p246_p3), 122   ;;  %996 = vset.pattern.permute.xlu1 (!%p246_p3), %v1029_v5  ;;  %995 = vset.pattern.permute.xlu0 (!%p246_p3), %v1029_v5  ;;  %v361_v10 = vld [vmem:[%s1276_s2 + $0x18] sm:$0xff] (!%p246_p3)  ;;  %v362_v11 = vld [vmem:[%s1276_s2 + $0x20] sm:$0xff] (!%p246_p3)  ;;  %v363_v12 = vld [vmem:[%s1276_s2 + $0x28] sm:$0xff] (!%p246_p3)  ;;  %v643_v43 = vand.u32 (!%p246_p3), 127, %v642_v41  ;;  %vm731_vm8 = vcmask (!%p246_p3), 232504  }
   0x9   : > { %v364_v13 = vld [vmem:[%s1276_s2 + $0x30] sm:$0xff] (!%p246_p3)  ;;  %v365_v14 = vld [vmem:[%s1276_s2 + $0x38] sm:$0xff] (!%p246_p3)  ;;  %v530_v15 = vld [vmem:[%s1277_s3] sm:$0xff] (!%p246_p3)  ;;  %vm740_vm9 = vcmask (!%p246_p3), 290024  }
   0xa   : > { %v531_v16 = vld [vmem:[%s1277_s3 + $0x8] sm:$0xff] (!%p246_p3)  ;;  %v532_v17 = vld [vmem:[%s1277_s3 + $0x10] sm:$0xff] (!%p246_p3)  ;;  %v533_v18 = vld [vmem:[%s1277_s3 + $0x18] sm:$0xff] (!%p246_p3)  ;;  %v644_v46 = vadd.s32 (!%p246_p3), 1, %v643_v43 }
   0xb   : > { %v534_v19 = vld [vmem:[%s1277_s3 + $0x20] sm:$0xff] (!%p246_p3)  ;;  %v535_v20 = vld [vmem:[%s1277_s3 + $0x28] sm:$0xff] (!%p246_p3)  ;;  %v536_v21 = vld [vmem:[%s1277_s3 + $0x30] sm:$0xff] (!%p246_p3) }
   0xc   : > { %v537_v22 = vld [vmem:[%s1277_s3 + $0x38] sm:$0xff] (!%p246_p3)  ;;  %v586_v23 = vld [vmem:[%s1278_s4] sm:$0xff] (!%p246_p3)  ;;  %v587_v24 = vld [vmem:[%s1278_s4 + $0x8] sm:$0xff] (!%p246_p3)  ;;  %v1197_v48 = vmul.u32.u64.low (!%p246_p3), 2863311531, %v644_v46  ;;  %v1198_v49 = vmul.u32.u64.high 2863311531, %v644_v46, %v1197_v48 }
   0xd   : > { %v588_v25 = vld [vmem:[%s1278_s4 + $0x10] sm:$0xff] (!%p246_p3)  ;;  %v589_v26 = vld [vmem:[%s1278_s4 + $0x18] sm:$0xff] (!%p246_p3)  ;;  %v590_v27 = vld [vmem:[%s1278_s4 + $0x20] sm:$0xff] (!%p246_p3) }
   0xe   : > { %s1287_s18 = smov (!%p297_p4, %s1016_s18), 1  ;;  %v591_v28 = vld [vmem:[%s1278_s4 + $0x28] sm:$0xff]  ;;  %v592_v29 = vld [vmem:[%s1278_s4 + $0x30] sm:$0xff]  ;;  %v593_v30 = vld [vmem:[%s1278_s4 + $0x38] sm:$0xff]  ;;  %v651_v53 = vshrl.u32 %v1198_v49, 2 }
   0xf   : > { %s922_s22 = sshll.u32 %s1287_s18, 3  ;;  %v1000_v34 = vld [vmem:[%s1275_s1 + $0x8] sm:$0xff]   ;;  %v1001_v35 = vld [vmem:[%s1275_s1 + $0x18] sm:$0xff]  }
  0x10   : > { %s301_s25 = scalar_lea.vmem %s1274_s0, %s922_s22  ;;  %s923_s22 = sshll.u32 %s1287_s18, 5  ;;  %v652_v55 = vmul.u32 6, %v651_v53 }
  0x11   : > { %v997_v0 = vld [vmem:[%s301_s25] sm:$0xff]   ;;  %s1179_s25 = scalar_lea.vmem %s1279_s5, %s923_s22  ;;  %s1030_s18 = smov 7  }
  0x12   : > { %344 = vrot.lane.b32.xlu0 %v997_v0, %s1026_s26  ;;  %348 = vrot.lane.b32.xlu1 %v997_v0, %s1027_s27  ;;  %677 = vst.msk [vmem:[%s1179_s25 + $0x8] sm:$0xf] %vm674_vm1, %v1029_v5  ;;  %675 = vst.msk [vmem:[%s1179_s25] sm:$0xf] %vm674_vm1, %v1029_v5  ;;  %v653_v57 = vsub.s32 %v644_v46, %v652_v55 }
  0x13   : > { %676 = vst.msk [vmem:[%s1179_s25 + $0x4] sm:$0xf] %vm674_vm1, %v1029_v5  ;;  %678 = vst.msk [vmem:[%s1179_s25 + $0xc] sm:$0xf] %vm674_vm1, %v1029_v5 }
  0x14   : > { %679 = vst.msk [vmem:[%s1179_s25 + $0x10] sm:$0xf] %vm674_vm1, %v1029_v5  ;;  %680 = vst.msk [vmem:[%s1179_s25 + $0x14] sm:$0xf] %vm674_vm1, %v1029_v5  ;;  %vm656_vm2 = vcmp.ne.s32.totalorder %v653_v57, 0  ;;  %vm657_vm3 = vcmp.lt.s32.totalorder %v653_v57, 0 }
  0x15   : > { %681 = vst.msk [vmem:[%s1179_s25 + $0x18] sm:$0xf] %vm674_vm1, %v1029_v5  ;;  %682 = vst.msk [vmem:[%s1179_s25 + $0x1c] sm:$0xf] %vm674_vm1, %v1029_v5  ;;  %v659_v60 = vadd.s32 6, %v653_v57 }
  0x16   : > { %346 = vrot.lane.b32.xlu0 %v997_v0, %s1028_s28  ;;  %vm658_vm4 = vmand %vm657_vm3, %vm656_vm2 }
  0x17   : > { %v660_v1 = vsel %vm658_vm4, %v659_v60, %v653_v57 }
  0x18   : > { %vm661_vm5 = vcmp.ge.s32.totalorder %v660_v1, 1  ;;  %vm662_vm6 = vcmp.le.s32.totalorder %v660_v1, 4 }
  0x19   : > { %vm1204_vm7 = vmand %vm661_vm5, %vm662_vm6 }
  0x84   : > { %v345_v3 = vpop.permute.xlu0 %344  ;;  %v349_v4 = vpop.permute.xlu1 %348 }
  0x85   : > { %426 = vrot.lane.b32.xlu1 %v345_v3, %s1027_s27  ;;  %940 = vmatprep.subr.bf16.mxu0 %v349_v4 }
  0x86   : > { %956 = vmatprep.subr.bf16.mxu1 %v349_v4  ;;  %941 = vmatpush3.bf16.msra.mxu0 %v349_v4 }
  0x87   : > { %960 = vmatpush3.bf16.msra.mxu1 %v349_v4 }
  0x88   : > { %v347_v6 = vpop.permute.xlu0 %346 }
  0x89   : > { %428 = vrot.lane.b32.xlu0 %v347_v6, %s1027_s27  ;;  %430 = vrot.lane.b32.xlu1 %v349_v4, %s1027_s27 }
  0x8d   : > { %373 = vperm.xlu1 %996, %v359_v7   ;;  %368 = vperm.xlu0 %995, %v358_v8  }
  0x91   : > { %378 = vperm.xlu1 %996, %v360_v9   ;;  %383 = vperm.xlu0 %995, %v361_v10  }
  0x95   : > { %388 = vperm.xlu1 %996, %v362_v11   ;;  %393 = vperm.xlu0 %995, %v363_v12  }
  0x99   : > { %398 = vperm.xlu1 %996, %v364_v13   ;;  %403 = vperm.xlu0 %995, %v365_v14  }
  0x9d   : > { %540 = vperm.xlu1 %996, %v530_v15   ;;  %545 = vperm.xlu0 %995, %v531_v16  }
  0xa1   : > { %550 = vperm.xlu1 %996, %v532_v17   ;;  %555 = vperm.xlu0 %995, %v533_v18  }
  0xa5   : > { %560 = vperm.xlu1 %996, %v534_v19   ;;  %565 = vperm.xlu0 %995, %v535_v20  }
  0xa9   : > { %570 = vperm.xlu1 %996, %v536_v21   ;;  %575 = vperm.xlu0 %995, %v537_v22  }
  0xad   : > { %596 = vperm.xlu1 %996, %v586_v23   ;;  %601 = vperm.xlu0 %995, %v587_v24  }
  0xb1   : > { %606 = vperm.xlu1 %996, %v588_v25   ;;  %611 = vperm.xlu0 %995, %v589_v26  }
  0xb5   : > { %616 = vperm.xlu1 %996, %v590_v27   ;;  %621 = vperm.xlu0 %995, %v591_v28  }
  0xb9   : > { %626 = vperm.xlu1 %996, %v592_v29   ;;  %631 = vperm.xlu0 %995, %v593_v30  }
  0xf7   : > { %v427_v31 = vpop.permute.xlu1 %426 }
  0xf8   : > { %942 = vmatprep.subr.bf16.mxu0 %v427_v31  ;;  %957 = vmatprep.subr.bf16.mxu1 %v427_v31 }
  0xf9   : > { %943 = vmatpush3.bf16.msra.mxu0 %v427_v31  ;;  %961 = vmatpush3.bf16.msra.mxu1 %v427_v31 }
  0xfb   : > { %v429_v32 = vpop.permute.xlu0 %428  ;;  %v431_v33 = vpop.permute.xlu1 %430 }
  0xfc   : > { %944 = vmatprep.subr.bf16.mxu0 %v429_v32  ;;  %958 = vmatprep.subr.bf16.mxu1 %v429_v32 }
  0xfd   : > { %945 = vmatpush3.bf16.msra.mxu0 %v429_v32  ;;  %962 = vmatpush3.bf16.msra.mxu1 %v429_v32 }
  0xfe   : > { %946 = vmatprep.subr.bf16.mxu0 %v431_v33  ;;  %959 = vmatprep.subr.bf16.mxu1 %v431_v33 }
 0x101   : > { %947 = vmatpush3.bf16.msra.mxu0 %v431_v33  ;;  %963 = vmatpush3.bf16.msra.mxu1 %v431_v33 }
 0x104   : > { %949 = vmatmul.mubr.msk.bf16.vlgmr.msra.gmra.mrb[0].mxu0 %vm436_vm0, %v1000_v34  ;;  %953 = vmatmul.mubr.msk.bf16.vlgmr.msra.gmra.mrb[0].mxu1 %vm436_vm0, %v1001_v35 }
 0x10c   : > { %v374_v36 = vpop.permute.xlu1 %373  ;;  %v369_v37 = vpop.permute.xlu0 %368 }
 0x110   : > { %v379_v38 = vpop.permute.xlu1 %378  ;;  %v384_v39 = vpop.permute.xlu0 %383 }
 0x114   : > { %v389_v40 = vpop.permute.xlu1 %388  ;;  %v394_v42 = vpop.permute.xlu0 %393 }
 0x118   : > { %v399_v44 = vpop.permute.xlu1 %398  ;;  %v404_v45 = vpop.permute.xlu0 %403 }
 0x11c   : > { %v541_v47 = vpop.permute.xlu1 %540  ;;  %v546_v50 = vpop.permute.xlu0 %545 }
 0x120   : > { %v551_v51 = vpop.permute.xlu1 %550  ;;  %v556_v52 = vpop.permute.xlu0 %555 }
 0x124   : > { %v561_v54 = vpop.permute.xlu1 %560  ;;  %v566_v56 = vpop.permute.xlu0 %565 }
 0x128   : > { %v571_v58 = vpop.permute.xlu1 %570  ;;  %v1201_v59 = vpop.permute.xlu0 %575 }
 0x12c   : > { %v597_v61 = vpop.permute.xlu1 %596  ;;  %v602_v62 = vpop.permute.xlu0 %601 }
 0x130   : > { %v607_v16 = vpop.permute.xlu1 %606  ;;  %v612_v24 = vpop.permute.xlu0 %611 }
 0x1d7   : > { %v950_v63 = vpop.f32.mrb[0].mxu0  ;;  %v954_v0 = vpop.f32.mrb[0].mxu1 }
 0x1d8   : > { %v492_v2 = vadd.f32 %v950_v63, %v379_v38  ;;  %v508_v3 = vadd.f32 %v954_v0, %v399_v44  ;;  %v483_v4 = vpop.f32.mrb[1].mxu0  ;;  %v499_v6 = vpop.f32.mrb[1].mxu1 }
 0x1d9   : > { %v484_v7 = vadd.f32 %v483_v4, %v369_v37  ;;  %v500_v8 = vadd.f32 %v499_v6, %v389_v40  ;;  %v951_v9 = vpop.f32.mrb[2].mxu0  ;;  %v955_v10 = vpop.f32.mrb[2].mxu1 }
 0x1da   : > { %v516_v11 = vmul.f32 0.2, %v492_v2  ;;  %v495_v12 = vadd.f32 %v951_v9, %v384_v39  ;;  %v511_v13 = vadd.f32 %v955_v10, %v404_v45  ;;  %v486_v14 = vpop.f32.mrb[3].mxu0  ;;  %v502_v15 = vpop.f32.mrb[3].mxu1  ;;  %v520_v22 = vmul.f32 0.2, %v508_v3 }
 0x1db   : > { %v514_v17 = vmul.f32 0.2, %v484_v7  ;;  %v518_v18 = vmul.f32 0.2, %v500_v8  ;;  %v487_v19 = vadd.f32 %v486_v14, %v374_v36  ;;  %v503_v20 = vadd.f32 %v502_v15, %v394_v42  ;;  %v617_v40 = vpop.permute.xlu1 %616 }
 0x1dc   : > { %v524_v21 = vmax.f32 %v492_v2, %v516_v11  ;;  %v517_v23 = vmul.f32 0.2, %v495_v12  ;;  %v521_v31 = vmul.f32 0.2, %v511_v13  ;;  %v528_v36 = vmax.f32 %v508_v3, %v520_v22 }
 0x1dd   : > { %v522_v25 = vmax.f32 %v484_v7, %v514_v17  ;;  %v526_v26 = vmax.f32 %v500_v8, %v518_v18  ;;  %v515_v27 = vmul.f32 0.2, %v487_v19  ;;  %v519_v28 = vmul.f32 0.2, %v503_v20 }
 0x1de   : > { %v580_v29 = vmul.f32 %v551_v51, %v524_v21  ;;  %v525_v30 = vmax.f32 %v495_v12, %v517_v23  ;;  %v529_v43 = vmax.f32 %v511_v13, %v521_v31  ;;  %v584_v51 = vmul.f32 %v571_v58, %v528_v36 }
 0x1df   : > { %v578_v32 = vmul.f32 %v541_v47, %v522_v25  ;;  %v523_v33 = vmax.f32 %v487_v19, %v515_v27  ;;  %v527_v34 = vmax.f32 %v503_v20, %v519_v28  ;;  %v582_v37 = vmul.f32 %v561_v54, %v526_v26  ;;  %v622_v47 = vpop.permute.xlu0 %621  ;;  %v627_v60 = vpop.permute.xlu1 %626 }
 0x1e0   : > { %v581_v38 = vmul.f32 %v556_v52, %v525_v30  ;;  %v636_v39 = vadd.f32 %v607_v16, %v580_v29  ;;  %v585_v55 = vmul.f32 %v1201_v59, %v529_v43 }
 0x1e1   : > { %v579_v41 = vmul.f32 %v546_v50, %v523_v33  ;;  %v634_v42 = vadd.f32 %v597_v61, %v578_v32  ;;  %v583_v44 = vmul.f32 %v566_v56, %v527_v34  ;;  %v638_v54 = vadd.f32 %v617_v40, %v582_v37 }
 0x1e2   : > { %v668_v45 = vsel %vm1204_vm7, %v636_v39, 0.0  ;;  %v637_v46 = vadd.f32 %v612_v24, %v581_v38 }
 0x1e3   : > { %v926_v48 = vpack.c.bf16 %v668_v45, %v668_v45  ;;  %v635_v49 = vadd.f32 %v602_v62, %v579_v41  ;;  %v666_v52 = vsel %vm1204_vm7, %v634_v42, 0.0  ;;  %v639_v57 = vadd.f32 %v622_v47, %v583_v44  ;;  %v632_v63 = vpop.permute.xlu0 %631 }
 0x1e4   : > { %v669_v53 = vsel %vm1204_vm7, %v637_v46, 0.0  ;;  %v924_v61 = vpack.c.bf16 %v666_v52, %v666_v52  ;;  %v670_v58 = vsel %vm1204_vm7, %v638_v54, 0.0  ;;  %v640_v62 = vadd.f32 %v627_v60, %v584_v51 }
 0x1e5   : > { %711 = vrot.lane.b32.xlu1 %v926_v48, %s1030_s18  ;;  %v927_v50 = vpack.c.bf16 %v669_v53, %v669_v53  ;;  %v667_v56 = vsel %vm1204_vm7, %v635_v49, 0.0  ;;  %v671_v1 = vsel %vm1204_vm7, %v639_v57, 0.0  ;;  %v641_v2 = vadd.f32 %v632_v63, %v585_v55 }
 0x1e6   : > { %v925_v0 = vpack.c.bf16 %v667_v56, %v667_v56  ;;  %v928_v59 = vpack.c.bf16 %v670_v58, %v670_v58  ;;  %v672_v3 = vsel %vm1204_vm7, %v640_v62, 0.0  ;;  %v929_v4 = vpack.c.bf16 %v671_v1, %v671_v1 }
 0x1e7   : > { %713 = vrot.lane.b32.xlu0 %v927_v50, %s1030_s18  ;;  %v673_v6 = vsel %vm1204_vm7, %v641_v2, 0.0  ;;  %v930_v7 = vpack.c.bf16 %v672_v3, %v672_v3 }
 0x1e8   : > { %v931_v8 = vpack.c.bf16 %v673_v6, %v673_v6 }
 0x1e9   : > { %707 = vrot.lane.b32.xlu1 %v924_v61, %s1030_s18 }
 0x1eb   : > { %709 = vrot.lane.b32.xlu0 %v925_v0, %s1030_s18 }
 0x1ed   : > { %715 = vrot.lane.b32.xlu1 %v928_v59, %s1030_s18 }
 0x1ef   : > { %717 = vrot.lane.b32.xlu0 %v929_v4, %s1030_s18 }
 0x1f1   : > { %719 = vrot.lane.b32.xlu1 %v930_v7, %s1030_s18 }
 0x1f3   : > { %721 = vrot.lane.b32.xlu0 %v931_v8, %s1030_s18 }
 0x257   : > { %v712_v9 = vpop.permute.xlu1 %711 }
 0x258   : > { %734 = vst.msk [vmem:[%s1179_s25 + $0x8] sm:$0xf] %vm731_vm8, %v712_v9 }
 0x259   : > { %743 = vst.msk [vmem:[%s1179_s25 + $0x8] sm:$0xf] %vm740_vm9, %v1029_v5  ;;  %v714_v10 = vpop.permute.xlu0 %713 }
 0x25a   : > { %735 = vst.msk [vmem:[%s1179_s25 + $0xc] sm:$0xf] %vm731_vm8, %v714_v10 }
 0x25b   : > { %744 = vst.msk [vmem:[%s1179_s25 + $0xc] sm:$0xf] %vm740_vm9, %v1029_v5  ;;  %v708_v11 = vpop.permute.xlu1 %707 }
 0x25c   : > { %732 = vst.msk [vmem:[%s1179_s25] sm:$0xf] %vm731_vm8, %v708_v11 }
 0x25d   : > { %741 = vst.msk [vmem:[%s1179_s25] sm:$0xf] %vm740_vm9, %v1029_v5  ;;  %v710_v12 = vpop.permute.xlu0 %709 }
 0x25e   : > { %733 = vst.msk [vmem:[%s1179_s25 + $0x4] sm:$0xf] %vm731_vm8, %v710_v12 }
 0x25f   : > { %742 = vst.msk [vmem:[%s1179_s25 + $0x4] sm:$0xf] %vm740_vm9, %v1029_v5  ;;  %v716_v13 = vpop.permute.xlu1 %715 }
 0x260   : > { %736 = vst.msk [vmem:[%s1179_s25 + $0x10] sm:$0xf] %vm731_vm8, %v716_v13 }
 0x261   : > { %745 = vst.msk [vmem:[%s1179_s25 + $0x10] sm:$0xf] %vm740_vm9, %v1029_v5  ;;  %v718_v14 = vpop.permute.xlu0 %717 }
 0x262   : > { %737 = vst.msk [vmem:[%s1179_s25 + $0x14] sm:$0xf] %vm731_vm8, %v718_v14 }
 0x263   : > { %746 = vst.msk [vmem:[%s1179_s25 + $0x14] sm:$0xf] %vm740_vm9, %v1029_v5  ;;  %v720_v15 = vpop.permute.xlu1 %719 }
 0x264   : > { %738 = vst.msk [vmem:[%s1179_s25 + $0x18] sm:$0xf] %vm731_vm8, %v720_v15 }
 0x265   : > { %747 = vst.msk [vmem:[%s1179_s25 + $0x18] sm:$0xf] %vm740_vm9, %v1029_v5  ;;  %v722_v16 = vpop.permute.xlu0 %721 }
 0x266   : > { %739 = vst.msk [vmem:[%s1179_s25 + $0x1c] sm:$0xf] %vm731_vm8, %v722_v16 }
 0x267   : > { %748 = vst.msk [vmem:[%s1179_s25 + $0x1c] sm:$0xf] %vm740_vm9, %v1029_v5 }
 0x268 PF: > { %s15_s20 = sadd.s32 1, %s1024_s20   ;;  %s1282_s18 = smov %s1020_s19 }
 0x269   : > { %p12_p5 = scmp.ge.s32.totalorder %s15_s20, 4   ;;  %s1283_s19 = smov %s1285_s21 }
 0x26b   :  { %14 = sbr.rel (!%p12_p5) target bundleno = 2 (0x2), region = 82 }

// kernel: tile.38
= control target key start
LH: loop header
LB: loop body
LE: loop exit
PB: predicated region body
PF: predicated region fallthrough
CT: control target
= control target key end

     0   :  { %s22_s0 = inlined_call_operand.vmem [shape: f32[4], index: 0, kind: input, shape index: {}]   ;;  %s23_s1 = inlined_call_operand.vmem [shape: f32[4,4], index: 1, kind: output, shape index: {}]  }
   0x1   :  { %v4_v0 = vld [vmem:[%s22_s0] ss:$0 sm:$0xff] }
   0x2   :  { %5 = vst [vmem:[%s23_s1] sm:$0xf] %v4_v0 }

// kernel: tile.3
= control target key start
LH: loop header
LB: loop body
LE: loop exit
PB: predicated region body
PF: predicated region fallthrough
CT: control target
= control target key end

     0   :  { %s34_s8 = smov 125   ;;  %vm7_vm0 = vcmask 7168   ;;  %s35_s11 = smov 126   ;;  %s61_s0 = inlined_call_operand.vmem [shape: f32[4,4], index: 0, kind: input, shape index: {}]   ;;  %s62_s1 = inlined_call_operand.vmem [shape: f32[16,1], index: 1, kind: output, shape index: {}]  }
   0x1   :  { %v4_v0 = vld [vmem:[%s61_s0] sm:$0xf]  ;;  %s33_s0 = smov 127  }
   0x2   :  { %5 = vst [vmem:[#allocation0] sm:$0xf] %v4_v0 }
   0x9   :  { %v9_v1 = vld [vmem:[#allocation0] sm:$0xf]  }
   0xa   :  { %v21_v2 = vld [vmem:[#allocation0] sm:$0xf]   ;;  %10 = vrot.lane.b32.xlu0 %v9_v1, %s33_s0 }
   0xb   :  { %22 = vrot.lane.b32.xlu1 %v21_v2, %s34_s8  ;;  %v6_v3 = vld [vmem:[#allocation0] sm:$0xf]  }
   0xc   :  { %v15_v4 = vld [vmem:[#allocation0] sm:$0xf]   ;;  %8 = vst.msk [vmem:[%s62_s1] ss:$4 sm:$0xf] %vm7_vm0, %v6_v3  }
   0xe   :  { %16 = vrot.lane.b32.xlu0 %v15_v4, %s35_s11 }
  0x7c   :  { %v11_v5 = vpop.permute.xlu0 %10  }
  0x7d   :  { %v23_v6 = vpop.permute.xlu1 %22   ;;  %27 = vst.msk [vmem:[%s62_s1 + $0x1] ss:$4 sm:$0xf] %vm7_vm0, %v11_v5  }
  0x7e   :  { %29 = vst.msk [vmem:[%s62_s1 + $0x3] ss:$4 sm:$0xf] %vm7_vm0, %v23_v6  }
  0x80   :  { %v17_v7 = vpop.permute.xlu0 %16  }
  0x81   :  { %28 = vst.msk [vmem:[%s62_s1 + $0x2] ss:$4 sm:$0xf] %vm7_vm0, %v17_v7  }

// kernel: vanilla_ae_forward_pallas.22
= control target key start
LH: loop header
LB: loop body
LE: loop exit
PB: predicated region body
PF: predicated region fallthrough
CT: control target
= control target key end

     0   :  { %s716_s18 = smov 0   ;;  %s718_s19 = smov 0   ;;  %s787_s0 = inlined_call_operand.vmem [shape: bf16[2,16,100], index: 0, kind: input, shape index: {}]   ;;  %s788_s1 = inlined_call_operand.vmem [shape: bf16[8,144], index: 1, kind: input, shape index: {}]   ;;  %s789_s2 = inlined_call_operand.vmem [shape: f32[8,1], index: 2, kind: input, shape index: {}]   ;;  %s790_s3 = inlined_call_operand.vmem [shape: f32[8,1], index: 3, kind: input, shape index: {}]   ;;  %s791_s4 = inlined_call_operand.vmem [shape: f32[8,1], index: 4, kind: input, shape index: {}]   ;;  %s792_s5 = inlined_call_operand.vmem [shape: bf16[2,8,100], index: 5, kind: output, shape index: {}]  }
   0x1   :  { %s720_s20 = smov 0  }
   0x2 LB: > { %s27_s21 = sadd.s32 1, %s670_s19  ;;  %p598_p0 = scmp.ge.s32.totalorder %s674_s20, 1  ;;  %s674_s20 = sphi %s720_s20, %s15_s20   ;;  %s670_s19 = sphi %s718_s19, %s794_s19   ;;  %s666_s18 = sphi %s716_s18, %s793_s18  }
   0x3   : > { %p29_p1 = scmp.ge.s32.totalorder %s27_s21, 2  ;;  %p238_p2 = scmp.lt.s32.totalorder %s674_s20, 3 }
   0x5   : > { %s796_s21 = smov (%p29_p1, %s27_s21), 0  ;;  %p239_p3 = pnand %p598_p0, %p238_p2 }
   0x6   : > { %p285_p4 = scmp.lt.s32.totalorder (!%p239_p3), %s666_s18, 1  ;;  %v676_v0 = vmov (!%p239_p3), 0   ;;  %s677_s26 = smov (!%p239_p3), 127   ;;  %v347_v2 = vld [vmem:[%s788_s1] sm:$0xff] (!%p239_p3)  ;;  %vm360_vm0 = vcmask (!%p239_p3), 130048   ;;  %vm445_vm1 = vcmask (!%p239_p3), 84992   ;;  %v420_v16 = vlaneseq (!%p239_p3) }
   0x7   : > { %242 = sbr.rel (%p239_p3) target bundleno = 506 (0x1fa), region = 40  ;;  %364 = vmatprep.subr.bf16.mxu0 (!%p239_p3), %v676_v0  ;;  %648 = vset.pattern.permute.xlu1 (!%p239_p3), %v676_v0  ;;  %s678_s27 = smov (!%p239_p3), 118   ;;  %v604_v3 = vcombine.high (!%p239_p3), %v347_v2, %v347_v2  ;;  %v406_v4 = vld [vmem:[%s790_s3] sm:$0xff] (!%p239_p3)  ;;  %v603_v15 = vcombine.low (!%p239_p3), %v347_v2, %v347_v2  ;;  %vm454_vm8 = vcmask (!%p239_p3), 724056   ;;  %vm456_vm9 = vcmask (!%p239_p3), 814792  }
   0x8   : > { %647 = vset.pattern.permute.xlu0 (!%p239_p3), %v676_v0  ;;  %s679_s28 = smov (!%p239_p3), 126   ;;  %s680_s29 = smov (!%p239_p3), 117   ;;  %v348_v5 = vld [vmem:[%s789_s2] sm:$0xff] (!%p239_p3)  ;;  %v421_v17 = vand.u32 (!%p239_p3), 127, %v420_v16 }
   0x9   : > { %s681_s30 = smov (!%p239_p3), 116   ;;  %s682_s6 = smov (!%p239_p3), 108   ;;  %605 = vmatprep.mubr.msk.bf16.mxu0 (!%p239_p3), %vm360_vm0, %v604_v3  ;;  %v413_v6 = vld [vmem:[%s791_s4] sm:$0xff] (!%p239_p3) }
   0xa   : > { %s683_s7 = smov (!%p239_p3), 107   ;;  %s684_s8 = smov (!%p239_p3), 106   ;;  %v422_v18 = vadd.s32 (!%p239_p3), 1, %v421_v17 }
   0xc   : > { %v771_v19 = vmul.u32.u64.low (!%p239_p3), 3435973837, %v422_v18  ;;  %v772_v20 = vmul.u32.u64.high 3435973837, %v422_v18, %v771_v19 }
   0xe   : > { %s798_s18 = smov (!%p285_p4, %s666_s18), 1  ;;  %v429_v21 = vshrl.u32 %v772_v20, 3 }
   0xf   : > { %s609_s22 = sshll.u32 %s798_s18, 3  ;;  %s601_s17 = sshll.u32 %s798_s18, 2 }
  0x10   : > { %s289_s25 = scalar_lea.vmem %s787_s0, %s609_s22  ;;  %s767_s24 = scalar_lea.vmem %s792_s5, %s601_s17  ;;  %v430_v22 = vmul.u32 10, %v429_v21 }
  0x11   : > { %v649_v1 = vld [vmem:[%s289_s25] sm:$0xff]   ;;  %446 = vst.msk [vmem:[%s767_s24] sm:$0xf] %vm445_vm1, %v676_v0  ;;  %s685_s18 = smov 11  }
  0x12   : > { %323 = vrot.lane.b32.xlu0 %v649_v1, %s677_s26  ;;  %329 = vrot.lane.b32.xlu1 %v649_v1, %s678_s27  ;;  %v431_v23 = vsub.s32 %v422_v18, %v430_v22 }
  0x13   : > { %365 = vmatpush1.bf16.msra.mxu0 %v649_v1 }
  0x14   : > { %366 = vmatprep.subr.bf16.mxu0 %v676_v0  ;;  %vm434_vm2 = vcmp.ne.s32.totalorder %v431_v23, 0  ;;  %vm435_vm3 = vcmp.lt.s32.totalorder %v431_v23, 0  ;;  %v437_v25 = vadd.s32 10, %v431_v23 }
  0x15   : > { %vm436_vm4 = vmand %vm435_vm3, %vm434_vm2 }
  0x16   : > { %326 = vrot.lane.b32.xlu0 %v649_v1, %s679_s28  ;;  %332 = vrot.lane.b32.xlu1 %v649_v1, %s680_s29  ;;  %v438_v31 = vsel %vm436_vm4, %v437_v25, %v431_v23 }
  0x17   : > { %vm439_vm5 = vcmp.ge.s32.totalorder %v438_v31, 1  ;;  %vm440_vm6 = vcmp.le.s32.totalorder %v438_v31, 8 }
  0x18   : > { %vm441_vm7 = vmand %vm439_vm5, %vm440_vm6 }
  0x1a   : > { %335 = vrot.lane.b32.xlu0 %v649_v1, %s681_s30  ;;  %338 = vrot.lane.b32.xlu1 %v649_v1, %s682_s6 }
  0x1e   : > { %341 = vrot.lane.b32.xlu0 %v649_v1, %s683_s7  ;;  %344 = vrot.lane.b32.xlu1 %v649_v1, %s684_s8 }
  0x22   : > { %409 = vperm.xlu1 %648, %v406_v4   ;;  %351 = vperm.xlu0 %647, %v348_v5  }
  0x26   : > { %416 = vperm.xlu1 %648, %v413_v6  }
  0x84   : > { %v324_v7 = vpop.permute.xlu0 %323  ;;  %v330_v9 = vpop.permute.xlu1 %329 }
  0x85   : > { %367 = vmatpush1.bf16.msra.mxu0 %v324_v7 }
  0x86   : > { %368 = vmatprep.subr.bf16.mxu0 %v676_v0 }
  0x88   : > { %v327_v8 = vpop.permute.xlu0 %326  ;;  %v333_v10 = vpop.permute.xlu1 %332 }
  0x89   : > { %369 = vmatpush1.bf16.msra.mxu0 %v327_v8 }
  0x8a   : > { %370 = vmatprep.subr.bf16.mxu0 %v676_v0 }
  0x8c   : > { %v336_v11 = vpop.permute.xlu0 %335  ;;  %v339_v12 = vpop.permute.xlu1 %338 }
  0x8d   : > { %371 = vmatpush1.bf16.msra.mxu0 %v330_v9 }
  0x8e   : > { %372 = vmatprep.subr.bf16.mxu0 %v676_v0 }
  0x90   : > { %v342_v13 = vpop.permute.xlu0 %341  ;;  %v345_v14 = vpop.permute.xlu1 %344 }
  0x91   : > { %373 = vmatpush1.bf16.msra.mxu0 %v333_v10 }
  0x92   : > { %374 = vmatprep.subr.bf16.mxu0 %v676_v0 }
  0x95   : > { %375 = vmatpush1.bf16.msra.mxu0 %v336_v11 }
  0x96   : > { %376 = vmatprep.subr.bf16.mxu0 %v676_v0 }
  0x99   : > { %377 = vmatpush1.bf16.msra.mxu0 %v339_v12 }
  0x9a   : > { %378 = vmatprep.subr.bf16.mxu0 %v676_v0 }
  0x9d   : > { %379 = vmatpush1.bf16.msra.mxu0 %v342_v13 }
  0x9e   : > { %380 = vmatprep.subr.bf16.mxu0 %v676_v0 }
  0xa1   : > { %381 = vmatpush1.bf16.msra.mxu0 %v345_v14  ;;  %v352_v24 = vpop.permute.xlu0 %351  ;;  %v410_v29 = vpop.permute.xlu1 %409 }
  0xa4   : > { %397 = vmatmul.mubr.bf16.vlgmr.msra.gmra.mrb[0].mxu0 %v603_v15 }
  0xa5   : > { %v417_v36 = vpop.permute.xlu1 %416 }
 0x177   : > { %v398_v26 = vpop.f32.mrb[0].mxu0 }
 0x178   : > { %v399_v27 = vadd.f32 %v398_v26, %v352_v24  ;;  %v400_v28 = vpop.f32.mrb[1].mxu0 }
 0x179   : > { %v401_v30 = vpop.f32.mrb[2].mxu0 }
 0x17a   : > { %v404_v32 = vmul.f32 0.2, %v399_v27  ;;  %v402_v33 = vpop.f32.mrb[3].mxu0 }
 0x17c   : > { %v405_v34 = vmax.f32 %v399_v27, %v404_v32 }
 0x17e   : > { %v412_v35 = vmul.f32 %v410_v29, %v405_v34 }
 0x180   : > { %v419_v37 = vadd.f32 %v417_v36, %v412_v35 }
 0x182   : > { %v444_v38 = vsel %vm441_vm7, %v419_v37, 0.0 }
 0x183   : > { %v610_v39 = vpack.c.bf16 %v444_v38, %v444_v38 }
 0x185   : > { %451 = vrot.lane.b32.xlu0 %v610_v39, %s685_s18 }
 0x1f7   : > { %v452_v40 = vpop.permute.xlu0 %451 }
 0x1f8   : > { %455 = vst.msk [vmem:[%s767_s24] sm:$0xf] %vm454_vm8, %v452_v40 }
 0x1f9   : > { %457 = vst.msk [vmem:[%s767_s24] sm:$0xf] %vm456_vm9, %v676_v0 }
 0x1fa PF: > { %s15_s20 = sadd.s32 1, %s674_s20   ;;  %s793_s18 = smov %s670_s19 }
 0x1fb   : > { %p12_p5 = scmp.ge.s32.totalorder %s15_s20, 4   ;;  %s794_s19 = smov %s796_s21 }
 0x1fd   :  { %14 = sbr.rel (!%p12_p5) target bundleno = 2 (0x2), region = 82 }

// kernel: vanilla_ae_forward_pallas.23
= control target key start
LH: loop header
LB: loop body
LE: loop exit
PB: predicated region body
PF: predicated region fallthrough
CT: control target
= control target key end

     0   :  { %s774_s18 = smov 0   ;;  %s776_s19 = smov 0   ;;  %s850_s0 = inlined_call_operand.vmem [shape: bf16[2,8,100], index: 0, kind: input, shape index: {}]   ;;  %s851_s1 = inlined_call_operand.vmem [shape: bf16[16,32], index: 1, kind: input, shape index: {}]   ;;  %s852_s2 = inlined_call_operand.vmem [shape: f32[16,1], index: 2, kind: input, shape index: {}]   ;;  %s853_s3 = inlined_call_operand.vmem [shape: f32[16,1], index: 3, kind: input, shape index: {}]   ;;  %s854_s4 = inlined_call_operand.vmem [shape: f32[16,1], index: 4, kind: input, shape index: {}]   ;;  %s855_s5 = inlined_call_operand.vmem [shape: bf16[2,16,100], index: 5, kind: output, shape index: {}]  }
   0x1   :  { %s778_s20 = smov 0  }
   0x2 LB: > { %s27_s21 = sadd.s32 1, %s731_s19  ;;  %p651_p0 = scmp.ge.s32.totalorder %s735_s20, 1  ;;  %s735_s20 = sphi %s778_s20, %s15_s20   ;;  %s731_s19 = sphi %s776_s19, %s857_s19   ;;  %s727_s18 = sphi %s774_s18, %s856_s18  }
   0x3   : > { %p29_p1 = scmp.ge.s32.totalorder %s27_s21, 2  ;;  %p244_p2 = scmp.lt.s32.totalorder %s735_s20, 3 }
   0x5   : > { %s859_s21 = smov (%p29_p1, %s27_s21), 0  ;;  %p245_p3 = pnand %p651_p0, %p244_p2 }
   0x6   : > { %p295_p4 = scmp.lt.s32.totalorder (!%p245_p3), %s727_s18, 1  ;;  %v737_v0 = vmov (!%p245_p3), 0.0   ;;  %s738_s26 = smov (!%p245_p3), 127   ;;  %vm741_vm0 = vmmov (!%p245_p3), 0   ;;  %v742_v3 = vmov (!%p245_p3), 0   ;;  %vm344_vm1 = vcmask (!%p245_p3), 1043456  }
   0x7   : > { %248 = sbr.rel (%p245_p3) target bundleno = 602 (0x25a), region = 40  ;;  %668 = vmatprep.subr.bf16.mxu0 (!%p245_p3), %v737_v0  ;;  %s739_s27 = smov (!%p245_p3), 117   ;;  %672 = vmatprep.mubr.msk.bf16.mxu0 (!%p245_p3), %vm741_vm0, %v737_v0  ;;  %v353_v7 = vld [vmem:[%s852_s2] sm:$0xff] (!%p245_p3)  ;;  %v354_v11 = vld [vmem:[%s852_s2 + $0x8] sm:$0xff] (!%p245_p3)  ;;  %vm378_vm2 = vcmask (!%p245_p3), 261120   ;;  %vm481_vm3 = vcmask (!%p245_p3), 84992   ;;  %v455_v18 = vlaneseq (!%p245_p3) }
   0x8   : > { %s740_s28 = smov (!%p245_p3), 118   ;;  %709 = vset.pattern.permute.xlu1 (!%p245_p3), %v742_v3  ;;  %710 = vset.pattern.permute.xlu0 (!%p245_p3), %v742_v3  ;;  %v427_v10 = vld [vmem:[%s853_s3] sm:$0xff] (!%p245_p3)  ;;  %v428_v12 = vld [vmem:[%s853_s3 + $0x8] sm:$0xff] (!%p245_p3)  ;;  %vm496_vm10 = vcmask (!%p245_p3), 724056   ;;  %vm499_vm11 = vcmask (!%p245_p3), 814792  }
   0x9   : > { %v441_v13 = vld [vmem:[%s854_s4] sm:$0xff] (!%p245_p3)  ;;  %v442_v14 = vld [vmem:[%s854_s4 + $0x8] sm:$0xff] (!%p245_p3)  ;;  %v456_v19 = vand.u32 (!%p245_p3), 127, %v455_v18 }
   0xa   : > { %v712_v17 = vld [vmem:[%s851_s1] sm:$0xff] (!%p245_p3)  }
   0xb   : > { %v457_v20 = vadd.s32 (!%p245_p3), 1, %v456_v19 }
   0xd   : > { %v831_v21 = vmul.u32.u64.low (!%p245_p3), 3435973837, %v457_v20  ;;  %v832_v22 = vmul.u32.u64.high 3435973837, %v457_v20, %v831_v21 }
   0xe   : > { %s861_s18 = smov (!%p295_p4, %s727_s18), 1 }
   0xf   : > { %s652_s22 = sshll.u32 %s861_s18, 2  ;;  %v464_v23 = vshrl.u32 %v832_v22, 3 }
  0x10   : > { %s298_s25 = scalar_lea.vmem %s850_s0, %s652_s22  ;;  %s662_s22 = sshll.u32 %s861_s18, 3 }
  0x11   : > { %v334_v1 = vld [vmem:[%s298_s25] sm:$0xf]  ;;  %s825_s25 = scalar_lea.vmem %s855_s5, %s662_s22  ;;  %v465_v24 = vmul.u32 10, %v464_v23  ;;  %s743_s18 = smov 11  }
  0x12   : > { %v655_v2 = vcombine.low %v334_v1, %v334_v1  ;;  %482 = vst.msk [vmem:[%s825_s25] sm:$0xf] %vm481_vm3, %v742_v3  ;;  %483 = vst.msk [vmem:[%s825_s25 + $0x4] sm:$0xf] %vm481_vm3, %v742_v3 }
  0x13   : > { %v466_v26 = vsub.s32 %v457_v20, %v465_v24 }
  0x14   : > { %338 = vrot.lane.b32.xlu0 %v655_v2, %s738_s26  ;;  %342 = vrot.lane.b32.xlu1 %v655_v2, %s739_s27 }
  0x15   : > { %vm469_vm4 = vcmp.ne.s32.totalorder %v466_v26, 0  ;;  %vm470_vm5 = vcmp.lt.s32.totalorder %v466_v26, 0  ;;  %v472_v28 = vadd.s32 10, %v466_v26 }
  0x16   : > { %vm471_vm6 = vmand %vm470_vm5, %vm469_vm4 }
  0x17   : > { %v473_v34 = vsel %vm471_vm6, %v472_v28, %v466_v26 }
  0x18   : > { %340 = vrot.lane.b32.xlu0 %v655_v2, %s740_s28  ;;  %vm474_vm7 = vcmp.ge.s32.totalorder %v473_v34, 1  ;;  %vm475_vm8 = vcmp.le.s32.totalorder %v473_v34, 8 }
  0x19   : > { %vm476_vm9 = vmand %vm474_vm7, %vm475_vm8 }
  0x86   : > { %v339_v4 = vpop.permute.xlu0 %338  ;;  %v343_v6 = vpop.permute.xlu1 %342 }
  0x87   : > { %v347_v5 = vsel %vm344_vm1, %v334_v1, %v339_v4 }
  0x88   : > { %372 = vrot.lane.b32.xlu1 %v347_v5, %s739_s27 }
  0x8a   : > { %v341_v8 = vpop.permute.xlu0 %340 }
  0x8b   : > { %v350_v9 = vsel %vm344_vm1, %v341_v8, %v343_v6 }
  0x8c   : > { %374 = vrot.lane.b32.xlu0 %v350_v9, %s739_s27  ;;  %357 = vperm.xlu1 %709, %v353_v7  }
  0x90   : > { %431 = vperm.xlu1 %709, %v427_v10   ;;  %362 = vperm.xlu0 %710, %v354_v11  }
  0x94   : > { %436 = vperm.xlu1 %709, %v428_v12   ;;  %445 = vperm.xlu0 %710, %v441_v13  }
  0x98   : > { %450 = vperm.xlu1 %709, %v442_v14  }
  0xfa   : > { %v373_v15 = vpop.permute.xlu1 %372 }
  0xfb   : > { %669 = vmatpush3.bf16.msra.mxu0 %v373_v15 }
  0xfc   : > { %670 = vmatprep.subr.bf16.mxu0 %v737_v0 }
  0xfe   : > { %v375_v16 = vpop.permute.xlu0 %374 }
  0xff   : > { %671 = vmatpush3.bf16.msra.mxu0 %v375_v16 }
 0x102   : > { %673 = vmatmul.mubr.msk.bf16.vlgmr.msra.gmra.mrb[0].mxu0 %vm378_vm2, %v712_v17 }
 0x10b   : > { %v358_v25 = vpop.permute.xlu1 %357 }
 0x10f   : > { %v432_v27 = vpop.permute.xlu1 %431  ;;  %v363_v32 = vpop.permute.xlu0 %362 }
 0x113   : > { %v437_v38 = vpop.permute.xlu1 %436  ;;  %v446_v43 = vpop.permute.xlu0 %445 }
 0x117   : > { %v451_v46 = vpop.permute.xlu1 %450 }
 0x1d5   : > { %v416_v29 = vpop.f32.mrb[0].mxu0 }
 0x1d6   : > { %v417_v30 = vadd.f32 %v416_v29, %v358_v25  ;;  %v674_v31 = vpop.f32.mrb[1].mxu0 }
 0x1d7   : > { %v419_v33 = vpop.f32.mrb[2].mxu0 }
 0x1d8   : > { %v423_v35 = vmul.f32 0.2, %v417_v30  ;;  %v420_v36 = vadd.f32 %v419_v33, %v363_v32  ;;  %v675_v37 = vpop.f32.mrb[3].mxu0 }
 0x1da   : > { %v425_v39 = vmax.f32 %v417_v30, %v423_v35  ;;  %v424_v40 = vmul.f32 0.2, %v420_v36 }
 0x1dc   : > { %v426_v41 = vmax.f32 %v420_v36, %v424_v40  ;;  %v439_v42 = vmul.f32 %v432_v27, %v425_v39 }
 0x1de   : > { %v440_v44 = vmul.f32 %v437_v38, %v426_v41  ;;  %v453_v45 = vadd.f32 %v446_v43, %v439_v42 }
 0x1e0   : > { %v479_v47 = vsel %vm476_vm9, %v453_v45, 0.0  ;;  %v454_v48 = vadd.f32 %v451_v46, %v440_v44 }
 0x1e1   : > { %v663_v49 = vpack.c.bf16 %v479_v47, %v479_v47 }
 0x1e2   : > { %v480_v50 = vsel %vm476_vm9, %v454_v48, 0.0 }
 0x1e3   : > { %490 = vrot.lane.b32.xlu0 %v663_v49, %s743_s18  ;;  %v664_v51 = vpack.c.bf16 %v480_v50, %v480_v50 }
 0x1e5   : > { %492 = vrot.lane.b32.xlu1 %v664_v51, %s743_s18 }
 0x255   : > { %v491_v52 = vpop.permute.xlu0 %490 }
 0x256   : > { %497 = vst.msk [vmem:[%s825_s25] sm:$0xf] %vm496_vm10, %v491_v52 }
 0x257   : > { %500 = vst.msk [vmem:[%s825_s25] sm:$0xf] %vm499_vm11, %v742_v3  ;;  %v493_v53 = vpop.permute.xlu1 %492 }
 0x258   : > { %498 = vst.msk [vmem:[%s825_s25 + $0x4] sm:$0xf] %vm496_vm10, %v493_v53 }
 0x259   : > { %501 = vst.msk [vmem:[%s825_s25 + $0x4] sm:$0xf] %vm499_vm11, %v742_v3 }
 0x25a PF: > { %s15_s20 = sadd.s32 1, %s735_s20   ;;  %s856_s18 = smov %s731_s19 }
 0x25b   : > { %p12_p5 = scmp.ge.s32.totalorder %s15_s20, 4   ;;  %s857_s19 = smov %s859_s21 }
 0x25d   :  { %14 = sbr.rel (!%p12_p5) target bundleno = 2 (0x2), region = 82 }

</bundles_post_ra>
